<compile_context>
chip_gen: v7x
topology: tpu7x:2x2x1
jax: 0.10.0
libtpu: 0.0.40
codegen_flags: <defaults>
</compile_context>

<pallas_src>
import numpy as np
import jax
import jax.numpy as jnp
from jax.experimental import pallas as pl
from jax.experimental.pallas import tpu as pltpu

EPS = 1e-5  # nn.InstanceNorm2d default eps (affine=False, no running stats)


def _upblock_kernel(x_ref, wf_ref, w2_ref, bs_ref, o_ref, y_stk):
    # x_ref : (1, H+2, W, 3*Ccat) bf16   dx-stacked, H-padded NHWC input
    # wf_ref: (3, 3*Ccat, 2*Cout) bf16   conv1 (dy-major, dx folded into K),
    #                                    skip 1x1 fused as the last Cout output
    #                                    columns of the dy=1 block
    # w2_ref: (3, 3*Cout, Cout)   bf16   conv2 (dy-major, dx folded into K)
    # bs_ref: (1, Cout)           f32    skip-conv bias
    # o_ref : (1, H, W, Cout)     f32
    # y_stk : VMEM scratch (H+2, W, 3*Cout) bf16, dx-stacked intermediate
    _, hp, w, k1 = x_ref.shape
    h = hp - 2
    c_out = o_ref.shape[-1]

    # ---- conv1 (3x3, pad=1) + fused skip 1x1: 3 dy-shifted MXU matmuls ----
    acc = jnp.zeros((h * w, 2 * c_out), jnp.float32)
    for dy in range(3):                                  # dy slice is along a
        xs = x_ref[0, dy:dy + h].reshape(h * w, k1)      # leading (untiled) dim
        acc = acc + jnp.dot(xs, wf_ref[dy],
                            preferred_element_type=jnp.float32)
    acc1 = acc[:, :c_out]                 # conv1 pre-norm (its bias is dead)
    skip = acc[:, c_out:] + bs_ref[...]   # fused skip 1x1 (+ its bias)

    # ---- InstanceNorm2d (affine=False) + ReLU, single-pass stats ----------
    m1 = jnp.mean(acc1, axis=0, keepdims=True)
    v1 = jnp.maximum(jnp.mean(acc1 * acc1, axis=0, keepdims=True) - m1 * m1,
                     0.0)
    y1 = jnp.maximum((acc1 - m1) * jax.lax.rsqrt(v1 + EPS), 0.0)
    y1 = y1.astype(y_stk.dtype).reshape(h, w, c_out)

    # ---- stage y1 dx-stacked for conv2 ------------------------------------
    # Halo rows 0 and H+1 must be zero; interior rows are fully rewritten each
    # grid step, so only the two halo rows are (cheaply) cleared here.
    zrow = jnp.zeros((1, w, 3 * c_out), y_stk.dtype)
    y_stk[0:1] = zrow
    y_stk[hp - 1:hp] = zrow
    zcol = jnp.zeros((h, 1, c_out), y_stk.dtype)
    y_dx0 = jnp.concatenate([zcol, y1[:, :w - 1, :]], axis=1)  # x-1 (left halo)
    y_dx2 = jnp.concatenate([y1[:, 1:, :], zcol], axis=1)      # x+1 (right halo)
    y_stk[1:1 + h] = jnp.concatenate([y_dx0, y1, y_dx2], axis=-1)

    # ---- conv2 (3x3, pad=1): 3 dy-shifted MXU matmuls, K = 3*Cout ---------
    acc2 = jnp.zeros((h * w, c_out), jnp.float32)
    for dy in range(3):
        ys = y_stk[dy:dy + h].reshape(h * w, 3 * c_out)
        acc2 = acc2 + jnp.dot(ys, w2_ref[dy],
                              preferred_element_type=jnp.float32)

    m2 = jnp.mean(acc2, axis=0, keepdims=True)
    v2 = jnp.maximum(jnp.mean(acc2 * acc2, axis=0, keepdims=True) - m2 * m2,
                     0.0)
    y2 = jnp.maximum((acc2 - m2) * jax.lax.rsqrt(v2 + EPS), 0.0)

    o_ref[0] = (y2 + skip).reshape(h, w, c_out)


def _bilinear_up_x2(x):
    """nn.Upsample(scale_factor=2, mode='bilinear', align_corners=False), NCHW."""
    _, _, h, w = x.shape

    def idx(n_in):
        dst = np.arange(2 * n_in, dtype=np.float64)
        src = np.maximum((dst + 0.5) * 0.5 - 0.5, 0.0)
        i0 = np.floor(src).astype(np.int32)
        i1 = np.minimum(i0 + 1, n_in - 1).astype(np.int32)
        lam = (src - i0).astype(np.float32)
        return jnp.asarray(i0), jnp.asarray(i1), jnp.asarray(lam)

    i0h, i1h, lh = idx(h)
    i0w, i1w, lw = idx(w)
    xh = (x[:, :, i0h, :] * (1.0 - lh)[None, None, :, None]
          + x[:, :, i1h, :] * lh[None, None, :, None])
    out = (xh[:, :, :, i0w] * (1.0 - lw)[None, None, None, :]
           + xh[:, :, :, i1w] * lw[None, None, None, :])
    return out


def _dx_stack(x_nhwc):
    """(N, H, W, C) -> (N, H+2, W, 3*C): zero-pad H and W by one pixel and
    stack the dx = 0, 1, 2 shifted copies along channels, so 3x3 convs only
    need dy (leading-dim) shifts inside the kernel."""
    _, _, w, _ = x_nhwc.shape
    xp = jnp.pad(x_nhwc, ((0, 0), (1, 1), (1, 1), (0, 0)))
    return jnp.concatenate(
        [xp[:, :, 0:w, :], xp[:, :, 1:w + 1, :], xp[:, :, 2:w + 2, :]],
        axis=-1)


def _vmem_limit_bytes(hp, w, k1, c_out):
    """Rough per-step VMEM need (lane/sublane padded, double-buffered I/O)."""
    pad128 = lambda c: -(-c // 128) * 128
    pad8 = lambda r: -(-r // 8) * 8
    h = hp - 2
    x_blk = hp * pad8(w) * pad128(k1) * 2                  # bf16 input block
    o_blk = h * pad8(w) * pad128(c_out) * 4                # f32 output block
    wts = (3 * k1 * pad128(2 * c_out) + 3 * 3 * c_out * pad128(c_out)) * 2 \
        + pad8(1) * pad128(c_out) * 4
    scr = hp * pad8(w) * pad128(3 * c_out) * 2             # bf16 staging scratch
    live = pad8(h * w) * (pad128(k1) * 2
                          + (pad128(2 * c_out) + pad128(3 * c_out)) * 4)
    est = 2 * (x_blk + o_blk + wts) + scr + live           # 2x: double buffers
    return int(min(max(2 * est, 32 * 1024 * 1024), 64 * 1024 * 1024))


def upblock_forward(inp, fb, params):
    """UpBlock.forward.  inp: (N, Cin, H, W), fb: (N, Cout, 2H, 2W); NCHW f32."""
    up = _bilinear_up_x2(inp)                      # (N, Cin, 2H, 2W)
    xcat = jnp.concatenate([up, fb], axis=1)       # (N, Ccat, 2H, 2W)
    x = jnp.transpose(xcat, (0, 2, 3, 1))          # NHWC (XLA fuses the whole
    x_stk = _dx_stack(x).astype(jnp.bfloat16)      #  prep into one HBM pass)
    n, hp, w, k1 = x_stk.shape
    h = hp - 2
    c_cat = x.shape[-1]
    c_out = params["w1"].shape[0]

    # conv weights: dy-major blocks, rows ordered (dx, cin) to match x_stk.
    # The skip 1x1 is fused as Cout extra output columns of the dy=1 block
    # (non-zero only in its dx=1 rows).  b1/b2 are mathematically dead under
    # affine=False InstanceNorm (mean subtraction cancels per-channel consts).
    w1t = jnp.transpose(params["w1"], (2, 3, 1, 0)).reshape(3, 3 * c_cat, c_out)
    ws_t = jnp.transpose(params["ws"][:, :, 0, 0], (1, 0))        # (Ccat, Cout)
    skip_cols = jnp.zeros((3, 3 * c_cat, c_out), jnp.float32)
    skip_cols = skip_cols.at[1, c_cat:2 * c_cat, :].set(ws_t)
    wf = jnp.concatenate([w1t, skip_cols], axis=-1).astype(jnp.bfloat16)
    w2t = jnp.transpose(params["w2"], (2, 3, 1, 0)
                        ).reshape(3, 3 * c_out, c_out).astype(jnp.bfloat16)
    bs = params["bs"].reshape(1, c_out).astype(jnp.float32)

    out_nhwc = pl.pallas_call(
        _upblock_kernel,
        out_shape=jax.ShapeDtypeStruct((n, h, w, c_out), jnp.float32),
        grid_spec=pltpu.PrefetchScalarGridSpec(
            num_scalar_prefetch=0,
            grid=(n,),
            in_specs=[
                pl.BlockSpec((1, hp, w, k1), lambda b: (b, 0, 0, 0)),
                pl.BlockSpec((3, 3 * c_cat, 2 * c_out), lambda b: (0, 0, 0)),
                pl.BlockSpec((3, 3 * c_out, c_out), lambda b: (0, 0, 0)),
                pl.BlockSpec((1, c_out), lambda b: (0, 0)),
            ],
            out_specs=pl.BlockSpec((1, h, w, c_out), lambda b: (b, 0, 0, 0)),
            scratch_shapes=[pltpu.VMEM((hp, w, 3 * c_out), jnp.bfloat16)],
        ),
        compiler_params=pltpu.CompilerParams(
            dimension_semantics=("parallel",),
            vmem_limit_bytes=_vmem_limit_bytes(hp, w, k1, c_out)),
    )(x_stk, wf, w2t, bs)
    # TODO(synk): for large spatial sizes (v7x: 64 MiB VMEM) add an H-tile grid
    # axis with two-pass InstanceNorm stats and a lane-dense NCHW (W-on-lanes)
    # output layout instead of whole-sample NHWC blocks.
    return jnp.transpose(out_nhwc, (0, 3, 1, 2))   # back to NCHW


def init_params(key, in_channel, out_channel):
    """Deterministic init matching the PyTorch module's parameter shapes."""
    c_cat = in_channel + out_channel

    def conv_init(k, cout, cin, ksz):
        fan_in = cin * ksz * ksz
        bound = 1.0 / np.sqrt(fan_in)
        kw, kb = jax.random.split(k)
        w = jax.random.uniform(kw, (cout, cin, ksz, ksz), jnp.float32,
                               -bound, bound)
        b = jax.random.uniform(kb, (cout,), jnp.float32, -bound, bound)
        return w, b

    k1, k2, k3 = jax.random.split(key, 3)
    w1, b1 = conv_init(k1, out_channel, c_cat, 3)
    w2, b2 = conv_init(k2, out_channel, out_channel, 3)
    ws, bs = conv_init(k3, out_channel, c_cat, 1)
    # b1/b2 are kept for parameter parity with the PyTorch module even though
    # the forward math cancels them (affine=False InstanceNorm).
    return dict(w1=w1, b1=b1, w2=w2, b2=b2, ws=ws, bs=bs)


def ref_forward(inp, fb, params):
    """Pure-JAX f32 reference of UpBlock.forward (numeric sanity check)."""
    up = _bilinear_up_x2(inp)
    x = jnp.concatenate([up, fb], axis=1)

    def conv(z, w, b, pad):
        y = jax.lax.conv_general_dilated(
            z, w, (1, 1), [(pad, pad), (pad, pad)],
            dimension_numbers=("NCHW", "OIHW", "NCHW"),
            precision=jax.lax.Precision.HIGHEST)
        return y + b[None, :, None, None]

    def inorm(z):
        m = jnp.mean(z, axis=(2, 3), keepdims=True)
        v = jnp.mean((z - m) ** 2, axis=(2, 3), keepdims=True)
        return (z - m) * jax.lax.rsqrt(v + EPS)

    hcur = jnp.maximum(inorm(conv(x, params["w1"], params["b1"], 1)), 0.0)
    hcur = jnp.maximum(inorm(conv(hcur, params["w2"], params["b2"], 1)), 0.0)
    s = conv(x, params["ws"], params["bs"], 0)
    return hcur + s


if __name__ == "__main__":
    in_channel, out_channel = 128, 64       # module defaults (realistic lanes)
    n, h_in, w_in = 2, 8, 8                 # upsampled spatial = 16x16

    key = jax.random.PRNGKey(0)
    k_in, k_fb, k_p = jax.random.split(key, 3)
    inp = jax.random.normal(k_in, (n, in_channel, h_in, w_in), jnp.float32)
    fb = jax.random.normal(k_fb, (n, out_channel, 2 * h_in, 2 * w_in),
                           jnp.float32)
    params = init_params(k_p, in_channel, out_channel)

    out = jax.jit(upblock_forward)(inp, fb, params)
    out = jax.block_until_ready(out)
    assert out.shape == (n, out_channel, 2 * h_in, 2 * w_in)

    # Kernel deliberately feeds the MXU bf16 inputs (f32 accumulation), so the
    # tolerance is bf16-level vs. the f32 HIGHEST-precision reference.
    ref = ref_forward(inp, fb, params)
    np.testing.assert_allclose(np.asarray(out), np.asarray(ref),
                               rtol=5e-2, atol=5e-2)
    print("KERNEL_OK")
</pallas_src>

<mosaic_0001>
module attributes {stable_mosaic.version = 11 : i64} {
  func.func @_upblock_kernel(%arg0: i32, %arg1: memref<1x18x16x576xbf16, #tpu.memory_space<vmem>>, %arg2: memref<3x576x128xbf16, #tpu.memory_space<vmem>>, %arg3: memref<3x192x64xbf16, #tpu.memory_space<vmem>>, %arg4: memref<1x64xf32, #tpu.memory_space<vmem>>, %arg5: memref<1x16x16x64xf32, #tpu.memory_space<vmem>>, %arg6: memref<18x16x192xbf16, #tpu.memory_space<vmem>>) attributes {dimension_semantics = [#tpu.dimension_semantics<parallel>], iteration_bounds = array<i64: 2>, scalar_prefetch = 0 : i64, scratch_operands = 1 : i64, tpu.core_type = #tpu.core_type<tc>, window_params = [{transform_indices = @transform_0, window_bounds = array<i64: 1, 18, 16, 576>}, {pipeline_mode = #tpu.pipeline_mode<synchronous>, transform_indices = @transform_1, window_bounds = array<i64: 3, 576, 128>}, {pipeline_mode = #tpu.pipeline_mode<synchronous>, transform_indices = @transform_2, window_bounds = array<i64: 3, 192, 64>}, {pipeline_mode = #tpu.pipeline_mode<synchronous>, transform_indices = @transform_3, window_bounds = array<i64: 1, 64>}, {transform_indices = @transform_4, window_bounds = array<i64: 1, 16, 16, 64>}]} {
    %cst = arith.constant 0.000000e+00 : f32
    %0 = vector.broadcast %cst : f32 to vector<256x128xf32>
    %c0 = arith.constant 0 : index
    %c0_0 = arith.constant 0 : index
    %c0_1 = arith.constant 0 : index
    %c0_2 = arith.constant 0 : index
    %1 = vector.load %arg1[%c0, %c0_0, %c0_1, %c0_2] : memref<1x18x16x576xbf16, #tpu.memory_space<vmem>>, vector<1x16x16x576xbf16>
    %2 = vector.shape_cast %1 : vector<1x16x16x576xbf16> to vector<16x16x576xbf16>
    %3 = vector.shape_cast %2 : vector<16x16x576xbf16> to vector<256x576xbf16>
    %c0_3 = arith.constant 0 : index
    %c0_4 = arith.constant 0 : index
    %c0_5 = arith.constant 0 : index
    %4 = vector.load %arg2[%c0_3, %c0_4, %c0_5] : memref<3x576x128xbf16, #tpu.memory_space<vmem>>, vector<1x576x128xbf16>
    %5 = vector.shape_cast %4 : vector<1x576x128xbf16> to vector<576x128xbf16>
    %cst_6 = arith.constant dense<0.000000e+00> : vector<256x128xf32>
    %6 = tpu.matmul %3, %5, %cst_6 {dimension_numbers = #tpu.dot_dimension_numbers<[1], [0], [0], [1], [0, 0, 1, 1], [], []>} : vector<256x576xbf16>, vector<576x128xbf16>, vector<256x128xf32> -> vector<256x128xf32>
    %7 = arith.addf %0, %6 : vector<256x128xf32>
    %c0_7 = arith.constant 0 : index
    %c1 = arith.constant 1 : index
    %c0_8 = arith.constant 0 : index
    %c0_9 = arith.constant 0 : index
    %8 = vector.load %arg1[%c0_7, %c1, %c0_8, %c0_9] : memref<1x18x16x576xbf16, #tpu.memory_space<vmem>>, vector<1x16x16x576xbf16>
    %9 = vector.shape_cast %8 : vector<1x16x16x576xbf16> to vector<16x16x576xbf16>
    %10 = vector.shape_cast %9 : vector<16x16x576xbf16> to vector<256x576xbf16>
    %c1_10 = arith.constant 1 : index
    %c0_11 = arith.constant 0 : index
    %c0_12 = arith.constant 0 : index
    %11 = vector.load %arg2[%c1_10, %c0_11, %c0_12] : memref<3x576x128xbf16, #tpu.memory_space<vmem>>, vector<1x576x128xbf16>
    %12 = vector.shape_cast %11 : vector<1x576x128xbf16> to vector<576x128xbf16>
    %cst_13 = arith.constant dense<0.000000e+00> : vector<256x128xf32>
    %13 = tpu.matmul %10, %12, %cst_13 {dimension_numbers = #tpu.dot_dimension_numbers<[1], [0], [0], [1], [0, 0, 1, 1], [], []>} : vector<256x576xbf16>, vector<576x128xbf16>, vector<256x128xf32> -> vector<256x128xf32>
    %14 = arith.addf %7, %13 : vector<256x128xf32>
    %c0_14 = arith.constant 0 : index
    %c2 = arith.constant 2 : index
    %c0_15 = arith.constant 0 : index
    %c0_16 = arith.constant 0 : index
    %15 = vector.load %arg1[%c0_14, %c2, %c0_15, %c0_16] : memref<1x18x16x576xbf16, #tpu.memory_space<vmem>>, vector<1x16x16x576xbf16>
    %16 = vector.shape_cast %15 : vector<1x16x16x576xbf16> to vector<16x16x576xbf16>
    %17 = vector.shape_cast %16 : vector<16x16x576xbf16> to vector<256x576xbf16>
    %c2_17 = arith.constant 2 : index
    %c0_18 = arith.constant 0 : index
    %c0_19 = arith.constant 0 : index
    %18 = vector.load %arg2[%c2_17, %c0_18, %c0_19] : memref<3x576x128xbf16, #tpu.memory_space<vmem>>, vector<1x576x128xbf16>
    %19 = vector.shape_cast %18 : vector<1x576x128xbf16> to vector<576x128xbf16>
    %cst_20 = arith.constant dense<0.000000e+00> : vector<256x128xf32>
    %20 = tpu.matmul %17, %19, %cst_20 {dimension_numbers = #tpu.dot_dimension_numbers<[1], [0], [0], [1], [0, 0, 1, 1], [], []>} : vector<256x576xbf16>, vector<576x128xbf16>, vector<256x128xf32> -> vector<256x128xf32>
    %21 = arith.addf %14, %20 : vector<256x128xf32>
    %22 = vector.extract_strided_slice %21 {offsets = [0, 0], sizes = [256, 64], strides = [1, 1]} : vector<256x128xf32> to vector<256x64xf32>
    %23 = vector.extract_strided_slice %21 {offsets = [0, 64], sizes = [256, 64], strides = [1, 1]} : vector<256x128xf32> to vector<256x64xf32>
    %c0_21 = arith.constant 0 : index
    %c0_22 = arith.constant 0 : index
    %24 = vector.load %arg4[%c0_21, %c0_22] : memref<1x64xf32, #tpu.memory_space<vmem>>, vector<1x64xf32>
    %25 = vector.broadcast %24 : vector<1x64xf32> to vector<256x64xf32>
    %26 = arith.addf %23, %25 : vector<256x64xf32>
    %cst_23 = arith.constant dense<0.000000e+00> : vector<64xf32>
    %27 = vector.multi_reduction <add>, %22, %cst_23 [0] : vector<256x64xf32> to vector<64xf32>
    %28 = vector.shape_cast %27 : vector<64xf32> to vector<1x64xf32>
    %cst_24 = arith.constant 2.560000e+02 : f32
    %29 = vector.broadcast %cst_24 : f32 to vector<1x64xf32>
    %30 = arith.divf %28, %29 : vector<1x64xf32>
    %31 = arith.mulf %22, %22 : vector<256x64xf32>
    %cst_25 = arith.constant dense<0.000000e+00> : vector<64xf32>
    %32 = vector.multi_reduction <add>, %31, %cst_25 [0] : vector<256x64xf32> to vector<64xf32>
    %33 = vector.shape_cast %32 : vector<64xf32> to vector<1x64xf32>
    %cst_26 = arith.constant 2.560000e+02 : f32
    %34 = vector.broadcast %cst_26 : f32 to vector<1x64xf32>
    %35 = arith.divf %33, %34 : vector<1x64xf32>
    %36 = arith.mulf %30, %30 : vector<1x64xf32>
    %37 = arith.subf %35, %36 : vector<1x64xf32>
    %cst_27 = arith.constant 0.000000e+00 : f32
    %38 = vector.broadcast %cst_27 : f32 to vector<1x64xf32>
    %39 = arith.maximumf %37, %38 : vector<1x64xf32>
    %40 = vector.broadcast %30 : vector<1x64xf32> to vector<256x64xf32>
    %41 = arith.subf %22, %40 : vector<256x64xf32>
    %cst_28 = arith.constant 9.99999974E-6 : f32
    %42 = vector.broadcast %cst_28 : f32 to vector<1x64xf32>
    %43 = arith.addf %39, %42 : vector<1x64xf32>
    %44 = math.rsqrt %43 : vector<1x64xf32>
    %45 = vector.broadcast %44 : vector<1x64xf32> to vector<256x64xf32>
    %46 = arith.mulf %41, %45 : vector<256x64xf32>
    %cst_29 = arith.constant 0.000000e+00 : f32
    %47 = vector.broadcast %cst_29 : f32 to vector<256x64xf32>
    %48 = arith.maximumf %46, %47 : vector<256x64xf32>
    %49 = arith.truncf %48 : vector<256x64xf32> to vector<256x64xbf16>
    %50 = vector.shape_cast %49 : vector<256x64xbf16> to vector<16x16x64xbf16>
    %cst_30 = arith.constant 0.000000e+00 : bf16
    %51 = vector.broadcast %cst_30 : bf16 to vector<1x16x192xbf16>
    %c0_31 = arith.constant 0 : index
    %c0_32 = arith.constant 0 : index
    %c0_33 = arith.constant 0 : index
    %52 = vector.load %arg6[%c0_31, %c0_32, %c0_33] : memref<18x16x192xbf16, #tpu.memory_space<vmem>>, vector<1x16x192xbf16>
    tpu.vector_store %arg6[%c0_31, %c0_32, %c0_33], %51 {strides = array<i32>} : memref<18x16x192xbf16, #tpu.memory_space<vmem>>, vector<1x16x192xbf16>,
    %c17 = arith.constant 17 : index
    %c0_34 = arith.constant 0 : index
    %c0_35 = arith.constant 0 : index
    %53 = vector.load %arg6[%c17, %c0_34, %c0_35] : memref<18x16x192xbf16, #tpu.memory_space<vmem>>, vector<1x16x192xbf16>
    tpu.vector_store %arg6[%c17, %c0_34, %c0_35], %51 {strides = array<i32>} : memref<18x16x192xbf16, #tpu.memory_space<vmem>>, vector<1x16x192xbf16>,
    %cst_36 = arith.constant 0.000000e+00 : bf16
    %54 = vector.broadcast %cst_36 : bf16 to vector<16x1x64xbf16>
    %55 = vector.extract_strided_slice %50 {offsets = [0, 0, 0], sizes = [16, 15, 64], strides = [1, 1, 1]} : vector<16x16x64xbf16> to vector<16x15x64xbf16>
    %56 = tpu.concatenate %54, %55 in 1 : vector<16x1x64xbf16>, vector<16x15x64xbf16> -> vector<16x16x64xbf16>
    %57 = vector.extract_strided_slice %50 {offsets = [0, 1, 0], sizes = [16, 15, 64], strides = [1, 1, 1]} : vector<16x16x64xbf16> to vector<16x15x64xbf16>
    %58 = tpu.concatenate %57, %54 in 1 : vector<16x15x64xbf16>, vector<16x1x64xbf16> -> vector<16x16x64xbf16>
    %59 = tpu.concatenate %56, %50, %58 in 2 : vector<16x16x64xbf16>, vector<16x16x64xbf16>, vector<16x16x64xbf16> -> vector<16x16x192xbf16>
    %c1_37 = arith.constant 1 : index
    %c0_38 = arith.constant 0 : index
    %c0_39 = arith.constant 0 : index
    %60 = vector.load %arg6[%c1_37, %c0_38, %c0_39] : memref<18x16x192xbf16, #tpu.memory_space<vmem>>, vector<16x16x192xbf16>
    tpu.vector_store %arg6[%c1_37, %c0_38, %c0_39], %59 {strides = array<i32>} : memref<18x16x192xbf16, #tpu.memory_space<vmem>>, vector<16x16x192xbf16>,
    %cst_40 = arith.constant 0.000000e+00 : f32
    %61 = vector.broadcast %cst_40 : f32 to vector<256x64xf32>
    %c0_41 = arith.constant 0 : index
    %c0_42 = arith.constant 0 : index
    %c0_43 = arith.constant 0 : index
    %62 = vector.load %arg6[%c0_41, %c0_42, %c0_43] : memref<18x16x192xbf16, #tpu.memory_space<vmem>>, vector<16x16x192xbf16>
    %63 = vector.shape_cast %62 : vector<16x16x192xbf16> to vector<256x192xbf16>
    %c0_44 = arith.constant 0 : index
    %c0_45 = arith.constant 0 : index
    %c0_46 = arith.constant 0 : index
    %64 = vector.load %arg3[%c0_44, %c0_45, %c0_46] : memref<3x192x64xbf16, #tpu.memory_space<vmem>>, vector<1x192x64xbf16>
    %65 = vector.shape_cast %64 : vector<1x192x64xbf16> to vector<192x64xbf16>
    %cst_47 = arith.constant dense<0.000000e+00> : vector<256x64xf32>
    %66 = tpu.matmul %63, %65, %cst_47 {dimension_numbers = #tpu.dot_dimension_numbers<[1], [0], [0], [1], [0, 0, 1, 1], [], []>} : vector<256x192xbf16>, vector<192x64xbf16>, vector<256x64xf32> -> vector<256x64xf32>
    %67 = arith.addf %61, %66 : vector<256x64xf32>
    %c1_48 = arith.constant 1 : index
    %c0_49 = arith.constant 0 : index
    %c0_50 = arith.constant 0 : index
    %68 = vector.load %arg6[%c1_48, %c0_49, %c0_50] : memref<18x16x192xbf16, #tpu.memory_space<vmem>>, vector<16x16x192xbf16>
    %69 = vector.shape_cast %68 : vector<16x16x192xbf16> to vector<256x192xbf16>
    %c1_51 = arith.constant 1 : index
    %c0_52 = arith.constant 0 : index
    %c0_53 = arith.constant 0 : index
    %70 = vector.load %arg3[%c1_51, %c0_52, %c0_53] : memref<3x192x64xbf16, #tpu.memory_space<vmem>>, vector<1x192x64xbf16>
    %71 = vector.shape_cast %70 : vector<1x192x64xbf16> to vector<192x64xbf16>
    %cst_54 = arith.constant dense<0.000000e+00> : vector<256x64xf32>
    %72 = tpu.matmul %69, %71, %cst_54 {dimension_numbers = #tpu.dot_dimension_numbers<[1], [0], [0], [1], [0, 0, 1, 1], [], []>} : vector<256x192xbf16>, vector<192x64xbf16>, vector<256x64xf32> -> vector<256x64xf32>
    %73 = arith.addf %67, %72 : vector<256x64xf32>
    %c2_55 = arith.constant 2 : index
    %c0_56 = arith.constant 0 : index
    %c0_57 = arith.constant 0 : index
    %74 = vector.load %arg6[%c2_55, %c0_56, %c0_57] : memref<18x16x192xbf16, #tpu.memory_space<vmem>>, vector<16x16x192xbf16>
    %75 = vector.shape_cast %74 : vector<16x16x192xbf16> to vector<256x192xbf16>
    %c2_58 = arith.constant 2 : index
    %c0_59 = arith.constant 0 : index
    %c0_60 = arith.constant 0 : index
    %76 = vector.load %arg3[%c2_58, %c0_59, %c0_60] : memref<3x192x64xbf16, #tpu.memory_space<vmem>>, vector<1x192x64xbf16>
    %77 = vector.shape_cast %76 : vector<1x192x64xbf16> to vector<192x64xbf16>
    %cst_61 = arith.constant dense<0.000000e+00> : vector<256x64xf32>
    %78 = tpu.matmul %75, %77, %cst_61 {dimension_numbers = #tpu.dot_dimension_numbers<[1], [0], [0], [1], [0, 0, 1, 1], [], []>} : vector<256x192xbf16>, vector<192x64xbf16>, vector<256x64xf32> -> vector<256x64xf32>
    %79 = arith.addf %73, %78 : vector<256x64xf32>
    %cst_62 = arith.constant dense<0.000000e+00> : vector<64xf32>
    %80 = vector.multi_reduction <add>, %79, %cst_62 [0] : vector<256x64xf32> to vector<64xf32>
    %81 = vector.shape_cast %80 : vector<64xf32> to vector<1x64xf32>
    %cst_63 = arith.constant 2.560000e+02 : f32
    %82 = vector.broadcast %cst_63 : f32 to vector<1x64xf32>
    %83 = arith.divf %81, %82 : vector<1x64xf32>
    %84 = arith.mulf %79, %79 : vector<256x64xf32>
    %cst_64 = arith.constant dense<0.000000e+00> : vector<64xf32>
    %85 = vector.multi_reduction <add>, %84, %cst_64 [0] : vector<256x64xf32> to vector<64xf32>
    %86 = vector.shape_cast %85 : vector<64xf32> to vector<1x64xf32>
    %cst_65 = arith.constant 2.560000e+02 : f32
    %87 = vector.broadcast %cst_65 : f32 to vector<1x64xf32>
    %88 = arith.divf %86, %87 : vector<1x64xf32>
    %89 = arith.mulf %83, %83 : vector<1x64xf32>
    %90 = arith.subf %88, %89 : vector<1x64xf32>
    %cst_66 = arith.constant 0.000000e+00 : f32
    %91 = vector.broadcast %cst_66 : f32 to vector<1x64xf32>
    %92 = arith.maximumf %90, %91 : vector<1x64xf32>
    %93 = vector.broadcast %83 : vector<1x64xf32> to vector<256x64xf32>
    %94 = arith.subf %79, %93 : vector<256x64xf32>
    %cst_67 = arith.constant 9.99999974E-6 : f32
    %95 = vector.broadcast %cst_67 : f32 to vector<1x64xf32>
    %96 = arith.addf %92, %95 : vector<1x64xf32>
    %97 = math.rsqrt %96 : vector<1x64xf32>
    %98 = vector.broadcast %97 : vector<1x64xf32> to vector<256x64xf32>
    %99 = arith.mulf %94, %98 : vector<256x64xf32>
    %cst_68 = arith.constant 0.000000e+00 : f32
    %100 = vector.broadcast %cst_68 : f32 to vector<256x64xf32>
    %101 = arith.maximumf %99, %100 : vector<256x64xf32>
    %102 = arith.addf %101, %26 : vector<256x64xf32>
    %103 = vector.shape_cast %102 : vector<256x64xf32> to vector<16x16x64xf32>
    %c0_69 = arith.constant 0 : index
    %c0_70 = arith.constant 0 : index
    %c0_71 = arith.constant 0 : index
    %c0_72 = arith.constant 0 : index
    %104 = vector.load %arg5[%c0_69, %c0_70, %c0_71, %c0_72] : memref<1x16x16x64xf32, #tpu.memory_space<vmem>>, vector<1x16x16x64xf32>
    %105 = vector.shape_cast %104 : vector<1x16x16x64xf32> to vector<16x16x64xf32>
    %106 = vector.shape_cast %103 : vector<16x16x64xf32> to vector<1x16x16x64xf32>
    tpu.vector_store %arg5[%c0_69, %c0_70, %c0_71, %c0_72], %106 {strides = array<i32>} : memref<1x16x16x64xf32, #tpu.memory_space<vmem>>, vector<1x16x16x64xf32>,
    return
  }
  func.func @transform_0(%arg0: i32) -> (i32, i32, i32, i32) {
    %c0_i32 = arith.constant 0 : i32
    %c0_i32_0 = arith.constant 0 : i32
    %c0_i32_1 = arith.constant 0 : i32
    %c0_i32_2 = arith.constant 0 : i32
    return %arg0, %c0_i32, %c0_i32_0, %c0_i32_1 : i32, i32, i32, i32
  }
  func.func @transform_1(%arg0: i32) -> (i32, i32, i32) {
    %c0_i32 = arith.constant 0 : i32
    %c0_i32_0 = arith.constant 0 : i32
    %c0_i32_1 = arith.constant 0 : i32
    %c0_i32_2 = arith.constant 0 : i32
    return %c0_i32, %c0_i32_0, %c0_i32_1 : i32, i32, i32
  }
  func.func @transform_2(%arg0: i32) -> (i32, i32, i32) {
    %c0_i32 = arith.constant 0 : i32
    %c0_i32_0 = arith.constant 0 : i32
    %c0_i32_1 = arith.constant 0 : i32
    %c0_i32_2 = arith.constant 0 : i32
    return %c0_i32, %c0_i32_0, %c0_i32_1 : i32, i32, i32
  }
  func.func @transform_3(%arg0: i32) -> (i32, i32) {
    %c0_i32 = arith.constant 0 : i32
    %c0_i32_0 = arith.constant 0 : i32
    %c0_i32_1 = arith.constant 0 : i32
    return %c0_i32, %c0_i32_0 : i32, i32
  }
  func.func @transform_4(%arg0: i32) -> (i32, i32, i32, i32) {
    %c0_i32 = arith.constant 0 : i32
    %c0_i32_0 = arith.constant 0 : i32
    %c0_i32_1 = arith.constant 0 : i32
    %c0_i32_2 = arith.constant 0 : i32
    return %arg0, %c0_i32, %c0_i32_0, %c0_i32_1 : i32, i32, i32, i32
  }
}

</mosaic_0001>

<bundles_post_ra>
// kernel: upblock_forward.1
= control target key start
LH: loop header
LB: loop body
LE: loop exit
PB: predicated region body
PF: predicated region fallthrough
CT: control target
= control target key end

     0   :  { %9 = vsyncpa [#allocation4], 0  ;;  %s12148_s0 = inlined_call_operand.vmem [shape: bf16[2,18,16,576], index: 0, kind: input, shape index: {}]   ;;  %s12149_s1 = inlined_call_operand.vmem [shape: bf16[3,576,128], index: 1, kind: input, shape index: {}]   ;;  %s12150_s2 = inlined_call_operand.vmem [shape: bf16[3,192,64], index: 2, kind: input, shape index: {}]   ;;  %s12151_s3 = inlined_call_operand.vmem [shape: f32[1,64], index: 3, kind: input, shape index: {}]   ;;  %s12152_s4 = inlined_call_operand.hbm [shape: f32[2,16,16,64], index: 4, kind: output, shape index: {}]  }
   0x1   :  { %11 = vsyncpa [#allocation4 + $0x1], 0  ;;  %s9059_s15 = smov 0   ;;  %s9061_s16 = smov 0  }
   0x2   :  { %s9063_s17 = smov 0   ;;  %s9065_s18 = smov 0  }
   0x3 LB: > { %s9080_s19 = sadd.s32 4294967295, %s9027_s18   ;;  %s6461_s20 = sadd.s32 4294967294, %s9027_s18   ;;  %s9027_s18 = sphi %s9065_s18, %s12307_s18   ;;  %s9023_s17 = sphi %s9063_s17, %s12306_s17   ;;  %s9019_s16 = sphi %s9061_s16, %s12305_s16   ;;  %s9015_s15 = sphi %s9059_s15, %s12304_s15  }
   0x4   : > { %s9084_s21 = sadd.s32 1, %s9027_s18   ;;  %s113_s22 = sadd.s32 1, %s9023_s17 }
   0x5   : > { %s110_s23 = ssub.s32 %s9027_s18, %s9084_s21  ;;  %p123_p0 = scmp.ne.s32.totalorder %s9023_s17, %s9019_s16 }
   0x6   : > { %p111_p1 = scmp.eq.s32.totalorder %s110_s23, 0  ;;  %p124_p2 = scmp.eq.s32.totalorder %s9080_s19, 1 }
   0x7   : > { %p129_p3 = scmp.ne.s32.totalorder %s9019_s16, %s9015_s15  ;;  %p130_p4 = scmp.eq.s32.totalorder %s6461_s20, 1 }
   0x8   : > { %s9095_s24 = scalar_select %p111_p1, %s9023_s17, %s113_s22  }
   0x9   : > { %p9097_p5 = por %p124_p2, %p123_p0  ;;  %p9101_p6 = por %p130_p4, %p129_p3 }
   0xa   : > { %p6464_p7 = scmp.ge.s32.totalorder %s9027_s18, 1  ;;  %p165_p8 = scmp.lt.s32.totalorder %s9027_s18, 3 }
   0xc   : > { %p166_p9 = pnand %p6464_p7, %p165_p8 }
   0xe   : > { %169 = sbr.rel (%p166_p9) target bundleno = 1772 (0x6ec), region = 36 }
  0x15   : > { %v8570_v0 = vld [vmem:[%s12149_s1 + $0x160] sm:$0xff]   ;;  %v8574_v4 = vld [vmem:[%s12149_s1 + $0x168] sm:$0xff]   ;;  %v8578_v8 = vld [vmem:[%s12149_s1 + $0x170] sm:$0xff]   ;;  %p191_p10 = scmp.lt.s32.totalorder %s9080_s19, 1  ;;  %vm1151_vm0 = vcmask 523264   ;;  %vm4710_vm1 = vcmask 1047552  }
  0x16   : > { %v9113_v1 = vld [vmem:[%s12149_s1 + $0x1e0] sm:$0xff]   ;;  %7338 = vmatprep.subr.bf16.mxu0 %v8570_v0  ;;  %v9131_v5 = vld [vmem:[%s12149_s1 + $0x1e8] sm:$0xff]   ;;  %v9149_v9 = vld [vmem:[%s12149_s1 + $0x1f0] sm:$0xff]   ;;  %vm4711_vm2 = vsmask.f32 7424  ;;  %s9030_s23 = smov 64  }
  0x17   : > { %v8572_v2 = vld [vmem:[%s12149_s1 + $0x120] sm:$0xff]   ;;  %8190 = vmatprep.subr.bf16.mxu1 %v9113_v1  ;;  %v8576_v6 = vld [vmem:[%s12149_s1 + $0x128] sm:$0xff]   ;;  %v8580_v10 = vld [vmem:[%s12149_s1 + $0x130] sm:$0xff]   ;;  %s192_s11 = scalar_select %p191_p10, %s9080_s19, 1  ;;  %vm4643_vm4 = vcmask 1040384  }
  0x18   : > { %v9122_v3 = vld [vmem:[%s12149_s1 + $0x1a0] sm:$0xff]   ;;  %7339 = vmatpush3.bf16.msra.mxu0 %v8572_v2  ;;  %v9140_v7 = vld [vmem:[%s12149_s1 + $0x1a8] sm:$0xff]   ;;  %v9158_v11 = vld [vmem:[%s12149_s1 + $0x1b0] sm:$0xff]   ;;  %vm4644_vm5 = vsmask.f32 256  ;;  %s188_s27 = sand.u32 1, %s9019_s16  }
  0x19   : > { %8198 = vmatpush3.bf16.msra.mxu1 %v9122_v3  ;;  %7340 = vmatprep.subr.bf16.mxu0 %v8574_v4  ;;  %v8582_v12 = vld [vmem:[%s12149_s1 + $0x178] sm:$0xff]   ;;  %v8586_v16 = vld [vmem:[%s12149_s1 + $0x180] sm:$0xff]   ;;  %v8590_v20 = vld [vmem:[%s12149_s1 + $0x188] sm:$0xff]   ;;  %s8526_s29 = smul.u32 720, %s192_s11  ;;  %s6465_s28 = sshll.u32 %s188_s27, 8 }
  0x1a   : > { %8191 = vmatprep.subr.bf16.mxu1 %v9131_v5  ;;  %v9167_v13 = vld [vmem:[%s12149_s1 + $0x1f8] sm:$0xff]   ;;  %v9185_v17 = vld [vmem:[%s12149_s1 + $0x200] sm:$0xff]   ;;  %v9204_v21 = vld [vmem:[%s12149_s1 + $0x208] sm:$0xff]   ;;  %s7337_s30 = sshll.u32 %s9080_s19, 12  ;;  %s12107_s8 = scalar_lea.sflag [#allocation4], %s188_s27 }
  0x1b   : > { %v8584_v14 = vld [vmem:[%s12149_s1 + $0x138] sm:$0xff]   ;;  %v8588_v18 = vld [vmem:[%s12149_s1 + $0x140] sm:$0xff]   ;;  %v8592_v22 = vld [vmem:[%s12149_s1 + $0x148] sm:$0xff]   ;;  %s9246_s14 = scalar_lea.vmem %s12148_s0, %s8526_s29  ;;  %s11948_s29 = scalar_lea.vmem [#allocation3], %s6465_s28 }
  0x1c   : > { %7341 = vmatpush3.bf16.msra.mxu0 %v8576_v6  ;;  %v9176_v15 = vld [vmem:[%s12149_s1 + $0x1b8] sm:$0xff]   ;;  %v9195_v19 = vld [vmem:[%s12149_s1 + $0x1c0] sm:$0xff]   ;;  %v9214_v23 = vld [vmem:[%s12149_s1 + $0x1c8] sm:$0xff]   ;;  %s6399_s5 = sshll.u32 %s11948_s29, 4  ;;  %s12075_s7 = scalar_lea.hbm %s12152_s4, %s7337_s30  ;;  %s12077_s5 = int_to_ptr.vmem [resolvable:$true] %s6399_s5 }
  0x1d   : > { %8199 = vmatpush3.bf16.msra.mxu1 %v9140_v7  ;;  %7342 = vmatprep.subr.bf16.mxu0 %v8578_v8  ;;  %v8594_v24 = vld [vmem:[%s12149_s1 + $0x190] sm:$0xff]   ;;  %v8598_v28 = vld [vmem:[%s12149_s1 + $0x198] sm:$0xff]   ;;  %v9262_v33 = vld [vmem:[%s9246_s14 + $0x2c] ss:$20 sps:$4 sm:$0xff]   ;;  %s8965_s9 = scalar_lea.vmem %s12077_s5, 4096 }
  0x1e   : > { %8192 = vmatprep.subr.bf16.mxu1 %v9149_v9  ;;  %v9223_v25 = vld [vmem:[%s12149_s1 + $0x210] sm:$0xff]   ;;  %v9241_v29 = vld [vmem:[%s12149_s1 + $0x218] sm:$0xff]   ;;  %1232 = vmatprep.mubr.bf16.mxu0 %v9262_v33  ;;  %v8608_v36 = vld [vmem:[%s12149_s1 + $0x40] sm:$0xff]   ;;  %p8966_p11 = scmp.ne.s32.totalorder %s12077_s5, %s8965_s9 }
  0x1f   : > { %v8596_v26 = vld [vmem:[%s12149_s1 + $0x150] sm:$0xff]   ;;  %v8600_v30 = vld [vmem:[%s12149_s1 + $0x158] sm:$0xff]   ;;  %v8609_v37 = vld [vmem:[%s12149_s1] sm:$0xff]  }
  0x20   : > { %7343 = vmatpush3.bf16.msra.mxu0 %v8580_v10  ;;  %v9232_v27 = vld [vmem:[%s12149_s1 + $0x1d0] sm:$0xff]   ;;  %v9255_v31 = vld [vmem:[%s12149_s1 + $0x1d8] sm:$0xff]   ;;  %v8610_v38 = vld [vmem:[%s12149_s1 + $0x48] sm:$0xff]   ;;  %p8967_p12 = pnand %p8966_p11, %p9097_p5 }
  0x21   : > { %8200 = vmatpush3.bf16.msra.mxu1 %v9158_v11  ;;  %7344 = vmatprep.subr.bf16.mxu0 %v8582_v12  ;;  %v9258_v32 = vld [vmem:[%s9246_s14 + $0x28] ss:$20 sps:$4 sm:$0xff]   ;;  %v8605_v34 = vld [vmem:[%s9246_s14 + $0x210] ss:$20 sps:$4 sm:$0xff]   ;;  %v8617_v43 = vld [vmem:[%s9246_s14 + $0x238] ss:$20 sps:$4 sm:$0xff]  }
  0x22   : > { %8193 = vmatprep.subr.bf16.mxu1 %v9167_v13  ;;  %v8607_v35 = vld [vmem:[%s9246_s14 + $0x214] ss:$20 sps:$4 sm:$0xff]   ;;  %v8614_v41 = vld [vmem:[%s9246_s14 + $0x23c] ss:$20 sps:$4 sm:$0xff]   ;;  %v8624_v49 = vld [vmem:[%s9246_s14 + $0x264] ss:$20 sps:$4 sm:$0xff]   ;;  %p8968_p13 = pneg %p8967_p12 }
  0x23   : > { %1489 = vmatprep.mubr.bf16.mxu1 %v8607_v35  ;;  %v8611_v39 = vld [vmem:[%s12149_s1 + $0x8] sm:$0xff]   ;;  %v9288_v42 = vld [vmem:[%s9246_s14 + $0x50] ss:$20 sps:$4 sm:$0xff]   ;;  %v8620_v46 = vld [vmem:[%s12149_s1 + $0x58] sm:$0xff]  }
  0x24   : > { %7345 = vmatpush3.bf16.msra.mxu0 %v8584_v14  ;;  %v9283_v40 = vld [vmem:[%s9246_s14 + $0x54] ss:$20 sps:$4 sm:$0xff]   ;;  %v8621_v47 = vld [vmem:[%s12149_s1 + $0x18] sm:$0xff]   ;;  %v8628_v51 = vld [vmem:[%s12149_s1 + $0x60] sm:$0xff]  }
  0x25   : > { %8201 = vmatpush3.bf16.msra.mxu1 %v9176_v15  ;;  %7346 = vmatprep.subr.bf16.mxu0 %v8586_v16  ;;  %v8618_v44 = vld [vmem:[%s12149_s1 + $0x50] sm:$0xff]   ;;  %v9312_v50 = vld [vmem:[%s9246_s14 + $0x78] ss:$20 sps:$4 sm:$0xff]   ;;  %v8629_v53 = vld [vmem:[%s12149_s1 + $0x20] sm:$0xff]  }
  0x26   : > { %8194 = vmatprep.subr.bf16.mxu1 %v9185_v17  ;;  %v8619_v45 = vld [vmem:[%s12149_s1 + $0x10] sm:$0xff]   ;;  %v8630_v54 = vld [vmem:[%s12149_s1 + $0x68] sm:$0xff]   ;;  %v8632_v55 = vld [vmem:[%s9246_s14 + $0xa4] ss:$20 sps:$4 sm:$0xff]  }
  0x27   : > { %v9308_v48 = vld [vmem:[%s9246_s14 + $0x7c] ss:$20 sps:$4 sm:$0xff]   ;;  %v8627_v52 = vld [vmem:[%s9246_s14 + $0x260] ss:$20 sps:$4 sm:$0xff]   ;;  %v8631_v57 = vld [vmem:[%s12149_s1 + $0x28] sm:$0xff]  }
  0x28   : > { %7347 = vmatpush3.bf16.msra.mxu0 %v8588_v18  ;;  %v8634_v56 = vld [vmem:[%s9246_s14 + $0x28c] ss:$20 sps:$4 sm:$0xff]   ;;  %v8638_v59 = vld [vmem:[%s12149_s1 + $0x70] sm:$0xff]   ;;  %v8637_v60 = vld [vmem:[%s9246_s14 + $0x288] ss:$20 sps:$4 sm:$0xff]  }
  0x29   : > { %8202 = vmatpush3.bf16.msra.mxu1 %v9195_v19  ;;  %7348 = vmatprep.subr.bf16.mxu0 %v8590_v20  ;;  %v8636_v58 = vld [vmem:[%s9246_s14 + $0xa0] ss:$20 sps:$4 sm:$0xff]   ;;  %v8640_v62 = vld [vmem:[%s12149_s1 + $0x78] sm:$0xff]   ;;  %v8662_v14 = vld [vmem:[%s9246_s14 + $0x190] ss:$20 sps:$4 sm:$0xff]  }
  0x2a   : > { %8195 = vmatprep.subr.bf16.mxu1 %v9204_v21  ;;  %v8639_v61 = vld [vmem:[%s12149_s1 + $0x30] sm:$0xff]   ;;  %v8642_v63 = vld [vmem:[%s9246_s14 + $0xcc] ss:$20 sps:$4 sm:$0xff]   ;;  %v8646_v0 = vld [vmem:[%s9246_s14 + $0x4] ss:$20 sps:$4 sm:$0xff]  }
  0x2b   : > { %v8644_v2 = vld [vmem:[%s9246_s14] ss:$20 sps:$4 sm:$0xff]   ;;  %v8651_v6 = vld [vmem:[%s9246_s14 + $0x11c] ss:$20 sps:$4 sm:$0xff]   ;;  %v8653_v8 = vld [vmem:[%s9246_s14 + $0x118] ss:$20 sps:$4 sm:$0xff]  }
  0x2c   : > { %7349 = vmatpush3.bf16.msra.mxu0 %v8592_v22  ;;  %v8648_v4 = vld [vmem:[%s9246_s14 + $0xf4] ss:$20 sps:$4 sm:$0xff]   ;;  %v8665_v16 = vld [vmem:[%s9246_s14 + $0x1b8] ss:$20 sps:$4 sm:$0xff]   ;;  %v8674_v22 = vld [vmem:[%s9246_s14 + $0x230] ss:$20 sps:$4 sm:$0xff]  }
  0x2d   : > { %8203 = vmatpush3.bf16.msra.mxu1 %v9214_v23  ;;  %7350 = vmatprep.subr.bf16.mxu0 %v8594_v24  ;;  %v8656_v10 = vld [vmem:[%s9246_s14 + $0x140] ss:$20 sps:$4 sm:$0xff]   ;;  %v8659_v12 = vld [vmem:[%s9246_s14 + $0x168] ss:$20 sps:$4 sm:$0xff]   ;;  %v8677_v24 = vld [vmem:[%s9246_s14 + $0x258] ss:$20 sps:$4 sm:$0xff]  }
  0x2e   : > { %8196 = vmatprep.subr.bf16.mxu1 %v9223_v25  ;;  %v8668_v18 = vld [vmem:[%s9246_s14 + $0x1e0] ss:$20 sps:$4 sm:$0xff]   ;;  %v8671_v20 = vld [vmem:[%s9246_s14 + $0x208] ss:$20 sps:$4 sm:$0xff]   ;;  %vm10826_vm3 = vmand %vm4710_vm1, %vm4711_vm2 }
  0x2f   : > { %v8723_v35 = vld [vmem:[%s12149_s1 + $0xc0] sm:$0xff]   ;;  %vm11090_vm6 = vmand %vm4643_vm4, %vm4644_vm5 }
  0x30   : > { %7351 = vmatpush3.bf16.msra.mxu0 %v8596_v26  ;;  %v8680_v26 = vld [vmem:[%s9246_s14 + $0x280] ss:$20 sps:$4 sm:$0xff]  }
  0x31   : > { %8204 = vmatpush3.bf16.msra.mxu1 %v9232_v27  ;;  %7352 = vmatprep.subr.bf16.mxu0 %v8598_v28  ;;  %v9399_v28 = vld [vmem:[%s9246_s14 + $0x30] ss:$20 sps:$4 sm:$0xff]  }
  0x32   : > { %8197 = vmatprep.subr.bf16.mxu1 %v9241_v29 }
  0x34   : > { %7353 = vmatpush3.bf16.msra.mxu0 %v8600_v30  ;;  %v8694_v30 = vld [vmem:[%s12149_s1 + $0x228] sm:$0xff]  }
  0x35   : > { %8205 = vmatpush3.bf16.msra.mxu1 %v9255_v31  ;;  %7450 = vmatprep.subr.bf16.mxu0 %v9113_v1  ;;  %v8641_v1 = vld [vmem:[%s12149_s1 + $0x38] sm:$0xff]  }
  0x36   : > { %7582 = vmatprep.subr.bf16.mxu1 %v8608_v36  ;;  %v9428_v36 = vld [vmem:[%s9246_s14 + $0x80] ss:$20 sps:$4 sm:$0xff]  }
  0x37   : > { %1233 = vmatmul.mubr.bf16.vlgmr.msra.gmra.mrb[0].mxu0 %v9258_v32 }
  0x38   : > { %1490 = vmatmul.mubr.bf16.vlgmr.msra.gmra.mrb[0].mxu1 %v8605_v34  ;;  %7451 = vmatpush3.bf16.msra.mxu0 %v9122_v3  ;;  %v8647_v3 = vld [vmem:[%s9246_s14 + $0xc8] ss:$20 sps:$4 sm:$0xff]  }
  0x39   : > { %7583 = vmatpush3.bf16.msra.mxu1 %v8609_v37  ;;  %7452 = vmatprep.subr.bf16.mxu0 %v9131_v5  ;;  %v8650_v5 = vld [vmem:[%s9246_s14 + $0xf0] ss:$20 sps:$4 sm:$0xff]   ;;  %v8714_v34 = vld [vmem:[%s12149_s1 + $0x238] sm:$0xff]   ;;  %v9431_v37 = vld [vmem:[%s9246_s14 + $0xac] ss:$20 sps:$4 sm:$0xff]  }
  0x3a   : > { %7584 = vmatprep.subr.bf16.mxu1 %v8610_v38  ;;  %1240 = vmatprep.mubr.bf16.mxu0 %v9283_v40  ;;  %v9436_v38 = vld [vmem:[%s9246_s14 + $0xa8] ss:$20 sps:$4 sm:$0xff]  }
  0x3b   : > { %1497 = vmatprep.mubr.bf16.mxu1 %v8614_v41  ;;  %v9447_v41 = vld [vmem:[%s9246_s14 + $0xfc] ss:$20 sps:$4 sm:$0xff]  }
  0x3c   : > { %7453 = vmatpush3.bf16.msra.mxu0 %v9140_v7  ;;  %v9369_v7 = vld [vmem:[%s12149_s1 + $0x220] sm:$0xff]  }
  0x3d   : > { %7585 = vmatpush3.bf16.msra.mxu1 %v8611_v39  ;;  %7454 = vmatprep.subr.bf16.mxu0 %v9149_v9  ;;  %v8654_v9 = vld [vmem:[%s9246_s14 + $0x144] ss:$20 sps:$4 sm:$0xff]   ;;  %v9439_v39 = vld [vmem:[%s9246_s14 + $0xd4] ss:$20 sps:$4 sm:$0xff]  }
  0x3e   : > { %7586 = vmatprep.subr.bf16.mxu1 %v8618_v44  ;;  %v9460_v44 = vld [vmem:[%s9246_s14 + $0x120] ss:$20 sps:$4 sm:$0xff]  }
  0x3f   : > { %1241 = vmatmul.mubr.bf16.gmra.mrb[4].mxu0 %v9288_v42 }
  0x40   : > { %1498 = vmatmul.mubr.bf16.gmra.mrb[4].mxu1 %v8617_v43  ;;  %7455 = vmatpush3.bf16.msra.mxu0 %v9158_v11  ;;  %v8657_v11 = vld [vmem:[%s9246_s14 + $0x16c] ss:$20 sps:$4 sm:$0xff]   ;;  %v9455_v43 = vld [vmem:[%s9246_s14 + $0x124] ss:$20 sps:$4 sm:$0xff]  }
  0x41   : > { %7587 = vmatpush3.bf16.msra.mxu1 %v8619_v45  ;;  %1248 = vmatprep.mubr.bf16.mxu0 %v9308_v48  ;;  %v9463_v45 = vld [vmem:[%s9246_s14 + $0x14c] ss:$20 sps:$4 sm:$0xff]  }
  0x42   : > { %7588 = vmatprep.subr.bf16.mxu1 %v8620_v46  ;;  %7456 = vmatprep.subr.bf16.mxu0 %v9167_v13  ;;  %v8660_v13 = vld [vmem:[%s9246_s14 + $0x194] ss:$20 sps:$4 sm:$0xff]  }
  0x43   : > { %1505 = vmatprep.mubr.bf16.mxu1 %v8624_v49  ;;  %v9468_v46 = vld [vmem:[%s9246_s14 + $0x148] ss:$20 sps:$4 sm:$0xff]  }
  0x44   : > { %7457 = vmatpush3.bf16.msra.mxu0 %v9176_v15  ;;  %v8663_v15 = vld [vmem:[%s9246_s14 + $0x1bc] ss:$20 sps:$4 sm:$0xff]  }
  0x45   : > { %7589 = vmatpush3.bf16.msra.mxu1 %v8621_v47  ;;  %7458 = vmatprep.subr.bf16.mxu0 %v9185_v17  ;;  %v8666_v17 = vld [vmem:[%s9246_s14 + $0x1e4] ss:$20 sps:$4 sm:$0xff]   ;;  %v9471_v47 = vld [vmem:[%s9246_s14 + $0x174] ss:$20 sps:$4 sm:$0xff]   ;;  %v9479_v49 = vld [vmem:[%s9246_s14 + $0x19c] ss:$20 sps:$4 sm:$0xff]  }
  0x46   : > { %7590 = vmatprep.subr.bf16.mxu1 %v8628_v51  ;;  %v9487_v51 = vld [vmem:[%s9246_s14 + $0x1c4] ss:$20 sps:$4 sm:$0xff]  }
  0x47   : > { %1249 = vmatmul.mubr.bf16.gmra.mrb[8].mxu0 %v9312_v50 }
  0x48   : > { %1506 = vmatmul.mubr.bf16.gmra.mrb[8].mxu1 %v8627_v52  ;;  %1256 = vmatprep.mubr.bf16.mxu0 %v8632_v55  ;;  %v9492_v52 = vld [vmem:[%s9246_s14 + $0x1c0] ss:$20 sps:$4 sm:$0xff]  }
  0x49   : > { %7591 = vmatpush3.bf16.msra.mxu1 %v8629_v53  ;;  %1513 = vmatprep.mubr.bf16.mxu1 %v8634_v56  ;;  %12171 = vst [vmem:[#allocation6_spill] sm:$0xff] %v9492_v52  ;;  %v9495_v53 = vld [vmem:[%s9246_s14 + $0x1ec] ss:$20 sps:$4 sm:$0xff]   ;;  %v9500_v56 = vld [vmem:[%s9246_s14 + $0x1e8] ss:$20 sps:$4 sm:$0xff]  }
  0x4a   : > { %7592 = vmatprep.subr.bf16.mxu1 %v8630_v54  ;;  %7459 = vmatpush3.bf16.msra.mxu0 %v9195_v19  ;;  %v8669_v19 = vld [vmem:[%s9246_s14 + $0x20c] ss:$20 sps:$4 sm:$0xff]   ;;  %12172 = vst [vmem:[#allocation7_spill] sm:$0xff] %v9495_v53  ;;  %12173 = vst [vmem:[#allocation8_spill] sm:$0xff] %v9500_v56 }
  0x4b   : > { %7460 = vmatprep.subr.bf16.mxu0 %v9204_v21  ;;  %v8672_v21 = vld [vmem:[%s9246_s14 + $0x234] ss:$20 sps:$4 sm:$0xff]  }
  0x4d   : > { %7593 = vmatpush3.bf16.msra.mxu1 %v8631_v57 }
  0x4e   : > { %7594 = vmatprep.subr.bf16.mxu1 %v8638_v59  ;;  %7461 = vmatpush3.bf16.msra.mxu0 %v9214_v23  ;;  %v8675_v23 = vld [vmem:[%s9246_s14 + $0x25c] ss:$20 sps:$4 sm:$0xff]  }
  0x4f   : > { %1257 = vmatmul.mubr.bf16.gmra.mrb[12].mxu0 %v8636_v58  ;;  %7462 = vmatprep.subr.bf16.mxu0 %v9223_v25  ;;  %v8678_v25 = vld [vmem:[%s9246_s14 + $0x284] ss:$20 sps:$4 sm:$0xff]  }
  0x50   : > { %1514 = vmatmul.mubr.bf16.gmra.mrb[12].mxu1 %v8637_v60  ;;  %1264 = vmatprep.mubr.bf16.mxu0 %v8642_v63  ;;  %v8721_v60 = vld [vmem:[%s9246_s14 + $0x38] ss:$20 sps:$4 sm:$0xff]  }
  0x51   : > { %7595 = vmatpush3.bf16.msra.mxu1 %v8639_v61  ;;  %2379 = vmatprep.mubr.bf16.mxu1 %v8646_v0 }
  0x52   : > { %7596 = vmatprep.subr.bf16.mxu1 %v8640_v62  ;;  %7463 = vmatpush3.bf16.msra.mxu0 %v9232_v27  ;;  %v9395_v27 = vld [vmem:[%s9246_s14 + $0x34] ss:$20 sps:$4 sm:$0xff]  }
  0x53   : > { %7464 = vmatprep.subr.bf16.mxu0 %v9241_v29  ;;  %v9402_v29 = vld [vmem:[%s9246_s14 + $0x5c] ss:$20 sps:$4 sm:$0xff]  }
  0x55   : > { %7597 = vmatpush3.bf16.msra.mxu1 %v8641_v1 }
  0x56   : > { %7465 = vmatpush3.bf16.msra.mxu0 %v9255_v31  ;;  %v8704_v31 = vld [vmem:[%s12149_s1 + $0x230] sm:$0xff]  }
  0x57   : > { %1265 = vmatmul.mubr.bf16.gmra.mrb[16].mxu0 %v8647_v3  ;;  %8070 = vmatprep.subr.bf16.mxu0 %v9369_v7 }
  0x58   : > { %2380 = vmatmul.mubr.bf16.vlgmr.msra.gmra.mrb[16].mxu1 %v8644_v2  ;;  %1272 = vmatprep.mubr.bf16.mxu0 %v8648_v4 }
  0x59   : > { %2387 = vmatprep.mubr.bf16.mxu1 %v9262_v33  ;;  %v9417_v33 = vld [vmem:[%s9246_s14 + $0x84] ss:$20 sps:$4 sm:$0xff]  }
  0x5f   : > { %1273 = vmatmul.mubr.bf16.gmra.mrb[20].mxu0 %v8650_v5 }
  0x60   : > { %2388 = vmatmul.mubr.bf16.gmra.mrb[20].mxu1 %v9258_v32  ;;  %1280 = vmatprep.mubr.bf16.mxu0 %v8651_v6  ;;  %v9414_v32 = vld [vmem:[%s9246_s14 + $0x58] ss:$20 sps:$4 sm:$0xff]  }
  0x61   : > { %2395 = vmatprep.mubr.bf16.mxu1 %v9283_v40  ;;  %v9444_v40 = vld [vmem:[%s9246_s14 + $0xd0] ss:$20 sps:$4 sm:$0xff]  }
  0x67   : > { %1281 = vmatmul.mubr.bf16.gmra.mrb[24].mxu0 %v8653_v8 }
  0x68   : > { %2396 = vmatmul.mubr.bf16.gmra.mrb[24].mxu1 %v9288_v42  ;;  %1288 = vmatprep.mubr.bf16.mxu0 %v8654_v9  ;;  %v9452_v42 = vld [vmem:[%s9246_s14 + $0xf8] ss:$20 sps:$4 sm:$0xff]  }
  0x69   : > { %2403 = vmatprep.mubr.bf16.mxu1 %v9308_v48  ;;  %v9476_v48 = vld [vmem:[%s9246_s14 + $0x170] ss:$20 sps:$4 sm:$0xff]  }
  0x6f   : > { %1289 = vmatmul.mubr.bf16.gmra.mrb[28].mxu0 %v8656_v10 }
  0x70   : > { %2404 = vmatmul.mubr.bf16.gmra.mrb[28].mxu1 %v9312_v50  ;;  %1296 = vmatprep.mubr.bf16.mxu0 %v8657_v11  ;;  %v9484_v50 = vld [vmem:[%s9246_s14 + $0x198] ss:$20 sps:$4 sm:$0xff]  }
  0x71   : > { %2411 = vmatprep.mubr.bf16.mxu1 %v8632_v55 }
  0x77   : > { %1297 = vmatmul.mubr.bf16.gmra.mrb[32].mxu0 %v8659_v12 }
  0x78   : > { %2412 = vmatmul.mubr.bf16.gmra.mrb[32].mxu1 %v8636_v58  ;;  %1304 = vmatprep.mubr.bf16.mxu0 %v8660_v13 }
  0x79   : > { %2419 = vmatprep.mubr.bf16.mxu1 %v8642_v63 }
  0x7f   : > { %1305 = vmatmul.mubr.bf16.gmra.mrb[36].mxu0 %v8662_v14 }
  0x80   : > { %2420 = vmatmul.mubr.bf16.gmra.mrb[36].mxu1 %v8647_v3  ;;  %1312 = vmatprep.mubr.bf16.mxu0 %v8663_v15 }
  0x81   : > { %2427 = vmatprep.mubr.bf16.mxu1 %v8648_v4 }
  0x87   : > { %1313 = vmatmul.mubr.bf16.gmra.mrb[40].mxu0 %v8665_v16 }
  0x88   : > { %2428 = vmatmul.mubr.bf16.gmra.mrb[40].mxu1 %v8650_v5  ;;  %1320 = vmatprep.mubr.bf16.mxu0 %v8666_v17 }
  0x89   : > { %2435 = vmatprep.mubr.bf16.mxu1 %v8651_v6  ;;  %v8722_v6 = vld [vmem:[%s9246_s14 + $0x60] ss:$20 sps:$4 sm:$0xff]  }
  0x8f   : > { %1321 = vmatmul.mubr.bf16.gmra.mrb[44].mxu0 %v8668_v18 }
  0x90   : > { %2436 = vmatmul.mubr.bf16.gmra.mrb[44].mxu1 %v8653_v8  ;;  %1328 = vmatprep.mubr.bf16.mxu0 %v8669_v19 }
  0x91   : > { %2443 = vmatprep.mubr.bf16.mxu1 %v8654_v9 }
  0x97   : > { %1329 = vmatmul.mubr.bf16.gmra.mrb[48].mxu0 %v8671_v20 }
  0x98   : > { %2444 = vmatmul.mubr.bf16.gmra.mrb[48].mxu1 %v8656_v10  ;;  %1336 = vmatprep.mubr.bf16.mxu0 %v8672_v21  ;;  %v8724_v10 = vld [vmem:[%s12149_s1 + $0x80] sm:$0xff]  }
  0x99   : > { %2451 = vmatprep.mubr.bf16.mxu1 %v8657_v11  ;;  %v8725_v11 = vld [vmem:[%s9246_s14 + $0x88] ss:$20 sps:$4 sm:$0xff]  }
  0x9f   : > { %1337 = vmatmul.mubr.bf16.gmra.mrb[52].mxu0 %v8674_v22 }
  0xa0   : > { %2452 = vmatmul.mubr.bf16.gmra.mrb[52].mxu1 %v8659_v12  ;;  %1344 = vmatprep.mubr.bf16.mxu0 %v8675_v23 }
  0xa1   : > { %2459 = vmatprep.mubr.bf16.mxu1 %v8660_v13 }
  0xa7   : > { %1345 = vmatmul.mubr.bf16.gmra.mrb[56].mxu0 %v8677_v24 }
  0xa8   : > { %2460 = vmatmul.mubr.bf16.gmra.mrb[56].mxu1 %v8662_v14  ;;  %1352 = vmatprep.mubr.bf16.mxu0 %v8678_v25  ;;  %v8727_v14 = vld [vmem:[%s12149_s1 + $0xc8] sm:$0xff]  }
  0xa9   : > { %2467 = vmatprep.mubr.bf16.mxu1 %v8663_v15 }
  0xaf   : > { %1353 = vmatmul.mubr.bf16.gmra.mrb[60].mxu0 %v8680_v26 }
  0xb0   : > { %2468 = vmatmul.mubr.bf16.gmra.mrb[60].mxu1 %v8665_v16  ;;  %1393 = vmatprep.mubr.bf16.mxu0 %v9395_v27 }
  0xb1   : > { %2475 = vmatprep.mubr.bf16.mxu1 %v8666_v17 }
  0xb7   : > { %1394 = vmatmul.mubr.bf16.vlgmr.msra.gmra.mrb[64].mxu0 %v9399_v28 }
  0xb8   : > { %2476 = vmatmul.mubr.bf16.gmra.mrb[64].mxu1 %v8668_v18  ;;  %8071 = vmatpush3.bf16.msra.mxu0 %v9369_v7 }
  0xb9   : > { %1401 = vmatprep.mubr.bf16.mxu0 %v9402_v29  ;;  %2483 = vmatprep.mubr.bf16.mxu1 %v8669_v19 }
  0xba   : > { %8072 = vmatprep.subr.bf16.mxu0 %v8694_v30 }
  0xbc   : > { %8073 = vmatpush3.bf16.msra.mxu0 %v8694_v30 }
  0xbd   : > { %8074 = vmatprep.subr.bf16.mxu0 %v8704_v31 }
  0xbf   : > { %1402 = vmatmul.mubr.bf16.gmra.mrb[68].mxu0 %v9414_v32 }
  0xc0   : > { %2484 = vmatmul.mubr.bf16.gmra.mrb[68].mxu1 %v8671_v20  ;;  %1409 = vmatprep.mubr.bf16.mxu0 %v9417_v33  ;;  %v8728_v20 = vld [vmem:[%s12149_s1 + $0x88] sm:$0xff]  }
  0xc1   : > { %2491 = vmatprep.mubr.bf16.mxu1 %v8672_v21  ;;  %8075 = vmatpush3.bf16.msra.mxu0 %v8704_v31  ;;  %v8731_v21 = vld [vmem:[%s12149_s1 + $0xd0] sm:$0xff]   ;;  %v8729_v31 = vld [vmem:[%s9246_s14 + $0xd8] ss:$20 sps:$4 sm:$0xff]  }
  0xc2   : > { %8076 = vmatprep.subr.bf16.mxu0 %v8714_v34 }
  0xc5   : > { %8077 = vmatpush3.bf16.msra.mxu0 %v8714_v34  ;;  %v8732_v34 = vld [vmem:[%s12149_s1 + $0x90] sm:$0xff]  }
  0xc6   : > { %7694 = vmatprep.subr.bf16.mxu0 %v8723_v35 }
  0xc7   : > { %1410 = vmatmul.mubr.bf16.gmra.mrb[72].mxu0 %v9428_v36 }
  0xc8   : > { %2492 = vmatmul.mubr.bf16.gmra.mrb[72].mxu1 %v8674_v22  ;;  %1417 = vmatprep.mubr.bf16.mxu0 %v9431_v37 }
  0xc9   : > { %2499 = vmatprep.mubr.bf16.mxu1 %v8675_v23 }
  0xcf   : > { %1418 = vmatmul.mubr.bf16.gmra.mrb[76].mxu0 %v9436_v38 }
  0xd0   : > { %2500 = vmatmul.mubr.bf16.gmra.mrb[76].mxu1 %v8677_v24  ;;  %1425 = vmatprep.mubr.bf16.mxu0 %v9439_v39  ;;  %v8726_v24 = vld [vmem:[%s9246_s14 + $0xb0] ss:$20 sps:$4 sm:$0xff]  }
  0xd7   : > { %1426 = vmatmul.mubr.bf16.gmra.mrb[80].mxu0 %v9444_v40 }
  0xd8   : > { %1433 = vmatprep.mubr.bf16.mxu0 %v9447_v41 }
  0xdf   : > { %1434 = vmatmul.mubr.bf16.gmra.mrb[84].mxu0 %v9452_v42 }
  0xe0   : > { %1441 = vmatprep.mubr.bf16.mxu0 %v9455_v43 }
  0xe7   : > { %1442 = vmatmul.mubr.bf16.gmra.mrb[88].mxu0 %v9460_v44 }
  0xe8   : > { %1449 = vmatprep.mubr.bf16.mxu0 %v9463_v45 }
  0xef   : > { %1450 = vmatmul.mubr.bf16.gmra.mrb[92].mxu0 %v9468_v46 }
  0xf0   : > { %1457 = vmatprep.mubr.bf16.mxu0 %v9471_v47 }
  0xf7   : > { %1458 = vmatmul.mubr.bf16.gmra.mrb[96].mxu0 %v9476_v48 }
  0xf8   : > { %1465 = vmatprep.mubr.bf16.mxu0 %v9479_v49 }
  0xff   : > { %1466 = vmatmul.mubr.bf16.gmra.mrb[100].mxu0 %v9484_v50 }
 0x100   : > { %1473 = vmatprep.mubr.bf16.mxu0 %v9487_v51 }
 0x107   : > { %1474 = vmatmul.mubr.bf16.gmra.mrb[104].mxu0 %v9492_v52  ;;  %v8753_v52 = vld [vmem:[%s9246_s14 + $0x8] ss:$20 sps:$4 sm:$0xff]  }
 0x108   : > { %1481 = vmatprep.mubr.bf16.mxu0 %v9495_v53 }
 0x10a   : > { %v7354_v54 = vpop.f32.mrb[0].mxu0 }
 0x10b   : > { %v7355_v55 = vpop.f32.mrb[1].mxu0  ;;  %v7538_v57 = vpop.f32.mrb[0].mxu1 }
 0x10c   : > { %v9502_v58 = vadd.f32 %v7355_v55, %v7354_v54  ;;  %v7357_v59 = vpop.f32.mrb[2].mxu0  ;;  %v7539_v61 = vpop.f32.mrb[1].mxu1  ;;  %v8735_v55 = vld [vmem:[%s12149_s1 + $0xd8] sm:$0xff]  }
 0x10d   : > { %v7358_v62 = vpop.f32.mrb[3].mxu0  ;;  %v9505_v63 = vadd.f32 %v7539_v61, %v7538_v57  ;;  %v7541_v0 = vpop.f32.mrb[2].mxu1 }
 0x10e   : > { %v9507_v1 = vadd.f32 %v7358_v62, %v7357_v59  ;;  %v7542_v2 = vpop.f32.mrb[3].mxu1 }
 0x10f   : > { %1482 = vmatmul.mubr.bf16.gmra.mrb[108].mxu0 %v9500_v56  ;;  %v9510_v3 = vadd.f32 %v7542_v2, %v7541_v0  ;;  %v8736_v0 = vld [vmem:[%s12149_s1 + $0x98] sm:$0xff]   ;;  %v8739_v2 = vld [vmem:[%s12149_s1 + $0xe0] sm:$0xff]  }
 0x110   : > { %8078 = vmatprep.mubr.msk.bf16.mxu0 %vm1151_vm0, %v8721_v60 }
 0x112   : > { %v7360_v4 = vpop.f32.mrb[4].mxu0 }
 0x113   : > { %v7361_v5 = vpop.f32.mrb[5].mxu0  ;;  %v7544_v7 = vpop.f32.mrb[4].mxu1 }
 0x114   : > { %v9514_v8 = vadd.f32 %v7361_v5, %v7360_v4  ;;  %v7363_v9 = vpop.f32.mrb[6].mxu0  ;;  %v7545_v12 = vpop.f32.mrb[5].mxu1 }
 0x115   : > { %v7364_v13 = vpop.f32.mrb[7].mxu0  ;;  %v9523_v15 = vadd.f32 %v7545_v12, %v7544_v7  ;;  %v7547_v16 = vpop.f32.mrb[6].mxu1  ;;  %v8740_v12 = vld [vmem:[%s12149_s1 + $0xa0] sm:$0xff]  }
 0x116   : > { %v9525_v17 = vadd.f32 %v7364_v13, %v7363_v9  ;;  %v7548_v18 = vpop.f32.mrb[7].mxu1 }
 0x117   : > { %8079 = vmatmul.mubr.msk.bf16.vlgmr.msra.gmra.mrb[112].mxu0 %vm1151_vm0, %v8722_v6  ;;  %v9528_v19 = vadd.f32 %v7548_v18, %v7547_v16  ;;  %v8730_v6 = vld [vmem:[%s9246_s14 + $0x100] ss:$20 sps:$4 sm:$0xff]   ;;  %v8743_v16 = vld [vmem:[%s12149_s1 + $0xe8] sm:$0xff]  }
 0x118   : > { %7695 = vmatpush3.bf16.msra.mxu0 %v8724_v10  ;;  %8082 = vmatprep.mubr.msk.bf16.mxu0 %vm1151_vm0, %v8725_v11  ;;  %v8733_v11 = vld [vmem:[%s9246_s14 + $0x128] ss:$20 sps:$4 sm:$0xff]  }
 0x119   : > { %7696 = vmatprep.subr.bf16.mxu0 %v8727_v14 }
 0x11a   : > { %v7366_v22 = vpop.f32.mrb[8].mxu0 }
 0x11b   : > { %v7367_v23 = vpop.f32.mrb[9].mxu0  ;;  %v7550_v25 = vpop.f32.mrb[8].mxu1 }
 0x11c   : > { %v9538_v26 = vadd.f32 %v7367_v23, %v7366_v22  ;;  %v7369_v30 = vpop.f32.mrb[10].mxu0  ;;  %7697 = vmatpush3.bf16.msra.mxu0 %v8728_v20  ;;  %v7551_v35 = vpop.f32.mrb[9].mxu1 }
 0x11d   : > { %v7370_v54 = vpop.f32.mrb[11].mxu0  ;;  %7698 = vmatprep.subr.bf16.mxu0 %v8731_v21  ;;  %v9547_v57 = vadd.f32 %v7551_v35, %v7550_v25  ;;  %v7553_v59 = vpop.f32.mrb[10].mxu1  ;;  %v8747_v25 = vld [vmem:[%s12149_s1 + $0xf0] sm:$0xff]  }
 0x11e   : > { %v9549_v60 = vadd.f32 %v7370_v54, %v7369_v30  ;;  %v7554_v61 = vpop.f32.mrb[11].mxu1 }
 0x11f   : > { %8083 = vmatmul.mubr.msk.bf16.gmra.mrb[116].mxu0 %vm1151_vm0, %v8726_v24  ;;  %v9552_v62 = vadd.f32 %v7554_v61, %v7553_v59  ;;  %v8744_v24 = vld [vmem:[%s12149_s1 + $0xa8] sm:$0xff]   ;;  %v8748_v61 = vld [vmem:[%s12149_s1 + $0xb0] sm:$0xff]  }
 0x120   : > { %8086 = vmatprep.mubr.msk.bf16.mxu0 %vm1151_vm0, %v8729_v31  ;;  %7699 = vmatpush3.bf16.msra.mxu0 %v8732_v34  ;;  %v8734_v34 = vld [vmem:[%s9246_s14 + $0x150] ss:$20 sps:$4 sm:$0xff]   ;;  %v8737_v59 = vld [vmem:[%s9246_s14 + $0x178] ss:$20 sps:$4 sm:$0xff]  }
 0x121   : > { %7700 = vmatprep.subr.bf16.mxu0 %v8735_v55 }
 0x122   : > { %v7372_v4 = vpop.f32.mrb[12].mxu0 }
 0x123   : > { %v7373_v5 = vpop.f32.mrb[13].mxu0  ;;  %v7556_v7 = vpop.f32.mrb[12].mxu1 }
 0x124   : > { %v9562_v9 = vadd.f32 %v7373_v5, %v7372_v4  ;;  %v7375_v10 = vpop.f32.mrb[14].mxu0  ;;  %7701 = vmatpush3.bf16.msra.mxu0 %v8736_v0  ;;  %v7557_v13 = vpop.f32.mrb[13].mxu1  ;;  %v8751_v4 = vld [vmem:[%s12149_s1 + $0xf8] sm:$0xff]  }
 0x125   : > { %v7376_v14 = vpop.f32.mrb[15].mxu0  ;;  %7702 = vmatprep.subr.bf16.mxu0 %v8739_v2  ;;  %v9571_v18 = vadd.f32 %v7557_v13, %v7556_v7  ;;  %v7559_v20 = vpop.f32.mrb[14].mxu1  ;;  %v9609_v13 = vld [vmem:[%s12149_s1 + $0x100] sm:$0xff]  }
 0x126   : > { %v9573_v21 = vadd.f32 %v7376_v14, %v7375_v10  ;;  %v7560_v22 = vpop.f32.mrb[15].mxu1 }
 0x127   : > { %8087 = vmatmul.mubr.msk.bf16.gmra.mrb[120].mxu0 %vm1151_vm0, %v8730_v6  ;;  %v9576_v23 = vadd.f32 %v7560_v22, %v7559_v20  ;;  %v8738_v20 = vld [vmem:[%s9246_s14 + $0x1a0] ss:$20 sps:$4 sm:$0xff]  }
 0x128   : > { %8090 = vmatprep.mubr.msk.bf16.mxu0 %vm1151_vm0, %v8733_v11  ;;  %7703 = vmatpush3.bf16.msra.mxu0 %v8740_v12  ;;  %v8752_v12 = vld [vmem:[%s12149_s1 + $0xb8] sm:$0xff]  }
 0x129   : > { %7704 = vmatprep.subr.bf16.mxu0 %v8743_v16 }
 0x12a   : > { %v7378_v30 = vpop.f32.mrb[16].mxu0 }
 0x12b   : > { %v7379_v31 = vpop.f32.mrb[17].mxu0  ;;  %v7598_v35 = vpop.f32.mrb[16].mxu1 }
 0x12c   : > { %v9586_v54 = vadd.f32 %v7379_v31, %v7378_v30  ;;  %v7381_v55 = vpop.f32.mrb[18].mxu0  ;;  %7705 = vmatpush3.bf16.msra.mxu0 %v8744_v24  ;;  %v7599_v0 = vpop.f32.mrb[17].mxu1  ;;  %v8741_v30 = vld [vmem:[%s9246_s14 + $0x1c8] ss:$20 sps:$4 sm:$0xff]  }
 0x12d   : > { %v7382_v2 = vpop.f32.mrb[19].mxu0  ;;  %7706 = vmatprep.subr.bf16.mxu0 %v8747_v25  ;;  %v9595_v5 = vadd.f32 %v7599_v0, %v7598_v35  ;;  %v7601_v6 = vpop.f32.mrb[18].mxu1 }
 0x12e   : > { %12174 = vst [vmem:[#allocation9_spill] sm:$0xff] %v9586_v54  ;;  %v9597_v7 = vadd.f32 %v7382_v2, %v7381_v55  ;;  %v7602_v10 = vpop.f32.mrb[19].mxu1 }
 0x12f   : > { %8091 = vmatmul.mubr.msk.bf16.gmra.mrb[124].mxu0 %vm1151_vm0, %v8734_v34  ;;  %v9600_v11 = vadd.f32 %v7602_v10, %v7601_v6  ;;  %v8742_v6 = vld [vmem:[%s9246_s14 + $0x1f0] ss:$20 sps:$4 sm:$0xff]  }
 0x130   : > { %12175 = vst [vmem:[#allocation10_spill] sm:$0xff] %v9597_v7  ;;  %8094 = vmatprep.mubr.msk.bf16.mxu0 %vm1151_vm0, %v8737_v59  ;;  %7707 = vmatpush3.bf16.msra.mxu0 %v8748_v61 }
 0x131   : > { %7708 = vmatprep.subr.bf16.mxu0 %v8751_v4 }
 0x132   : > { %v7384_v14 = vpop.f32.mrb[20].mxu0 }
 0x133   : > { %v7385_v16 = vpop.f32.mrb[21].mxu0  ;;  %v7604_v22 = vpop.f32.mrb[20].mxu1 }
 0x134   : > { %v9612_v24 = vadd.f32 %v7385_v16, %v7384_v14  ;;  %v7387_v25 = vpop.f32.mrb[22].mxu0  ;;  %7709 = vmatpush3.bf16.msra.mxu0 %v8752_v12  ;;  %v7605_v31 = vpop.f32.mrb[21].mxu1  ;;  %v8745_v16 = vld [vmem:[%s9246_s14 + $0x218] ss:$20 sps:$4 sm:$0xff]  }
 0x135   : > { %v7388_v34 = vpop.f32.mrb[23].mxu0  ;;  %8110 = vmatprep.subr.bf16.mxu0 %v9609_v13  ;;  %v9616_v35 = vadd.f32 %v7605_v31, %v7604_v22  ;;  %v7607_v55 = vpop.f32.mrb[22].mxu1 }
 0x136   : > { %12176 = vst [vmem:[#allocation11_spill] sm:$0xff] %v9612_v24  ;;  %v9618_v59 = vadd.f32 %v7388_v34, %v7387_v25  ;;  %v7608_v61 = vpop.f32.mrb[23].mxu1 }
 0x137   : > { %8095 = vmatmul.mubr.msk.bf16.gmra.mrb[128].mxu0 %vm1151_vm0, %v8738_v20  ;;  %v9621_v0 = vadd.f32 %v7608_v61, %v7607_v55 }
 0x138   : > { %12177 = vst [vmem:[#allocation12_spill] sm:$0xff] %v9618_v59  ;;  %8098 = vmatprep.mubr.msk.bf16.mxu0 %vm1151_vm0, %v8741_v30 }
 0x13a   : > { %v7390_v2 = vpop.f32.mrb[24].mxu0 }
 0x13b   : > { %v7391_v4 = vpop.f32.mrb[25].mxu0  ;;  %v7610_v10 = vpop.f32.mrb[24].mxu1 }
 0x13c   : > { %v9625_v12 = vadd.f32 %v7391_v4, %v7390_v2  ;;  %v7393_v14 = vpop.f32.mrb[26].mxu0  ;;  %v7611_v22 = vpop.f32.mrb[25].mxu1  ;;  %v8746_v4 = vld [vmem:[%s9246_s14 + $0x240] ss:$20 sps:$4 sm:$0xff]  }
 0x13d   : > { %v7394_v25 = vpop.f32.mrb[27].mxu0  ;;  %v9628_v31 = vadd.f32 %v7611_v22, %v7610_v10  ;;  %v7613_v34 = vpop.f32.mrb[26].mxu1  ;;  %v8749_v10 = vld [vmem:[%s9246_s14 + $0x268] ss:$20 sps:$4 sm:$0xff]  }
 0x13e   : > { %12178 = vst [vmem:[#allocation13_spill] sm:$0xff] %v9625_v12  ;;  %v9630_v20 = vadd.f32 %v7394_v25, %v7393_v14  ;;  %v7614_v55 = vpop.f32.mrb[27].mxu1 }
 0x13f   : > { %8099 = vmatmul.mubr.msk.bf16.gmra.mrb[132].mxu0 %vm1151_vm0, %v8742_v6  ;;  %v9633_v30 = vadd.f32 %v7614_v55, %v7613_v34 }
 0x140   : > { %12179 = vst [vmem:[#allocation14_spill] sm:$0xff] %v9630_v20  ;;  %8102 = vmatprep.mubr.msk.bf16.mxu0 %vm1151_vm0, %v8745_v16 }
 0x142   : > { %v7396_v61 = vpop.f32.mrb[28].mxu0 }
 0x143   : > { %v7397_v2 = vpop.f32.mrb[29].mxu0  ;;  %v7616_v12 = vpop.f32.mrb[28].mxu1 }
 0x144   : > { %v9637_v59 = vadd.f32 %v7397_v2, %v7396_v61  ;;  %v7399_v56 = vpop.f32.mrb[30].mxu0  ;;  %v7617_v22 = vpop.f32.mrb[29].mxu1  ;;  %v8750_v2 = vld [vmem:[%s9246_s14 + $0x290] ss:$20 sps:$4 sm:$0xff]  }
 0x145   : > { %v7400_v14 = vpop.f32.mrb[31].mxu0  ;;  %v9640_v25 = vadd.f32 %v7617_v22, %v7616_v12  ;;  %v7619_v20 = vpop.f32.mrb[30].mxu1  ;;  %v8755_v12 = vld [vmem:[%s9246_s14 + $0xc] ss:$20 sps:$4 sm:$0xff]  }
 0x146   : > { %12180 = vst [vmem:[#allocation15_spill] sm:$0xff] %v9637_v59  ;;  %v9642_v6 = vadd.f32 %v7400_v14, %v7399_v56  ;;  %v7620_v34 = vpop.f32.mrb[31].mxu1 }
 0x147   : > { %8103 = vmatmul.mubr.msk.bf16.gmra.mrb[136].mxu0 %vm1151_vm0, %v8746_v4  ;;  %v9645_v16 = vadd.f32 %v7620_v34, %v7619_v20 }
 0x148   : > { %12181 = vst [vmem:[#allocation16_spill] sm:$0xff] %v9642_v6  ;;  %8106 = vmatprep.mubr.msk.bf16.mxu0 %vm1151_vm0, %v8749_v10 }
 0x149   : > { %12182 = vst [vmem:[#allocation17_spill] sm:$0xff] %v9645_v16 }
 0x14a   : > { %v7402_v55 = vpop.f32.mrb[32].mxu0 }
 0x14b   : > { %v7403_v61 = vpop.f32.mrb[33].mxu0  ;;  %v7622_v59 = vpop.f32.mrb[32].mxu1 }
 0x14c   : > { %v9649_v24 = vadd.f32 %v7403_v61, %v7402_v55  ;;  %v7405_v53 = vpop.f32.mrb[34].mxu0  ;;  %v7623_v22 = vpop.f32.mrb[33].mxu1 }
 0x14d   : > { %v7406_v7 = vpop.f32.mrb[35].mxu0  ;;  %v9652_v56 = vadd.f32 %v7623_v22, %v7622_v59  ;;  %v7625_v14 = vpop.f32.mrb[34].mxu1 }
 0x14e   : > { %12183 = vst [vmem:[#allocation18_spill] sm:$0xff] %v9649_v24  ;;  %v9654_v6 = vadd.f32 %v7406_v7, %v7405_v53  ;;  %v7626_v20 = vpop.f32.mrb[35].mxu1  ;;  %v8757_v53 = vld [vmem:[%s12149_s1 + $0x108] sm:$0xff]  }
 0x14f   : > { %8107 = vmatmul.mubr.msk.bf16.gmra.mrb[140].mxu0 %vm1151_vm0, %v8750_v2  ;;  %v9657_v4 = vadd.f32 %v7626_v20, %v7625_v14  ;;  %v8770_v14 = vld [vmem:[%s12149_s1 + $0x240] sm:$0xff]  }
 0x150   : > { %2540 = vmatprep.mubr.bf16.mxu0 %v8755_v12 }
 0x152   : > { %v7408_v10 = vpop.f32.mrb[36].mxu0 }
 0x153   : > { %v7409_v34 = vpop.f32.mrb[37].mxu0  ;;  %v7628_v55 = vpop.f32.mrb[36].mxu1 }
 0x154   : > { %v9660_v61 = vadd.f32 %v7409_v34, %v7408_v10  ;;  %v7411_v24 = vpop.f32.mrb[38].mxu0  ;;  %v7629_v54 = vpop.f32.mrb[37].mxu1 }
 0x155   : > { %v7412_v16 = vpop.f32.mrb[39].mxu0  ;;  %v9662_v59 = vadd.f32 %v7629_v54, %v7628_v55  ;;  %v7631_v22 = vpop.f32.mrb[38].mxu1  ;;  %v8768_v54 = vld [vmem:[%s12149_s1 + $0x280] sm:$0xff]  }
 0x156   : > { %12184 = vst [vmem:[#allocation19_spill] sm:$0xff] %v9660_v61  ;;  %v9667_v7 = vadd.f32 %v7412_v16, %v7411_v24  ;;  %v7632_v2 = vpop.f32.mrb[39].mxu1  ;;  %v8758_v24 = vld [vmem:[%s12149_s1 + $0x110] sm:$0xff]   ;;  %7826 = vmatprep.subr.bf16.mxu1 %v8768_v54 }
 0x157   : > { %2541 = vmatmul.mubr.bf16.vlgmr.msra.gmra.mrb[144].mxu0 %v8753_v52  ;;  %v9669_v12 = vadd.f32 %v7632_v2, %v7631_v22  ;;  %7827 = vmatpush3.bf16.msra.mxu1 %v8770_v14  ;;  %v8759_v2 = vld [vmem:[%s12149_s1 + $0x118] sm:$0xff]  }
 0x158   : > { %12185 = vst [vmem:[#allocation20_spill] sm:$0xff] %v9667_v7  ;;  %8111 = vmatpush3.bf16.msra.mxu0 %v9609_v13  ;;  %2548 = vmatprep.mubr.bf16.mxu0 %v9395_v27 }
 0x159   : > { %8112 = vmatprep.subr.bf16.mxu0 %v8757_v53 }
 0x15a   : > { %v7414_v52 = vpop.f32.mrb[40].mxu0 }
 0x15b   : > { %v7415_v16 = vpop.f32.mrb[41].mxu0  ;;  %v7634_v20 = vpop.f32.mrb[40].mxu1 }
 0x15c   : > { %v9682_v13 = vadd.f32 %v7415_v16, %v7414_v52  ;;  %v7417_v27 = vpop.f32.mrb[42].mxu0  ;;  %v7635_v10 = vpop.f32.mrb[41].mxu1  ;;  %8113 = vmatpush3.bf16.msra.mxu0 %v8757_v53  ;;  %v8772_v53 = vld [vmem:[%s12149_s1 + $0x300] sm:$0xff]  }
 0x15d   : > { %v7418_v34 = vpop.f32.mrb[43].mxu0  ;;  %v9684_v55 = vadd.f32 %v7635_v10, %v7634_v20  ;;  %v7637_v22 = vpop.f32.mrb[42].mxu1  ;;  %8114 = vmatprep.subr.bf16.mxu0 %v8758_v24 }
 0x15e   : > { %12186 = vst [vmem:[#allocation21_spill] sm:$0xff] %v9682_v13  ;;  %v9689_v7 = vadd.f32 %v7418_v34, %v7417_v27  ;;  %v7638_v54 = vpop.f32.mrb[43].mxu1 }
 0x15f   : > { %2549 = vmatmul.mubr.bf16.gmra.mrb[148].mxu0 %v9399_v28  ;;  %v9692_v14 = vadd.f32 %v7638_v54, %v7637_v22 }
 0x160   : > { %12187 = vst [vmem:[#allocation22_spill] sm:$0xff] %v9689_v7  ;;  %2556 = vmatprep.mubr.bf16.mxu0 %v9402_v29  ;;  %8115 = vmatpush3.bf16.msra.mxu0 %v8758_v24 }
 0x161   : > { %8116 = vmatprep.subr.bf16.mxu0 %v8759_v2 }
 0x162   : > { %v7420_v52 = vpop.f32.mrb[44].mxu0 }
 0x163   : > { %v7421_v16 = vpop.f32.mrb[45].mxu0  ;;  %v7640_v20 = vpop.f32.mrb[44].mxu1 }
 0x164   : > { %v9698_v10 = vadd.f32 %v7421_v16, %v7420_v52  ;;  %v7423_v27 = vpop.f32.mrb[46].mxu0  ;;  %v7641_v34 = vpop.f32.mrb[45].mxu1  ;;  %8117 = vmatpush3.bf16.msra.mxu0 %v8759_v2  ;;  %v8778_v52 = vld [vmem:[%s12149_s1 + $0x288] sm:$0xff]  }
 0x165   : > { %v7424_v7 = vpop.f32.mrb[47].mxu0  ;;  %v9700_v28 = vadd.f32 %v7641_v34, %v7640_v20  ;;  %v7643_v22 = vpop.f32.mrb[46].mxu1  ;;  %7938 = vmatprep.subr.bf16.mxu0 %v8772_v53  ;;  %v8780_v2 = vld [vmem:[%s12149_s1 + $0x248] sm:$0xff]   ;;  %7828 = vmatprep.subr.bf16.mxu1 %v8778_v52  ;;  %v8788_v52 = vld [vmem:[%s12149_s1 + $0x290] sm:$0xff]  }
 0x166   : > { %12188 = vst [vmem:[#allocation23_spill] sm:$0xff] %v9698_v10  ;;  %v9702_v29 = vadd.f32 %v7424_v7, %v7423_v27  ;;  %v7644_v24 = vpop.f32.mrb[47].mxu1  ;;  %7829 = vmatpush3.bf16.msra.mxu1 %v8780_v2 }
 0x167   : > { %2557 = vmatmul.mubr.bf16.gmra.mrb[152].mxu0 %v9414_v32  ;;  %v9705_v54 = vadd.f32 %v7644_v24, %v7643_v22  ;;  %7830 = vmatprep.subr.bf16.mxu1 %v8788_v52 }
 0x168   : > { %12189 = vst [vmem:[#allocation24_spill] sm:$0xff] %v9702_v29  ;;  %2564 = vmatprep.mubr.bf16.mxu0 %v9417_v33 }
 0x16a   : > { %v7426_v16 = vpop.f32.mrb[48].mxu0 }
 0x16b   : > { %v7427_v53 = vpop.f32.mrb[49].mxu0  ;;  %v7646_v7 = vpop.f32.mrb[48].mxu1 }
 0x16c   : > { %v7428_v20 = vadd.f32 %v7427_v53, %v7426_v16  ;;  %v7429_v27 = vpop.f32.mrb[50].mxu0  ;;  %v7647_v32 = vpop.f32.mrb[49].mxu1 }
 0x16d   : > { %v7430_v34 = vpop.f32.mrb[51].mxu0  ;;  %v9714_v22 = vadd.f32 %v7647_v32, %v7646_v7  ;;  %v7649_v33 = vpop.f32.mrb[50].mxu1 }
 0x16e   : > { %v9717_v24 = vadd.f32 %v9505_v63, %v7428_v20  ;;  %v7431_v29 = vadd.f32 %v7430_v34, %v7429_v27  ;;  %v7650_v10 = vpop.f32.mrb[51].mxu1  ;;  %v8790_v63 = vld [vmem:[%s12149_s1 + $0x250] sm:$0xff]  }
 0x16f   : > { %2565 = vmatmul.mubr.bf16.gmra.mrb[156].mxu0 %v9428_v36  ;;  %v9720_v13 = vadd.f32 %v7650_v10, %v7649_v33  ;;  %7831 = vmatpush3.bf16.msra.mxu1 %v8790_v63 }
 0x170   : > { %v9726_v2 = vadd.f32 %v9510_v3, %v7431_v29  ;;  %2572 = vmatprep.mubr.bf16.mxu0 %v9431_v37 }
 0x172   : > { %v7432_v16 = vpop.f32.mrb[52].mxu0 }
 0x173   : > { %v7433_v53 = vpop.f32.mrb[53].mxu0  ;;  %v7652_v36 = vpop.f32.mrb[52].mxu1 }
 0x174   : > { %v7434_v10 = vadd.f32 %v7433_v53, %v7432_v16  ;;  %v7435_v7 = vpop.f32.mrb[54].mxu0  ;;  %v7653_v20 = vpop.f32.mrb[53].mxu1 }
 0x175   : > { %v7436_v27 = vpop.f32.mrb[55].mxu0  ;;  %v9732_v32 = vadd.f32 %v7653_v20, %v7652_v36  ;;  %v7655_v34 = vpop.f32.mrb[54].mxu1 }
 0x176   : > { %v9735_v3 = vadd.f32 %v9523_v15, %v7434_v10  ;;  %v7437_v37 = vadd.f32 %v7436_v27, %v7435_v7  ;;  %v7656_v29 = vpop.f32.mrb[55].mxu1 }
 0x177   : > { %12190 = vst [vmem:[#allocation25_spill] sm:$0xff] %v9732_v32  ;;  %2573 = vmatmul.mubr.bf16.gmra.mrb[160].mxu0 %v9436_v38  ;;  %v9738_v33 = vadd.f32 %v7656_v29, %v7655_v34 }
 0x178   : > { %v9741_v52 = vadd.f32 %v9528_v19, %v7437_v37  ;;  %2580 = vmatprep.mubr.bf16.mxu0 %v9439_v39  ;;  %v8798_v39 = vld [vmem:[%s12149_s1 + $0x298] sm:$0xff]  }
 0x179   : > { %7832 = vmatprep.subr.bf16.mxu1 %v8798_v39 }
 0x17a   : > { %v7438_v63 = vpop.f32.mrb[56].mxu0 }
 0x17b   : > { %v7439_v16 = vpop.f32.mrb[57].mxu0  ;;  %v7658_v53 = vpop.f32.mrb[56].mxu1 }
 0x17c   : > { %v7440_v36 = vadd.f32 %v7439_v16, %v7438_v63  ;;  %v7441_v20 = vpop.f32.mrb[58].mxu0  ;;  %v7659_v32 = vpop.f32.mrb[57].mxu1 }
 0x17d   : > { %v7442_v61 = vpop.f32.mrb[59].mxu0  ;;  %v9744_v15 = vadd.f32 %v7659_v32, %v7658_v53  ;;  %v7661_v10 = vpop.f32.mrb[58].mxu1 }
 0x17e   : > { %v9747_v7 = vadd.f32 %v9547_v57, %v7440_v36  ;;  %v7443_v38 = vadd.f32 %v7442_v61, %v7441_v20  ;;  %v7662_v27 = vpop.f32.mrb[59].mxu1  ;;  %v8799_v57 = vld [vmem:[%s12149_s1 + $0x258] sm:$0xff]  }
 0x17f   : > { %2581 = vmatmul.mubr.bf16.gmra.mrb[164].mxu0 %v9444_v40  ;;  %v9750_v19 = vadd.f32 %v7662_v27, %v7661_v10  ;;  %7833 = vmatpush3.bf16.msra.mxu1 %v8799_v57  ;;  %v8802_v10 = vld [vmem:[%s12149_s1 + $0x2a0] sm:$0xff]  }
 0x180   : > { %v9756_v34 = vadd.f32 %v9552_v62, %v7443_v38  ;;  %2588 = vmatprep.mubr.bf16.mxu0 %v9447_v41  ;;  %v8804_v27 = vld [vmem:[%s12149_s1 + $0x260] sm:$0xff]   ;;  %7834 = vmatprep.subr.bf16.mxu1 %v8802_v10 }
 0x182   : > { %v7444_v61 = vpop.f32.mrb[60].mxu0 }
 0x183   : > { %v7445_v32 = vpop.f32.mrb[61].mxu0  ;;  %v7664_v40 = vpop.f32.mrb[60].mxu1  ;;  %7835 = vmatpush3.bf16.msra.mxu1 %v8804_v27 }
 0x184   : > { %v7446_v37 = vadd.f32 %v7445_v32, %v7444_v61  ;;  %v7447_v29 = vpop.f32.mrb[62].mxu0  ;;  %v7665_v63 = vpop.f32.mrb[61].mxu1 }
 0x185   : > { %v7448_v16 = vpop.f32.mrb[63].mxu0  ;;  %v9762_v53 = vadd.f32 %v7665_v63, %v7664_v40  ;;  %v7667_v36 = vpop.f32.mrb[62].mxu1 }
 0x186   : > { %v9765_v62 = vadd.f32 %v9571_v18, %v7446_v37  ;;  %v7449_v41 = vadd.f32 %v7448_v16, %v7447_v29  ;;  %v7668_v20 = vpop.f32.mrb[63].mxu1  ;;  %v8806_v18 = vld [vmem:[%s12149_s1 + $0x2a8] sm:$0xff]  }
 0x187   : > { %2589 = vmatmul.mubr.bf16.gmra.mrb[168].mxu0 %v9452_v42  ;;  %v9771_v38 = vadd.f32 %v7668_v20, %v7667_v36  ;;  %v8807_v42 = vld [vmem:[%s12149_s1 + $0x268] sm:$0xff]   ;;  %7836 = vmatprep.subr.bf16.mxu1 %v8806_v18  ;;  %v8810_v20 = vld [vmem:[%s12149_s1 + $0x2b0] sm:$0xff]  }
 0x188   : > { %v9777_v39 = vadd.f32 %v9576_v23, %v7449_v41  ;;  %2596 = vmatprep.mubr.bf16.mxu0 %v9455_v43  ;;  %7837 = vmatpush3.bf16.msra.mxu1 %v8807_v42  ;;  %v8812_v18 = vld [vmem:[%s12149_s1 + $0x270] sm:$0xff]  }
 0x189   : > { %7838 = vmatprep.subr.bf16.mxu1 %v8810_v20 }
 0x18a   : > { %v7466_v57 = vpop.f32.mrb[64].mxu0 }
 0x18b   : > { %v7670_v61 = vpop.f32.mrb[64].mxu1  ;;  %v7467_v32 = vpop.f32.mrb[65].mxu0 }
 0x18c   : > { %v7468_v40 = vadd.f32 %v7467_v32, %v7466_v57  ;;  %v7671_v37 = vpop.f32.mrb[65].mxu1  ;;  %v7469_v23 = vpop.f32.mrb[66].mxu0  ;;  %7839 = vmatpush3.bf16.msra.mxu1 %v8812_v18  ;;  %v8823_v18 = vld [vmem:[%s9246_s14 + $0x7c] ss:$20 sps:$4 sm:$0xff]  }
 0x18d   : > { %v7672_v29 = vadd.f32 %v7671_v37, %v7670_v61  ;;  %v7673_v63 = vpop.f32.mrb[66].mxu1  ;;  %v7470_v43 = vpop.f32.mrb[67].mxu0 }
 0x18e   : > { %v1396_v16 = vadd.f32 %v7468_v40, %v9502_v58  ;;  %v7471_v36 = vadd.f32 %v7470_v43, %v7469_v23  ;;  %v7674_v41 = vpop.f32.mrb[67].mxu1  ;;  %v8814_v58 = vld [vmem:[%s12149_s1 + $0x2b8] sm:$0xff]  }
 0x18f   : > { %v9791_v10 = vadd.f32 %v7672_v29, %v9717_v24  ;;  %v7675_v27 = vadd.f32 %v7674_v41, %v7673_v63  ;;  %2597 = vmatmul.mubr.bf16.gmra.mrb[172].mxu0 %v9460_v44  ;;  %v8815_v44 = vld [vmem:[%s12149_s1 + $0x278] sm:$0xff]   ;;  %7840 = vmatprep.subr.bf16.mxu1 %v8814_v58 }
 0x190   : > { %v1399_v42 = vadd.f32 %v7471_v36, %v9507_v1  ;;  %2604 = vmatprep.mubr.bf16.mxu0 %v9463_v45  ;;  %v9803_v24 = vadd.f32 %v9595_v5, %v1396_v16  ;;  %v8818_v1 = vld [vmem:[%s9246_s14 + $0x54] ss:$20 sps:$4 sm:$0xff]   ;;  %7841 = vmatpush3.bf16.msra.mxu1 %v8815_v44 }
 0x191   : > { %v9806_v57 = vadd.f32 %v7675_v27, %v9726_v2  ;;  %3696 = vmatprep.mubr.bf16.mxu1 %v8818_v1  ;;  %v8816_v2 = vld [vmem:[%s9246_s14 + $0x50] ss:$20 sps:$4 sm:$0xff]  }
 0x192   : > { %v7472_v61 = vpop.f32.mrb[68].mxu0  ;;  %v9813_v45 = vadd.f32 %v9600_v11, %v1399_v42 }
 0x193   : > { %v7676_v32 = vpop.f32.mrb[68].mxu1  ;;  %v7473_v40 = vpop.f32.mrb[69].mxu0  ;;  %3697 = vmatmul.mubr.bf16.vlgmr.msra.gmra.mrb[80].mxu1 %v8816_v2 }
 0x194   : > { %v7474_v37 = vadd.f32 %v7473_v40, %v7472_v61  ;;  %v7677_v5 = vpop.f32.mrb[69].mxu1  ;;  %v7475_v23 = vpop.f32.mrb[70].mxu0  ;;  %3704 = vmatprep.mubr.bf16.mxu1 %v8823_v18 }
 0x195   : > { %v7678_v29 = vadd.f32 %v7677_v5, %v7676_v32  ;;  %v7679_v63 = vpop.f32.mrb[70].mxu1  ;;  %v7476_v43 = vpop.f32.mrb[71].mxu0 }
 0x196   : > { %v1404_v16 = vadd.f32 %v7474_v37, %v9514_v8  ;;  %v7477_v36 = vadd.f32 %v7476_v43, %v7475_v23  ;;  %v7680_v41 = vpop.f32.mrb[71].mxu1 }
 0x197   : > { %v9818_v20 = vadd.f32 %v7678_v29, %v9735_v3  ;;  %v7681_v11 = vadd.f32 %v7680_v41, %v7679_v63  ;;  %2605 = vmatmul.mubr.bf16.gmra.mrb[176].mxu0 %v9468_v46 }
 0x198   : > { %v1407_v27 = vadd.f32 %v7477_v36, %v9525_v17  ;;  %2612 = vmatprep.mubr.bf16.mxu0 %v9471_v47  ;;  %v9825_v42 = vadd.f32 %v9616_v35, %v1404_v16  ;;  %v8827_v47 = vld [vmem:[%s9246_s14 + $0x78] ss:$20 sps:$4 sm:$0xff]  }
 0x199   : > { %v9828_v8 = vadd.f32 %v7681_v11, %v9741_v52 }
 0x19a   : > { %v7478_v58 = vpop.f32.mrb[72].mxu0  ;;  %v9831_v3 = vadd.f32 %v9621_v0, %v1407_v27  ;;  %v8829_v0 = vld [vmem:[%s9246_s14 + $0xa4] ss:$20 sps:$4 sm:$0xff]  }
 0x19b   : > { %v7682_v44 = vpop.f32.mrb[72].mxu1  ;;  %v7479_v46 = vpop.f32.mrb[73].mxu0  ;;  %3705 = vmatmul.mubr.bf16.gmra.mrb[84].mxu1 %v8827_v47 }
 0x19c   : > { %v7480_v1 = vadd.f32 %v7479_v46, %v7478_v58  ;;  %v7683_v17 = vpop.f32.mrb[73].mxu1  ;;  %v7481_v61 = vpop.f32.mrb[74].mxu0  ;;  %3712 = vmatprep.mubr.bf16.mxu1 %v8829_v0 }
 0x19d   : > { %v7684_v32 = vadd.f32 %v7683_v17, %v7682_v44  ;;  %v7685_v40 = vpop.f32.mrb[74].mxu1  ;;  %v7482_v37 = vpop.f32.mrb[75].mxu0 }
 0x19e   : > { %v1412_v35 = vadd.f32 %v7480_v1, %v9538_v26  ;;  %v7483_v5 = vadd.f32 %v7482_v37, %v7481_v61  ;;  %v7686_v52 = vpop.f32.mrb[75].mxu1  ;;  %v12191_v61 = vld [vmem:[#allocation17_spill] sm:$0xff] }
 0x19f   : > { %v9836_v23 = vadd.f32 %v7684_v32, %v9747_v7  ;;  %v7687_v2 = vadd.f32 %v7686_v52, %v7685_v40  ;;  %2613 = vmatmul.mubr.bf16.gmra.mrb[180].mxu0 %v9476_v48 }
 0x1a0   : > { %v1415_v29 = vadd.f32 %v7483_v5, %v9549_v60  ;;  %2620 = vmatprep.mubr.bf16.mxu0 %v9479_v49  ;;  %v9843_v63 = vadd.f32 %v9628_v31, %v1412_v35  ;;  %v8833_v60 = vld [vmem:[%s9246_s14 + $0xa0] ss:$20 sps:$4 sm:$0xff]   ;;  %v8839_v5 = vld [vmem:[%s9246_s14 + $0xc8] ss:$20 sps:$4 sm:$0xff]  }
 0x1a1   : > { %v9846_v26 = vadd.f32 %v7687_v2, %v9756_v34  ;;  %v12195_v2 = vld [vmem:[#allocation7_spill] sm:$0xff] }
 0x1a2   : > { %v7484_v43 = vpop.f32.mrb[76].mxu0  ;;  %v9849_v7 = vadd.f32 %v9633_v30, %v1415_v29 }
 0x1a3   : > { %v7688_v16 = vpop.f32.mrb[76].mxu1  ;;  %v7485_v36 = vpop.f32.mrb[77].mxu0  ;;  %3713 = vmatmul.mubr.bf16.gmra.mrb[88].mxu1 %v8833_v60  ;;  %v8841_v60 = vld [vmem:[%s9246_s14 + $0xf4] ss:$20 sps:$4 sm:$0xff]  }
 0x1a4   : > { %v7486_v48 = vadd.f32 %v7485_v36, %v7484_v43  ;;  %v7689_v41 = vpop.f32.mrb[77].mxu1  ;;  %v7487_v11 = vpop.f32.mrb[78].mxu0 }
 0x1a5   : > { %v7690_v27 = vadd.f32 %v7689_v41, %v7688_v16  ;;  %v7691_v49 = vpop.f32.mrb[78].mxu1  ;;  %v7488_v18 = vpop.f32.mrb[79].mxu0  ;;  %v9881_v41 = vld [vmem:[%s9246_s14 + $0x214] ss:$20 sps:$4 sm:$0xff]  }
 0x1a6   : > { %v1420_v31 = vadd.f32 %v7486_v48, %v9562_v9  ;;  %v7489_v58 = vadd.f32 %v7488_v18, %v7487_v11  ;;  %v7692_v34 = vpop.f32.mrb[79].mxu1 }
 0x1a7   : > { %v9854_v44 = vadd.f32 %v7690_v27, %v9765_v62  ;;  %v7693_v46 = vadd.f32 %v7692_v34, %v7691_v49  ;;  %2621 = vmatmul.mubr.bf16.gmra.mrb[184].mxu0 %v9484_v50  ;;  %v8835_v50 = vld [vmem:[%s9246_s14 + $0xcc] ss:$20 sps:$4 sm:$0xff]  }
 0x1a8   : > { %v1423_v30 = vadd.f32 %v7489_v58, %v9573_v21  ;;  %2628 = vmatprep.mubr.bf16.mxu0 %v9487_v51  ;;  %v9860_v1 = vadd.f32 %v9640_v25, %v1420_v31  ;;  %v12192_v21 = vld [vmem:[#allocation9_spill] sm:$0xff]  ;;  %v12193_v25 = vld [vmem:[#allocation6_spill] sm:$0xff]  ;;  %3720 = vmatprep.mubr.bf16.mxu1 %v8835_v50  ;;  %v12196_v27 = vld [vmem:[#allocation11_spill] sm:$0xff] }
 0x1a9   : > { %v9863_v9 = vadd.f32 %v7693_v46, %v9777_v39  ;;  %v12194_v39 = vld [vmem:[#allocation10_spill] sm:$0xff]  ;;  %v12198_v58 = vld [vmem:[#allocation12_spill] sm:$0xff] }
 0x1aa   : > { %v7490_v17 = vpop.f32.mrb[80].mxu0  ;;  %v9866_v47 = vadd.f32 %v12191_v61, %v1423_v30  ;;  %v8845_v31 = vld [vmem:[%s9246_s14 + $0xf0] ss:$20 sps:$4 sm:$0xff]  }
 0x1ab   : > { %v7491_v62 = vpop.f32.mrb[81].mxu0  ;;  %3721 = vmatmul.mubr.bf16.gmra.mrb[92].mxu1 %v8839_v5  ;;  %v9896_v61 = vld [vmem:[%s9246_s14 + $0x210] ss:$20 sps:$4 sm:$0xff]  }
 0x1ac   : > { %v7492_v32 = vadd.f32 %v7491_v62, %v7490_v17  ;;  %v7493_v40 = vpop.f32.mrb[82].mxu0  ;;  %3728 = vmatprep.mubr.bf16.mxu1 %v8841_v60  ;;  %v8848_v50 = vld [vmem:[%s9246_s14 + $0x11c] ss:$20 sps:$4 sm:$0xff]  }
 0x1ad   : > { %v7494_v37 = vpop.f32.mrb[83].mxu0 }
 0x1ae   : > { %v1428_v35 = vadd.f32 %v7492_v32, %v12192_v21  ;;  %v7495_v51 = vadd.f32 %v7494_v37, %v7493_v40  ;;  %v9899_v40 = vld [vmem:[%s9246_s14 + $0x23c] ss:$20 sps:$4 sm:$0xff]  }
 0x1af   : > { %2629 = vmatmul.mubr.bf16.gmra.mrb[188].mxu0 %v12193_v25  ;;  %v12199_v21 = vld [vmem:[#allocation13_spill] sm:$0xff] }
 0x1b0   : > { %v1431_v52 = vadd.f32 %v7495_v51, %v12194_v39  ;;  %2636 = vmatprep.mubr.bf16.mxu0 %v12195_v2  ;;  %v9875_v0 = vadd.f32 %v9652_v56, %v1428_v35  ;;  %v12197_v56 = vld [vmem:[#allocation8_spill] sm:$0xff]  ;;  %v8852_v51 = vld [vmem:[%s9246_s14 + $0x118] ss:$20 sps:$4 sm:$0xff]   ;;  %v288_v39 = vld [vmem:[%s9246_s14 + $0x260] sm:$0xff] }
 0x1b2   : > { %v7496_v29 = vpop.f32.mrb[84].mxu0  ;;  %v9878_v43 = vadd.f32 %v9657_v4, %v1431_v52  ;;  %v291_v52 = vld [vmem:[%s9246_s14 + $0x274] sm:$0xff] }
 0x1b3   : > { %v7497_v16 = vpop.f32.mrb[85].mxu0  ;;  %3729 = vmatmul.mubr.bf16.gmra.mrb[96].mxu1 %v8845_v31  ;;  %v9918_v60 = vcombine.high %v288_v39, %v291_v52 }
 0x1b4   : > { %v7498_v36 = vadd.f32 %v7497_v16, %v7496_v29  ;;  %v7499_v48 = vpop.f32.mrb[86].mxu0  ;;  %3736 = vmatprep.mubr.bf16.mxu1 %v8848_v50 }
 0x1b5   : > { %v7500_v11 = vpop.f32.mrb[87].mxu0 }
 0x1b6   : > { %v1436_v49 = vadd.f32 %v7498_v36, %v12196_v27  ;;  %v7501_v18 = vadd.f32 %v7500_v11, %v7499_v48  ;;  %v9916_v36 = vld [vmem:[%s9246_s14 + $0x238] ss:$20 sps:$4 sm:$0xff]  }
 0x1b7   : > { %2637 = vmatmul.mubr.bf16.gmra.mrb[192].mxu0 %v12197_v56  ;;  %v8858_v56 = vld [vmem:[%s9246_s14 + $0x140] ss:$20 sps:$4 sm:$0xff]  }
 0x1b8   : > { %v1439_v4 = vadd.f32 %v7501_v18, %v12198_v58  ;;  %2644 = vmatprep.mubr.bf16.mxu0 %v9881_v41  ;;  %v9890_v34 = vadd.f32 %v9662_v59, %v1436_v49  ;;  %v8854_v49 = vld [vmem:[%s9246_s14 + $0x144] ss:$20 sps:$4 sm:$0xff]   ;;  %v12201_v18 = vld [vmem:[#allocation15_spill] sm:$0xff] }
 0x1ba   : > { %v7502_v46 = vpop.f32.mrb[88].mxu0  ;;  %v9893_v30 = vadd.f32 %v9669_v12, %v1439_v4  ;;  %v12200_v12 = vld [vmem:[#allocation14_spill] sm:$0xff] }
 0x1bb   : > { %v7503_v17 = vpop.f32.mrb[89].mxu0  ;;  %3737 = vmatmul.mubr.bf16.gmra.mrb[100].mxu1 %v8852_v51  ;;  %v12203_v51 = vld [vmem:[#allocation18_spill] sm:$0xff] }
 0x1bc   : > { %v7504_v62 = vadd.f32 %v7503_v17, %v7502_v46  ;;  %v7505_v32 = vpop.f32.mrb[90].mxu0  ;;  %3744 = vmatprep.mubr.bf16.mxu1 %v8854_v49  ;;  %v8773_v49 = vld [vmem:[%s12149_s1 + $0x2c0] sm:$0xff]  }
 0x1bd   : > { %v7506_v37 = vpop.f32.mrb[91].mxu0 }
 0x1be   : > { %v1444_v35 = vadd.f32 %v7504_v62, %v12199_v21  ;;  %v7507_v59 = vadd.f32 %v7506_v37, %v7505_v32  ;;  %v9932_v32 = vcombine.low %v288_v39, %v291_v52  ;;  %v8769_v21 = vld [vmem:[%s9246_s14 + $0x10] ss:$20 sps:$4 sm:$0xff]  }
 0x1bf   : > { %2645 = vmatmul.mubr.bf16.gmra.mrb[196].mxu0 %v9896_v61 }
 0x1c0   : > { %v1447_v5 = vadd.f32 %v7507_v59, %v12200_v12  ;;  %2652 = vmatprep.mubr.bf16.mxu0 %v9899_v40  ;;  %v9908_v25 = vadd.f32 %v9684_v55, %v1444_v35  ;;  %v8860_v59 = vld [vmem:[%s9246_s14 + $0x16c] ss:$20 sps:$4 sm:$0xff]  }
 0x1c2   : > { %v7508_v2 = vpop.f32.mrb[92].mxu0  ;;  %v9913_v29 = vadd.f32 %v9692_v14, %v1447_v5  ;;  %v12202_v14 = vld [vmem:[#allocation16_spill] sm:$0xff] }
 0x1c3   : > { %v7509_v16 = vpop.f32.mrb[93].mxu0  ;;  %3745 = vmatmul.mubr.bf16.gmra.mrb[104].mxu1 %v8858_v56 }
 0x1c4   : > { %v7510_v48 = vadd.f32 %v7509_v16, %v7508_v2  ;;  %v7511_v11 = vpop.f32.mrb[94].mxu0  ;;  %v8864_v2 = vld [vmem:[%s9246_s14 + $0x168] ss:$20 sps:$4 sm:$0xff]   ;;  %3752 = vmatprep.mubr.bf16.mxu1 %v8860_v59 }
 0x1c5   : > { %v7512_v27 = vpop.f32.mrb[95].mxu0 }
 0x1c6   : > { %v1452_v31 = vadd.f32 %v7510_v48, %v12201_v18  ;;  %v7513_v55 = vadd.f32 %v7512_v27, %v7511_v11  ;;  %v8771_v48 = vld [vmem:[%s9246_s14 + $0x38] ss:$20 sps:$4 sm:$0xff]  }
 0x1c7   : > { %2653 = vmatmul.mubr.bf16.gmra.mrb[200].mxu0 %v9916_v36 }
 0x1c8   : > { %v1455_v58 = vadd.f32 %v7513_v55, %v12202_v14  ;;  %2660 = vmatprep.mubr.bf16.mxu0 %v9918_v60  ;;  %v9927_v4 = vadd.f32 %v9700_v28, %v1452_v31  ;;  %v8776_v31 = vld [vmem:[%s12149_s1 + $0x308] sm:$0xff]   ;;  %v8870_v14 = vld [vmem:[%s9246_s14 + $0x190] ss:$20 sps:$4 sm:$0xff]  }
 0x1c9   : > { %v12204_v55 = vld [vmem:[#allocation19_spill] sm:$0xff] }
 0x1ca   : > { %v7514_v46 = vpop.f32.mrb[96].mxu0  ;;  %v9930_v17 = vadd.f32 %v9705_v54, %v1455_v58  ;;  %v12205_v58 = vld [vmem:[#allocation20_spill] sm:$0xff] }
 0x1cb   : > { %v7515_v62 = vpop.f32.mrb[97].mxu0  ;;  %3753 = vmatmul.mubr.bf16.gmra.mrb[108].mxu1 %v8864_v2 }
 0x1cc   : > { %v7516_v37 = vadd.f32 %v7515_v62, %v7514_v46  ;;  %v7517_v50 = vpop.f32.mrb[98].mxu0  ;;  %v8777_v62 = vld [vmem:[%s12149_s1 + $0x2c8] sm:$0xff]  }
 0x1cd   : > { %v7518_v35 = vpop.f32.mrb[99].mxu0 }
 0x1ce   : > { %v1460_v12 = vadd.f32 %v7516_v37, %v12203_v51  ;;  %v7519_v5 = vadd.f32 %v7518_v35, %v7517_v50  ;;  %v12206_v37 = vld [vmem:[#allocation25_spill] sm:$0xff] }
 0x1cf   : > { %2661 = vmatmul.mubr.bf16.gmra.mrb[204].mxu0 %v9932_v32 }
 0x1d0   : > { %v1463_v28 = vadd.f32 %v7519_v5, %v9654_v6  ;;  %8118 = vmatprep.mubr.msk.bf16.mxu0 %vm1151_vm0, %v8769_v21  ;;  %v9942_v54 = vadd.f32 %v9714_v22, %v1460_v12  ;;  %v8774_v6 = vld [vmem:[%s9246_s14 + $0x60] ss:$20 sps:$4 sm:$0xff]   ;;  %v8775_v12 = vld [vmem:[%s9246_s14 + $0x88] ss:$20 sps:$4 sm:$0xff]  }
 0x1d1   : > { %v8866_v22 = vld [vmem:[%s9246_s14 + $0x194] ss:$20 sps:$4 sm:$0xff]  }
 0x1d2   : > { %v7520_v39 = vpop.f32.mrb[100].mxu0  ;;  %v9945_v52 = vadd.f32 %v9720_v13, %v1463_v28  ;;  %3760 = vmatprep.mubr.bf16.mxu1 %v8866_v22  ;;  %v8782_v21 = vld [vmem:[%s12149_s1 + $0x310] sm:$0xff]   ;;  %v8787_v22 = vld [vmem:[%s12149_s1 + $0x2d8] sm:$0xff]  }
 0x1d3   : > { %v7521_v16 = vpop.f32.mrb[101].mxu0  ;;  %3761 = vmatmul.mubr.bf16.gmra.mrb[112].mxu1 %v8870_v14  ;;  %v8779_v28 = vld [vmem:[%s9246_s14 + $0xb0] ss:$20 sps:$4 sm:$0xff]  }
 0x1d4   : > { %v7522_v11 = vadd.f32 %v7521_v16, %v7520_v39  ;;  %v7523_v27 = vpop.f32.mrb[102].mxu0  ;;  %v8783_v39 = vld [vmem:[%s12149_s1 + $0x2d0] sm:$0xff]  }
 0x1d5   : > { %v7524_v18 = vpop.f32.mrb[103].mxu0 }
 0x1d6   : > { %v1468_v56 = vadd.f32 %v7522_v11, %v12204_v55  ;;  %v7525_v13 = vadd.f32 %v7524_v18, %v7523_v27  ;;  %v8873_v11 = vld [vmem:[%s9246_s14 + $0x1bc] ss:$20 sps:$4 sm:$0xff]   ;;  %v12208_v18 = vld [vmem:[#allocation22_spill] sm:$0xff] }
 0x1d7   : > { %8119 = vmatmul.mubr.msk.bf16.vlgmr.msra.gmra.mrb[112].mxu0 %vm1151_vm0, %v8771_v48  ;;  %v8786_v48 = vld [vmem:[%s12149_s1 + $0x318] sm:$0xff]   ;;  %3768 = vmatprep.mubr.bf16.mxu1 %v8873_v11 }
 0x1d8   : > { %v1471_v46 = vadd.f32 %v7525_v13, %v12205_v58  ;;  %7939 = vmatpush3.bf16.msra.mxu0 %v8773_v49  ;;  %8122 = vmatprep.mubr.msk.bf16.mxu0 %vm1151_vm0, %v8774_v6  ;;  %v9965_v50 = vadd.f32 %v12206_v37, %v1468_v56  ;;  %v12207_v27 = vld [vmem:[#allocation21_spill] sm:$0xff]  ;;  %v8792_v56 = vld [vmem:[%s12149_s1 + $0x320] sm:$0xff]  }
 0x1d9   : > { %7940 = vmatprep.subr.bf16.mxu0 %v8776_v31  ;;  %v8877_v6 = vld [vmem:[%s9246_s14 + $0x1b8] ss:$20 sps:$4 sm:$0xff]  }
 0x1da   : > { %v7526_v35 = vpop.f32.mrb[104].mxu0  ;;  %v9971_v59 = vadd.f32 %v9738_v33, %v1471_v46  ;;  %v8781_v46 = vld [vmem:[%s9246_s14 + $0xd8] ss:$20 sps:$4 sm:$0xff]  }
 0x1db   : > { %v7527_v51 = vpop.f32.mrb[105].mxu0  ;;  %3769 = vmatmul.mubr.bf16.gmra.mrb[116].mxu1 %v8877_v6  ;;  %v8789_v6 = vld [vmem:[%s9246_s14 + $0x150] ss:$20 sps:$4 sm:$0xff]  }
 0x1dc   : > { %v7528_v5 = vadd.f32 %v7527_v51, %v7526_v35  ;;  %v7529_v2 = vpop.f32.mrb[106].mxu0  ;;  %7941 = vmatpush3.bf16.msra.mxu0 %v8777_v62  ;;  %v8796_v51 = vld [vmem:[%s12149_s1 + $0x328] sm:$0xff]  }
 0x1dd   : > { %v7530_v16 = vpop.f32.mrb[107].mxu0  ;;  %7942 = vmatprep.subr.bf16.mxu0 %v8782_v21  ;;  %v8784_v21 = vld [vmem:[%s9246_s14 + $0x100] ss:$20 sps:$4 sm:$0xff]  }
 0x1de   : > { %v1476_v33 = vadd.f32 %v7528_v5, %v12207_v27  ;;  %v7531_v49 = vadd.f32 %v7530_v16, %v7529_v2  ;;  %v8803_v27 = vld [vmem:[%s12149_s1 + $0x330] sm:$0xff]  }
 0x1df   : > { %8123 = vmatmul.mubr.msk.bf16.gmra.mrb[116].mxu0 %vm1151_vm0, %v8775_v12  ;;  %v8879_v12 = vld [vmem:[%s9246_s14 + $0x1e4] ss:$20 sps:$4 sm:$0xff]  }
 0x1e0   : > { %v1479_v31 = vadd.f32 %v7531_v49, %v12208_v18  ;;  %8126 = vmatprep.mubr.msk.bf16.mxu0 %vm1151_vm0, %v8779_v28  ;;  %7943 = vmatpush3.bf16.msra.mxu0 %v8783_v39  ;;  %v9991_v55 = vadd.f32 %v9744_v15, %v1476_v33  ;;  %v8793_v15 = vld [vmem:[%s12149_s1 + $0x2e0] sm:$0xff]   ;;  %v12210_v39 = vld [vmem:[#allocation24_spill] sm:$0xff]  ;;  %v8785_v49 = vld [vmem:[%s9246_s14 + $0x128] ss:$20 sps:$4 sm:$0xff]  }
 0x1e1   : > { %7944 = vmatprep.subr.bf16.mxu0 %v8786_v48  ;;  %v8883_v28 = vld [vmem:[%s9246_s14 + $0x1e0] ss:$20 sps:$4 sm:$0xff]   ;;  %3776 = vmatprep.mubr.bf16.mxu1 %v8879_v12  ;;  %v8797_v48 = vld [vmem:[%s12149_s1 + $0x2e8] sm:$0xff]  }
 0x1e2   : > { %v7532_v13 = vpop.f32.mrb[108].mxu0  ;;  %v9997_v14 = vadd.f32 %v9750_v19, %v1479_v31  ;;  %v12209_v19 = vld [vmem:[#allocation23_spill] sm:$0xff]  ;;  %v8805_v18 = vld [vmem:[%s12149_s1 + $0x2f0] sm:$0xff]  }
 0x1e3   : > { %v7533_v58 = vpop.f32.mrb[109].mxu0  ;;  %3777 = vmatmul.mubr.bf16.gmra.mrb[120].mxu1 %v8883_v28  ;;  %v8885_v31 = vld [vmem:[%s9246_s14 + $0x20c] ss:$20 sps:$4 sm:$0xff]   ;;  %v8821_v28 = vld [vmem:[%s9246_s14 + $0x5c] ss:$20 sps:$4 sm:$0xff]  }
 0x1e4   : > { %v7534_v62 = vadd.f32 %v7533_v58, %v7532_v13  ;;  %v7535_v37 = vpop.f32.mrb[110].mxu0  ;;  %7945 = vmatpush3.bf16.msra.mxu0 %v8787_v22  ;;  %v8887_v22 = vld [vmem:[%s9246_s14 + $0x208] ss:$20 sps:$4 sm:$0xff]   ;;  %3784 = vmatprep.mubr.bf16.mxu1 %v8885_v31  ;;  %v8791_v13 = vld [vmem:[%s9246_s14 + $0x178] ss:$20 sps:$4 sm:$0xff]  }
 0x1e5   : > { %v7536_v35 = vpop.f32.mrb[111].mxu0  ;;  %7946 = vmatprep.subr.bf16.mxu0 %v8792_v56  ;;  %v8822_v56 = vld [vmem:[%s12149_s1 + $0x340] sm:$0xff]   ;;  %v8891_v31 = vld [vmem:[%s12149_s1 + $0x358] sm:$0xff]  }
 0x1e6   : > { %v1484_v5 = vadd.f32 %v7534_v62, %v12209_v19  ;;  %v7537_v2 = vadd.f32 %v7536_v35, %v7535_v37  ;;  %v8794_v58 = vld [vmem:[%s9246_s14 + $0x1a0] ss:$20 sps:$4 sm:$0xff]   ;;  %v8890_v62 = vld [vmem:[%s9246_s14 + $0x230] ss:$20 sps:$4 sm:$0xff]   ;;  %v8795_v37 = vld [vmem:[%s9246_s14 + $0x1c8] ss:$20 sps:$4 sm:$0xff]  }
 0x1e7   : > { %8127 = vmatmul.mubr.msk.bf16.gmra.mrb[120].mxu0 %vm1151_vm0, %v8781_v46  ;;  %v8888_v46 = vld [vmem:[%s9246_s14 + $0x234] ss:$20 sps:$4 sm:$0xff]   ;;  %v8895_v35 = vld [vmem:[%s9246_s14 + $0x258] ss:$20 sps:$4 sm:$0xff]  }
 0x1e8   : > { %v1487_v16 = vadd.f32 %v7537_v2, %v12210_v39  ;;  %8130 = vmatprep.mubr.msk.bf16.mxu0 %vm1151_vm0, %v8784_v21  ;;  %7947 = vmatpush3.bf16.msra.mxu0 %v8793_v15  ;;  %v10017_v11 = vadd.f32 %v9762_v53, %v1484_v5  ;;  %v8811_v53 = vld [vmem:[%s12149_s1 + $0x338] sm:$0xff]   ;;  %v8800_v21 = vld [vmem:[%s9246_s14 + $0x1f0] ss:$20 sps:$4 sm:$0xff]   ;;  %v8808_v12 = vld [vmem:[%s9246_s14 + $0x240] ss:$20 sps:$4 sm:$0xff]  }
 0x1e9   : > { %7948 = vmatprep.subr.bf16.mxu0 %v8796_v51  ;;  %v8892_v15 = vld [vmem:[%s9246_s14 + $0x25c] ss:$20 sps:$4 sm:$0xff]   ;;  %v8801_v51 = vld [vmem:[%s9246_s14 + $0x218] ss:$20 sps:$4 sm:$0xff]   ;;  %v8901_v5 = vld [vmem:[%s9246_s14 + $0x280] ss:$20 sps:$4 sm:$0xff]  }
 0x1ea   : > { %v10023_v33 = vadd.f32 %v9771_v38, %v1487_v16  ;;  %v8813_v38 = vld [vmem:[%s12149_s1 + $0x2f8] sm:$0xff]   ;;  %v8902_v39 = vld [vmem:[%s9246_s14 + $0x2ac] ss:$20 sps:$4 sm:$0xff]  }
 0x1eb   : > { %3785 = vmatmul.mubr.bf16.gmra.mrb[124].mxu1 %v8887_v22  ;;  %v8896_v19 = vld [vmem:[%s9246_s14 + $0x284] ss:$20 sps:$4 sm:$0xff]   ;;  %v8809_v2 = vld [vmem:[%s9246_s14 + $0x268] ss:$20 sps:$4 sm:$0xff]  }
 0x1ec   : > { %7949 = vmatpush3.bf16.msra.mxu0 %v8797_v48  ;;  %3792 = vmatprep.mubr.bf16.mxu1 %v8888_v46  ;;  %v8907_v16 = vld [vmem:[%s9246_s14 + $0x2a8] ss:$20 sps:$4 sm:$0xff]   ;;  %v8819_v48 = vld [vmem:[%s9246_s14 + $0x58] ss:$20 sps:$4 sm:$0xff]  }
 0x1ed   : > { %7950 = vmatprep.subr.bf16.mxu0 %v8803_v27  ;;  %v8825_v27 = vld [vmem:[%s9246_s14 + $0x84] ss:$20 sps:$4 sm:$0xff]   ;;  %v8834_v22 = vld [vmem:[%s9246_s14 + $0xa8] ss:$20 sps:$4 sm:$0xff]  }
 0x1ef   : > { %8131 = vmatmul.mubr.msk.bf16.gmra.mrb[124].mxu0 %vm1151_vm0, %v8785_v49  ;;  %v8847_v49 = vld [vmem:[%s12149_s1 + $0x348] sm:$0xff]  }
 0x1f0   : > { %8134 = vmatprep.mubr.msk.bf16.mxu0 %vm1151_vm0, %v8789_v6  ;;  %7951 = vmatpush3.bf16.msra.mxu0 %v8805_v18  ;;  %v8872_v6 = vld [vmem:[%s12149_s1 + $0x350] sm:$0xff]  }
 0x1f1   : > { %7952 = vmatprep.subr.bf16.mxu0 %v8811_v53  ;;  %v8828_v18 = vld [vmem:[%s9246_s14 + $0x80] ss:$20 sps:$4 sm:$0xff]  }
 0x1f2   : > { %v8831_v53 = vld [vmem:[%s9246_s14 + $0xac] ss:$20 sps:$4 sm:$0xff]  }
 0x1f3   : > { %3793 = vmatmul.mubr.bf16.gmra.mrb[128].mxu1 %v8890_v62 }
 0x1f4   : > { %7953 = vmatpush3.bf16.msra.mxu0 %v8813_v38  ;;  %3800 = vmatprep.mubr.bf16.mxu1 %v8892_v15  ;;  %v8837_v38 = vld [vmem:[%s9246_s14 + $0xd4] ss:$20 sps:$4 sm:$0xff]  }
 0x1f5   : > { %8150 = vmatprep.subr.bf16.mxu0 %v8822_v56 }
 0x1f7   : > { %8135 = vmatmul.mubr.msk.bf16.gmra.mrb[128].mxu0 %vm1151_vm0, %v8791_v13 }
 0x1f8   : > { %8138 = vmatprep.mubr.msk.bf16.mxu0 %vm1151_vm0, %v8794_v58  ;;  %v8840_v58 = vld [vmem:[%s9246_s14 + $0xd0] ss:$20 sps:$4 sm:$0xff]  }
 0x1fb   : > { %3801 = vmatmul.mubr.bf16.gmra.mrb[132].mxu1 %v8895_v35 }
 0x1fc   : > { %3808 = vmatprep.mubr.bf16.mxu1 %v8896_v19 }
 0x1ff   : > { %8139 = vmatmul.mubr.msk.bf16.gmra.mrb[132].mxu0 %vm1151_vm0, %v8795_v37  ;;  %v8843_v37 = vld [vmem:[%s9246_s14 + $0xfc] ss:$20 sps:$4 sm:$0xff]  }
 0x200   : > { %8142 = vmatprep.mubr.msk.bf16.mxu0 %vm1151_vm0, %v8800_v21 }
 0x203   : > { %3809 = vmatmul.mubr.bf16.gmra.mrb[136].mxu1 %v8901_v5  ;;  %v8846_v5 = vld [vmem:[%s9246_s14 + $0xf8] ss:$20 sps:$4 sm:$0xff]  }
 0x204   : > { %3816 = vmatprep.mubr.bf16.mxu1 %v8902_v39  ;;  %v8850_v39 = vld [vmem:[%s9246_s14 + $0x124] ss:$20 sps:$4 sm:$0xff]  }
 0x207   : > { %8143 = vmatmul.mubr.msk.bf16.gmra.mrb[136].mxu0 %vm1151_vm0, %v8801_v51 }
 0x208   : > { %8146 = vmatprep.mubr.msk.bf16.mxu0 %vm1151_vm0, %v8808_v12 }
 0x20b   : > { %3817 = vmatmul.mubr.bf16.gmra.mrb[140].mxu1 %v8907_v16 }
 0x20f   : > { %8147 = vmatmul.mubr.msk.bf16.gmra.mrb[140].mxu0 %vm1151_vm0, %v8809_v2 }
 0x210   : > { %3857 = vmatprep.mubr.bf16.mxu0 %v8821_v28 }
 0x217   : > { %3858 = vmatmul.mubr.bf16.vlgmr.msra.gmra.mrb[208].mxu0 %v8819_v48 }
 0x218   : > { %8151 = vmatpush3.bf16.msra.mxu0 %v8822_v56  ;;  %3865 = vmatprep.mubr.bf16.mxu0 %v8825_v27 }
 0x219   : > { %8152 = vmatprep.subr.bf16.mxu0 %v8847_v49 }
 0x21c   : > { %8153 = vmatpush3.bf16.msra.mxu0 %v8847_v49 }
 0x21d   : > { %8154 = vmatprep.subr.bf16.mxu0 %v8872_v6 }
 0x21f   : > { %3866 = vmatmul.mubr.bf16.gmra.mrb[212].mxu0 %v8828_v18 }
 0x220   : > { %3873 = vmatprep.mubr.bf16.mxu0 %v8831_v53  ;;  %8155 = vmatpush3.bf16.msra.mxu0 %v8872_v6  ;;  %v8853_v6 = vld [vmem:[%s9246_s14 + $0x120] ss:$20 sps:$4 sm:$0xff]  }
 0x221   : > { %8156 = vmatprep.subr.bf16.mxu0 %v8891_v31 }
 0x224   : > { %8157 = vmatpush3.bf16.msra.mxu0 %v8891_v31  ;;  %v8856_v31 = vld [vmem:[%s9246_s14 + $0x14c] ss:$20 sps:$4 sm:$0xff]  }
 0x227   : > { %3874 = vmatmul.mubr.bf16.gmra.mrb[216].mxu0 %v8834_v22 }
 0x228   : > { %3881 = vmatprep.mubr.bf16.mxu0 %v8837_v38 }
 0x22a   : > { %v7710_v56 = vpop.f32.mrb[144].mxu0 }
 0x22b   : > { %v7711_v13 = vpop.f32.mrb[145].mxu0 }
 0x22c   : > { %v7712_v46 = vadd.f32 %v7711_v13, %v7710_v56  ;;  %v7713_v62 = vpop.f32.mrb[146].mxu0 }
 0x22d   : > { %v7714_v21 = vpop.f32.mrb[147].mxu0 }
 0x22e   : > { %v10084_v15 = vadd.f32 %v9803_v24, %v7712_v46  ;;  %v7715_v35 = vadd.f32 %v7714_v21, %v7713_v62 }
 0x22f   : > { %3882 = vmatmul.mubr.bf16.gmra.mrb[220].mxu0 %v8840_v58  ;;  %v8859_v58 = vld [vmem:[%s9246_s14 + $0x148] ss:$20 sps:$4 sm:$0xff]  }
 0x230   : > { %v10087_v51 = vadd.f32 %v9813_v45, %v7715_v35  ;;  %3889 = vmatprep.mubr.bf16.mxu0 %v8843_v37  ;;  %v8862_v37 = vld [vmem:[%s9246_s14 + $0x174] ss:$20 sps:$4 sm:$0xff]  }
 0x232   : > { %v7716_v12 = vpop.f32.mrb[148].mxu0 }
 0x233   : > { %v7717_v19 = vpop.f32.mrb[149].mxu0 }
 0x234   : > { %v7718_v2 = vadd.f32 %v7717_v19, %v7716_v12  ;;  %v7719_v28 = vpop.f32.mrb[150].mxu0 }
 0x235   : > { %v7720_v16 = vpop.f32.mrb[151].mxu0 }
 0x236   : > { %v10092_v48 = vadd.f32 %v9825_v42, %v7718_v2  ;;  %v7721_v24 = vadd.f32 %v7720_v16, %v7719_v28 }
 0x237   : > { %3890 = vmatmul.mubr.bf16.gmra.mrb[224].mxu0 %v8846_v5  ;;  %v8865_v5 = vld [vmem:[%s9246_s14 + $0x170] ss:$20 sps:$4 sm:$0xff]  }
 0x238   : > { %v10095_v27 = vadd.f32 %v9831_v3, %v7721_v24  ;;  %3897 = vmatprep.mubr.bf16.mxu0 %v8850_v39  ;;  %v8868_v39 = vld [vmem:[%s9246_s14 + $0x19c] ss:$20 sps:$4 sm:$0xff]  }
 0x23a   : > { %v7722_v45 = vpop.f32.mrb[152].mxu0 }
 0x23b   : > { %v7723_v49 = vpop.f32.mrb[153].mxu0 }
 0x23c   : > { %v7724_v18 = vadd.f32 %v7723_v49, %v7722_v45  ;;  %v7725_v53 = vpop.f32.mrb[154].mxu0 }
 0x23d   : > { %v7726_v22 = vpop.f32.mrb[155].mxu0 }
 0x23e   : > { %v10100_v38 = vadd.f32 %v9843_v63, %v7724_v18  ;;  %v7727_v42 = vadd.f32 %v7726_v22, %v7725_v53 }
 0x23f   : > { %3898 = vmatmul.mubr.bf16.gmra.mrb[228].mxu0 %v8853_v6  ;;  %v8871_v6 = vld [vmem:[%s9246_s14 + $0x198] ss:$20 sps:$4 sm:$0xff]  }
 0x240   : > { %v10103_v56 = vadd.f32 %v9849_v7, %v7727_v42  ;;  %3905 = vmatprep.mubr.bf16.mxu0 %v8856_v31  ;;  %v8875_v31 = vld [vmem:[%s9246_s14 + $0x1c4] ss:$20 sps:$4 sm:$0xff]  }
 0x242   : > { %v7728_v3 = vpop.f32.mrb[156].mxu0 }
 0x243   : > { %v7729_v13 = vpop.f32.mrb[157].mxu0 }
 0x244   : > { %v7730_v46 = vadd.f32 %v7729_v13, %v7728_v3  ;;  %v7731_v62 = vpop.f32.mrb[158].mxu0 }
 0x245   : > { %v7732_v21 = vpop.f32.mrb[159].mxu0 }
 0x246   : > { %v10108_v35 = vadd.f32 %v9860_v1, %v7730_v46  ;;  %v7733_v63 = vadd.f32 %v7732_v21, %v7731_v62 }
 0x247   : > { %3906 = vmatmul.mubr.bf16.gmra.mrb[232].mxu0 %v8859_v58  ;;  %v8878_v58 = vld [vmem:[%s9246_s14 + $0x1c0] ss:$20 sps:$4 sm:$0xff]  }
 0x248   : > { %v10111_v12 = vadd.f32 %v9866_v47, %v7733_v63  ;;  %3913 = vmatprep.mubr.bf16.mxu0 %v8862_v37  ;;  %v8881_v37 = vld [vmem:[%s9246_s14 + $0x1ec] ss:$20 sps:$4 sm:$0xff]  }
 0x24a   : > { %v7734_v7 = vpop.f32.mrb[160].mxu0 }
 0x24b   : > { %v7735_v19 = vpop.f32.mrb[161].mxu0 }
 0x24c   : > { %v7736_v2 = vadd.f32 %v7735_v19, %v7734_v7  ;;  %v7737_v28 = vpop.f32.mrb[162].mxu0 }
 0x24d   : > { %v7738_v16 = vpop.f32.mrb[163].mxu0 }
 0x24e   : > { %v10116_v24 = vadd.f32 %v9875_v0, %v7736_v2  ;;  %v7739_v1 = vadd.f32 %v7738_v16, %v7737_v28 }
 0x24f   : > { %3914 = vmatmul.mubr.bf16.gmra.mrb[236].mxu0 %v8865_v5  ;;  %v8884_v5 = vld [vmem:[%s9246_s14 + $0x1e8] ss:$20 sps:$4 sm:$0xff]  }
 0x250   : > { %v10119_v45 = vadd.f32 %v9878_v43, %v7739_v1  ;;  %3921 = vmatprep.mubr.bf16.mxu0 %v8868_v39 }
 0x252   : > { %v7740_v47 = vpop.f32.mrb[164].mxu0 }
 0x253   : > { %v7741_v49 = vpop.f32.mrb[165].mxu0 }
 0x254   : > { %v7742_v18 = vadd.f32 %v7741_v49, %v7740_v47  ;;  %v7743_v53 = vpop.f32.mrb[166].mxu0 }
 0x255   : > { %v7744_v22 = vpop.f32.mrb[167].mxu0 }
 0x256   : > { %v10124_v42 = vadd.f32 %v9890_v34, %v7742_v18  ;;  %v7745_v0 = vadd.f32 %v7744_v22, %v7743_v53 }
 0x257   : > { %3922 = vmatmul.mubr.bf16.gmra.mrb[240].mxu0 %v8871_v6 }
 0x258   : > { %v10127_v3 = vadd.f32 %v9893_v30, %v7745_v0  ;;  %3929 = vmatprep.mubr.bf16.mxu0 %v8875_v31 }
 0x25a   : > { %v7746_v43 = vpop.f32.mrb[168].mxu0 }
 0x25b   : > { %v7747_v13 = vpop.f32.mrb[169].mxu0 }
 0x25c   : > { %v7748_v46 = vadd.f32 %v7747_v13, %v7746_v43  ;;  %v7749_v62 = vpop.f32.mrb[170].mxu0 }
 0x25d   : > { %v7750_v21 = vpop.f32.mrb[171].mxu0 }
 0x25e   : > { %v10132_v63 = vadd.f32 %v9908_v25, %v7748_v46  ;;  %v7751_v7 = vadd.f32 %v7750_v21, %v7749_v62 }
 0x25f   : > { %3930 = vmatmul.mubr.bf16.gmra.mrb[244].mxu0 %v8878_v58 }
 0x260   : > { %v10135_v34 = vadd.f32 %v9913_v29, %v7751_v7  ;;  %3937 = vmatprep.mubr.bf16.mxu0 %v8881_v37 }
 0x262   : > { %v7752_v30 = vpop.f32.mrb[172].mxu0 }
 0x263   : > { %v7753_v19 = vpop.f32.mrb[173].mxu0 }
 0x264   : > { %v7754_v2 = vadd.f32 %v7753_v19, %v7752_v30  ;;  %v7755_v28 = vpop.f32.mrb[174].mxu0 }
 0x265   : > { %v7756_v39 = vpop.f32.mrb[175].mxu0 }
 0x266   : > { %v10139_v16 = vadd.f32 %v9927_v4, %v7754_v2  ;;  %v7757_v1 = vadd.f32 %v7756_v39, %v7755_v28  ;;  %v7842_v49 = vpop.f32.mrb[80].mxu1 }
 0x267   : > { %3938 = vmatmul.mubr.bf16.gmra.mrb[248].mxu0 %v8884_v5  ;;  %v7843_v53 = vpop.f32.mrb[81].mxu1 }
 0x268   : > { %v10142_v25 = vadd.f32 %v9930_v17, %v7757_v1  ;;  %3945 = vmatprep.mubr.bf16.mxu0 %v9881_v41  ;;  %v10145_v22 = vadd.f32 %v7843_v53, %v7842_v49  ;;  %v7845_v0 = vpop.f32.mrb[82].mxu1  ;;  %v8900_v49 = vld [vmem:[%s9246_s14 + $0x28c] ss:$20 sps:$4 sm:$0xff]  }
 0x269   : > { %v7846_v13 = vpop.f32.mrb[83].mxu1 }
 0x26a   : > { %v7758_v47 = vpop.f32.mrb[176].mxu0  ;;  %v10151_v17 = vadd.f32 %v7846_v13, %v7845_v0 }
 0x26b   : > { %v7759_v29 = vpop.f32.mrb[177].mxu0 }
 0x26c   : > { %v7760_v6 = vadd.f32 %v7759_v29, %v7758_v47  ;;  %v7761_v18 = vpop.f32.mrb[178].mxu0 }
 0x26d   : > { %v7762_v31 = vpop.f32.mrb[179].mxu0 }
 0x26e   : > { %v10148_v4 = vadd.f32 %v9942_v54, %v7760_v6  ;;  %v7763_v43 = vadd.f32 %v7762_v31, %v7761_v18  ;;  %v7848_v62 = vpop.f32.mrb[84].mxu1 }
 0x26f   : > { %3946 = vmatmul.mubr.bf16.gmra.mrb[252].mxu0 %v9896_v61  ;;  %v7849_v7 = vpop.f32.mrb[85].mxu1 }
 0x270   : > { %v10154_v41 = vadd.f32 %v9945_v52, %v7763_v43  ;;  %3953 = vmatprep.mubr.bf16.mxu0 %v9899_v40  ;;  %v10157_v30 = vadd.f32 %v7849_v7, %v7848_v62  ;;  %v7851_v19 = vpop.f32.mrb[86].mxu1 }
 0x271   : > { %v7852_v2 = vpop.f32.mrb[87].mxu1 }
 0x272   : > { %v7764_v58 = vpop.f32.mrb[180].mxu0  ;;  %v10163_v52 = vadd.f32 %v7852_v2, %v7851_v19 }
 0x273   : > { %v7765_v46 = vpop.f32.mrb[181].mxu0 }
 0x274   : > { %v7766_v37 = vadd.f32 %v7765_v46, %v7764_v58  ;;  %v7767_v21 = vpop.f32.mrb[182].mxu0  ;;  %v8898_v58 = vld [vmem:[%s9246_s14 + $0x288] ss:$20 sps:$4 sm:$0xff]  }
 0x275   : > { %v7768_v54 = vpop.f32.mrb[183].mxu0 }
 0x276   : > { %v10160_v61 = vadd.f32 %v9965_v50, %v7766_v37  ;;  %v7769_v5 = vadd.f32 %v7768_v54, %v7767_v21  ;;  %v7854_v1 = vpop.f32.mrb[88].mxu1  ;;  %v8906_v21 = vld [vmem:[%s9246_s14 + $0x2b4] ss:$20 sps:$4 sm:$0xff]  }
 0x277   : > { %3954 = vmatmul.mubr.bf16.gmra.mrb[0].mxu0 %v9916_v36  ;;  %v7855_v50 = vpop.f32.mrb[89].mxu1 }
 0x278   : > { %v10166_v40 = vadd.f32 %v9971_v59, %v7769_v5  ;;  %3961 = vmatprep.mubr.bf16.mxu0 %v9918_v60  ;;  %v10170_v18 = vadd.f32 %v7855_v50, %v7854_v1  ;;  %v7857_v36 = vpop.f32.mrb[90].mxu1 }
 0x279   : > { %v7858_v31 = vpop.f32.mrb[91].mxu1 }
 0x27a   : > { %v7770_v28 = vpop.f32.mrb[184].mxu0  ;;  %v10176_v60 = vadd.f32 %v7858_v31, %v7857_v36 }
 0x27b   : > { %v7771_v39 = vpop.f32.mrb[185].mxu0 }
 0x27c   : > { %v7772_v47 = vadd.f32 %v7771_v39, %v7770_v28  ;;  %v7773_v29 = vpop.f32.mrb[186].mxu0 }
 0x27d   : > { %v7774_v6 = vpop.f32.mrb[187].mxu0 }
 0x27e   : > { %v10173_v53 = vadd.f32 %v9991_v55, %v7772_v47  ;;  %v7775_v59 = vadd.f32 %v7774_v6, %v7773_v29  ;;  %v7860_v46 = vpop.f32.mrb[92].mxu1  ;;  %v8904_v47 = vld [vmem:[%s9246_s14 + $0x2b0] ss:$20 sps:$4 sm:$0xff]   ;;  %v8908_v6 = vld [vmem:[%s9246_s14 + $0x60] ss:$20 sps:$4 sm:$0xff]  }
 0x27f   : > { %3962 = vmatmul.mubr.bf16.gmra.mrb[4].mxu0 %v9932_v32  ;;  %v7861_v55 = vpop.f32.mrb[93].mxu1 }
 0x280   : > { %v10179_v0 = vadd.f32 %v9997_v14, %v7775_v59  ;;  %3969 = vmatprep.mubr.bf16.mxu0 %v8900_v49  ;;  %v10183_v54 = vadd.f32 %v7861_v55, %v7860_v46  ;;  %v7863_v32 = vpop.f32.mrb[94].mxu1 }
 0x281   : > { %v7864_v5 = vpop.f32.mrb[95].mxu1 }
 0x282   : > { %v7776_v43 = vpop.f32.mrb[188].mxu0  ;;  %v10188_v2 = vadd.f32 %v7864_v5, %v7863_v32 }
 0x283   : > { %v7777_v13 = vpop.f32.mrb[189].mxu0 }
 0x284   : > { %v7778_v62 = vadd.f32 %v7777_v13, %v7776_v43  ;;  %v7779_v37 = vpop.f32.mrb[190].mxu0 }
 0x285   : > { %v7780_v7 = vpop.f32.mrb[191].mxu0 }
 0x286   : > { %v10186_v19 = vadd.f32 %v10017_v11, %v7778_v62  ;;  %v7781_v14 = vadd.f32 %v7780_v7, %v7779_v37  ;;  %v7866_v29 = vpop.f32.mrb[96].mxu1 }
 0x287   : > { %3970 = vmatmul.mubr.bf16.gmra.mrb[8].mxu0 %v8898_v58  ;;  %v7867_v36 = vpop.f32.mrb[97].mxu1 }
 0x288   : > { %v10191_v28 = vadd.f32 %v10023_v33, %v7781_v14  ;;  %3977 = vmatprep.mubr.bf16.mxu0 %v8906_v21  ;;  %v10195_v59 = vadd.f32 %v7867_v36, %v7866_v29  ;;  %v7869_v31 = vpop.f32.mrb[98].mxu1  ;;  %v8909_v21 = vld [vmem:[%s9246_s14 + $0x88] ss:$20 sps:$4 sm:$0xff]   ;;  %v8910_v14 = vld [vmem:[%s9246_s14 + $0xb0] ss:$20 sps:$4 sm:$0xff]  }
 0x289   : > { %v7870_v13 = vpop.f32.mrb[99].mxu1 }
 0x28a   : > { %12211 = vst [vmem:[#allocation17_spill] sm:$0xff] %v10191_v28  ;;  %v7782_v39 = vpop.f32.mrb[192].mxu0  ;;  %v10200_v58 = vadd.f32 %v7870_v13, %v7869_v31 }
 0x28b   : > { %v7783_v1 = vpop.f32.mrb[193].mxu0 }
 0x28c   : > { %v7784_v49 = vadd.f32 %v7783_v1, %v7782_v39  ;;  %v7785_v50 = vpop.f32.mrb[194].mxu0 }
 0x28d   : > { %v7786_v11 = vpop.f32.mrb[195].mxu0 }
 0x28e   : > { %v10198_v43 = vadd.f32 %v9791_v10, %v7784_v49  ;;  %v7787_v33 = vadd.f32 %v7786_v11, %v7785_v50  ;;  %v7872_v55 = vpop.f32.mrb[100].mxu1  ;;  %v8911_v11 = vld [vmem:[%s9246_s14 + $0xd8] ss:$20 sps:$4 sm:$0xff]  }
 0x28f   : > { %3978 = vmatmul.mubr.bf16.gmra.mrb[12].mxu0 %v8904_v47  ;;  %v7873_v10 = vpop.f32.mrb[101].mxu1 }
 0x290   : > { %12212 = vst [vmem:[#allocation9_spill] sm:$0xff] %v10198_v43  ;;  %v10203_v46 = vadd.f32 %v9806_v57, %v7787_v33  ;;  %8158 = vmatprep.mubr.msk.bf16.mxu0 %vm1151_vm0, %v8908_v6  ;;  %v10208_v39 = vadd.f32 %v7873_v10, %v7872_v55  ;;  %v7875_v1 = vpop.f32.mrb[102].mxu1 }
 0x291   : > { %v7876_v29 = vpop.f32.mrb[103].mxu1 }
 0x292   : > { %12213 = vst [vmem:[#allocation6_spill] sm:$0xff] %v10203_v46  ;;  %v7788_v62 = vpop.f32.mrb[196].mxu0  ;;  %v10214_v49 = vadd.f32 %v7876_v29, %v7875_v1 }
 0x293   : > { %v7789_v37 = vpop.f32.mrb[197].mxu0 }
 0x294   : > { %v7790_v7 = vadd.f32 %v7789_v37, %v7788_v62  ;;  %v7791_v32 = vpop.f32.mrb[198].mxu0 }
 0x295   : > { %v7792_v5 = vpop.f32.mrb[199].mxu0 }
 0x296   : > { %v10211_v47 = vadd.f32 %v9818_v20, %v7790_v7  ;;  %v7793_v57 = vadd.f32 %v7792_v5, %v7791_v32  ;;  %v7878_v31 = vpop.f32.mrb[104].mxu1  ;;  %v8912_v20 = vld [vmem:[%s9246_s14 + $0x100] ss:$20 sps:$4 sm:$0xff]  }
 0x297   : > { %8159 = vmatmul.mubr.msk.bf16.vlgmr.msra.gmra.mrb[112].mxu0 %vm1151_vm0, %v8909_v21  ;;  %v7879_v62 = vpop.f32.mrb[105].mxu1 }
 0x298   : > { %12214 = vst [vmem:[#allocation10_spill] sm:$0xff] %v10211_v47  ;;  %v10217_v50 = vadd.f32 %v9828_v8, %v7793_v57  ;;  %8162 = vmatprep.mubr.msk.bf16.mxu0 %vm1151_vm0, %v8910_v14  ;;  %v10222_v55 = vadd.f32 %v7879_v62, %v7878_v31  ;;  %v7881_v21 = vpop.f32.mrb[106].mxu1  ;;  %v8913_v57 = vld [vmem:[%s9246_s14 + $0x128] ss:$20 sps:$4 sm:$0xff]  }
 0x299   : > { %v7882_v32 = vpop.f32.mrb[107].mxu1 }
 0x29a   : > { %12215 = vst [vmem:[#allocation7_spill] sm:$0xff] %v10217_v50  ;;  %v7794_v6 = vpop.f32.mrb[200].mxu0  ;;  %v10228_v14 = vadd.f32 %v7882_v32, %v7881_v21  ;;  %v8916_v32 = vld [vmem:[%s9246_s14 + $0x1a0] ss:$20 sps:$4 sm:$0xff]  }
 0x29b   : > { %v7795_v36 = vpop.f32.mrb[201].mxu0 }
 0x29c   : > { %v7796_v33 = vadd.f32 %v7795_v36, %v7794_v6  ;;  %v7797_v13 = vpop.f32.mrb[202].mxu0  ;;  %v8914_v36 = vld [vmem:[%s9246_s14 + $0x150] ss:$20 sps:$4 sm:$0xff]  }
 0x29d   : > { %v7798_v37 = vpop.f32.mrb[203].mxu0 }
 0x29e   : > { %v10225_v7 = vadd.f32 %v9836_v23, %v7796_v33  ;;  %v7799_v8 = vadd.f32 %v7798_v37, %v7797_v13  ;;  %v7884_v29 = vpop.f32.mrb[108].mxu1 }
 0x29f   : > { %8163 = vmatmul.mubr.msk.bf16.gmra.mrb[116].mxu0 %vm1151_vm0, %v8911_v11  ;;  %v7885_v31 = vpop.f32.mrb[109].mxu1 }
 0x2a0   : > { %12216 = vst [vmem:[#allocation11_spill] sm:$0xff] %v10225_v7  ;;  %v10231_v10 = vadd.f32 %v9846_v26, %v7799_v8  ;;  %8166 = vmatprep.mubr.msk.bf16.mxu0 %vm1151_vm0, %v8912_v20  ;;  %v10236_v13 = vadd.f32 %v7885_v31, %v7884_v29  ;;  %v7887_v11 = vpop.f32.mrb[110].mxu1  ;;  %v8915_v8 = vld [vmem:[%s9246_s14 + $0x178] ss:$20 sps:$4 sm:$0xff]  }
 0x2a1   : > { %v7888_v20 = vpop.f32.mrb[111].mxu1 }
 0x2a2   : > { %12217 = vst [vmem:[#allocation8_spill] sm:$0xff] %v10231_v10  ;;  %v7800_v5 = vpop.f32.mrb[204].mxu0  ;;  %v10242_v37 = vadd.f32 %v7888_v20, %v7887_v11 }
 0x2a3   : > { %v7801_v1 = vpop.f32.mrb[205].mxu0 }
 0x2a4   : > { %v7802_v6 = vadd.f32 %v7801_v1, %v7800_v5  ;;  %v7803_v23 = vpop.f32.mrb[206].mxu0 }
 0x2a5   : > { %v7804_v33 = vpop.f32.mrb[207].mxu0 }
 0x2a6   : > { %v10239_v62 = vadd.f32 %v9854_v44, %v7802_v6  ;;  %v7805_v26 = vadd.f32 %v7804_v33, %v7803_v23  ;;  %v7890_v5 = vpop.f32.mrb[112].mxu1  ;;  %v8918_v23 = vld [vmem:[%s9246_s14 + $0x1f0] ss:$20 sps:$4 sm:$0xff]  }
 0x2a7   : > { %8167 = vmatmul.mubr.msk.bf16.gmra.mrb[120].mxu0 %vm1151_vm0, %v8913_v57  ;;  %v7891_v1 = vpop.f32.mrb[113].mxu1 }
 0x2a8   : > { %12218 = vst [vmem:[#allocation12_spill] sm:$0xff] %v10239_v62  ;;  %v10245_v21 = vadd.f32 %v9863_v9, %v7805_v26  ;;  %8170 = vmatprep.mubr.msk.bf16.mxu0 %vm1151_vm0, %v8914_v36  ;;  %v10250_v29 = vadd.f32 %v7891_v1, %v7890_v5  ;;  %v7893_v44 = vpop.f32.mrb[114].mxu1  ;;  %v8917_v9 = vld [vmem:[%s9246_s14 + $0x1c8] ss:$20 sps:$4 sm:$0xff]  }
 0x2a9   : > { %v7894_v6 = vpop.f32.mrb[115].mxu1 }
 0x2aa   : > { %12219 = vst [vmem:[#allocation13_spill] sm:$0xff] %v10245_v21  ;;  %v10254_v57 = vadd.f32 %v7894_v6, %v7893_v44  ;;  %v8922_v21 = vld [vmem:[%s9246_s14 + $0x290] ss:$20 sps:$4 sm:$0xff]  }
 0x2ae   : > { %v7896_v31 = vpop.f32.mrb[116].mxu1 }
 0x2af   : > { %8171 = vmatmul.mubr.msk.bf16.gmra.mrb[124].mxu0 %vm1151_vm0, %v8915_v8  ;;  %v7897_v36 = vpop.f32.mrb[117].mxu1  ;;  %v8919_v8 = vld [vmem:[%s9246_s14 + $0x218] ss:$20 sps:$4 sm:$0xff]  }
 0x2b0   : > { %8174 = vmatprep.mubr.msk.bf16.mxu0 %vm1151_vm0, %v8916_v32  ;;  %v10258_v33 = vadd.f32 %v7897_v36, %v7896_v31  ;;  %v7899_v11 = vpop.f32.mrb[118].mxu1  ;;  %v8920_v32 = vld [vmem:[%s9246_s14 + $0x240] ss:$20 sps:$4 sm:$0xff]  }
 0x2b1   : > { %v7900_v26 = vpop.f32.mrb[119].mxu1 }
 0x2b2   : > { %v10262_v20 = vadd.f32 %v7900_v26, %v7899_v11 }
 0x2b6   : > { %v7902_v5 = vpop.f32.mrb[120].mxu1 }
 0x2b7   : > { %8175 = vmatmul.mubr.msk.bf16.gmra.mrb[128].mxu0 %vm1151_vm0, %v8917_v9  ;;  %v7903_v1 = vpop.f32.mrb[121].mxu1  ;;  %v8921_v9 = vld [vmem:[%s9246_s14 + $0x268] ss:$20 sps:$4 sm:$0xff]  }
 0x2b8   : > { %8178 = vmatprep.mubr.msk.bf16.mxu0 %vm1151_vm0, %v8918_v23  ;;  %v10266_v44 = vadd.f32 %v7903_v1, %v7902_v5  ;;  %v7905_v6 = vpop.f32.mrb[122].mxu1 }
 0x2b9   : > { %v7906_v31 = vpop.f32.mrb[123].mxu1 }
 0x2ba   : > { %v10270_v36 = vadd.f32 %v7906_v31, %v7905_v6 }
 0x2be   : > { %v7908_v23 = vpop.f32.mrb[124].mxu1 }
 0x2bf   : > { %8179 = vmatmul.mubr.msk.bf16.gmra.mrb[132].mxu0 %vm1151_vm0, %v8919_v8  ;;  %v7909_v11 = vpop.f32.mrb[125].mxu1  ;;  %v8923_v8 = vld [vmem:[%s9246_s14 + $0x2b8] ss:$20 sps:$4 sm:$0xff]   ;;  %s9031_s14 = smov [#allocation3]  }
 0x2c0   : > { %8182 = vmatprep.mubr.msk.bf16.mxu0 %vm1151_vm0, %v8920_v32  ;;  %v10274_v26 = vadd.f32 %v7909_v11, %v7908_v23  ;;  %v7911_v62 = vpop.f32.mrb[126].mxu1 }
 0x2c1   : > { %v7912_v5 = vpop.f32.mrb[127].mxu1 }
 0x2c2   : > { %v10278_v1 = vadd.f32 %v7912_v5, %v7911_v62 }
 0x2c6   : > { %v7914_v10 = vpop.f32.mrb[128].mxu1 }
 0x2c7   : > { %8183 = vmatmul.mubr.msk.bf16.gmra.mrb[136].mxu0 %vm1151_vm0, %v8921_v9  ;;  %v7915_v7 = vpop.f32.mrb[129].mxu1 }
 0x2c8   : > { %8186 = vmatprep.mubr.msk.bf16.mxu0 %vm1151_vm0, %v8922_v21  ;;  %v10281_v32 = vadd.f32 %v7915_v7, %v7914_v10  ;;  %v7917_v6 = vpop.f32.mrb[130].mxu1 }
 0x2c9   : > { %v7918_v31 = vpop.f32.mrb[131].mxu1 }
 0x2ca   : > { %12220 = vst [vmem:[#allocation14_spill] sm:$0xff] %v10281_v32  ;;  %v10284_v50 = vadd.f32 %v7918_v31, %v7917_v6 }
 0x2cc   : > { %12221 = vst [vmem:[#allocation15_spill] sm:$0xff] %v10284_v50 }
 0x2ce   : > { %v7920_v23 = vpop.f32.mrb[132].mxu1 }
 0x2cf   : > { %8187 = vmatmul.mubr.msk.bf16.gmra.mrb[140].mxu0 %vm1151_vm0, %v8923_v8  ;;  %v7921_v11 = vpop.f32.mrb[133].mxu1 }
 0x2d0   : > { %v10286_v47 = vadd.f32 %v7921_v11, %v7920_v23  ;;  %v7923_v9 = vpop.f32.mrb[134].mxu1 }
 0x2d1   : > { %v7924_v46 = vpop.f32.mrb[135].mxu1 }
 0x2d2   : > { %12222 = vst [vmem:[#allocation16_spill] sm:$0xff] %v10286_v47  ;;  %v10288_v21 = vadd.f32 %v7924_v46, %v7923_v9 }
 0x2d4   : > { %12223 = vst [vmem:[#allocation18_spill] sm:$0xff] %v10288_v21 }
 0x2d6   : > { %v7926_v62 = vpop.f32.mrb[136].mxu1 }
 0x2d7   : > { %v7927_v5 = vpop.f32.mrb[137].mxu1 }
 0x2d8   : > { %v10290_v43 = vadd.f32 %v7927_v5, %v7926_v62  ;;  %v7929_v7 = vpop.f32.mrb[138].mxu1 }
 0x2d9   : > { %v7930_v10 = vpop.f32.mrb[139].mxu1 }
 0x2da   : > { %12224 = vst [vmem:[#allocation19_spill] sm:$0xff] %v10290_v43  ;;  %v10292_v32 = vadd.f32 %v7930_v10, %v7929_v7 }
 0x2de   : > { %v7932_v8 = vpop.f32.mrb[140].mxu1 }
 0x2df   : > { %v7933_v28 = vpop.f32.mrb[141].mxu1 }
 0x2e0   : > { %v10294_v6 = vadd.f32 %v7933_v28, %v7932_v8  ;;  %v7935_v31 = vpop.f32.mrb[142].mxu1 }
 0x2e1   : > { %v7936_v50 = vpop.f32.mrb[143].mxu1 }
 0x2e2   : > { %12225 = vst [vmem:[#allocation20_spill] sm:$0xff] %v10294_v6  ;;  %v10296_v23 = vadd.f32 %v7936_v50, %v7935_v31 }
 0x2e4   : > { %12226 = vst [vmem:[#allocation25_spill] sm:$0xff] %v10296_v23 }
 0x2ea   : > { %v7954_v11 = vpop.f32.mrb[208].mxu0 }
 0x2eb   : > { %v7955_v47 = vpop.f32.mrb[209].mxu0 }
 0x2ec   : > { %v7956_v46 = vadd.f32 %v7955_v47, %v7954_v11  ;;  %v7957_v9 = vpop.f32.mrb[210].mxu0 }
 0x2ed   : > { %v7958_v21 = vpop.f32.mrb[211].mxu0 }
 0x2ee   : > { %v3860_v62 = vadd.f32 %v7956_v46, %v10145_v22  ;;  %v7959_v5 = vadd.f32 %v7958_v21, %v7957_v9 }
 0x2f0   : > { %v3863_v43 = vadd.f32 %v7959_v5, %v10151_v17  ;;  %v10301_v7 = vadd.f32 %v10084_v15, %v3860_v62 }
 0x2f2   : > { %v7960_v10 = vpop.f32.mrb[212].mxu0  ;;  %v10304_v28 = vadd.f32 %v10087_v51, %v3863_v43 }
 0x2f3   : > { %v7961_v8 = vpop.f32.mrb[213].mxu0 }
 0x2f4   : > { %v7962_v50 = vadd.f32 %v7961_v8, %v7960_v10  ;;  %v7963_v31 = vpop.f32.mrb[214].mxu0 }
 0x2f5   : > { %v7964_v23 = vpop.f32.mrb[215].mxu0 }
 0x2f6   : > { %v3868_v47 = vadd.f32 %v7962_v50, %v10157_v30  ;;  %v7965_v11 = vadd.f32 %v7964_v23, %v7963_v31 }
 0x2f8   : > { %v3871_v6 = vadd.f32 %v7965_v11, %v10163_v52  ;;  %v10309_v22 = vadd.f32 %v10092_v48, %v3868_v47 }
 0x2fa   : > { %v7966_v17 = vpop.f32.mrb[216].mxu0  ;;  %v10312_v15 = vadd.f32 %v10095_v27, %v3871_v6 }
 0x2fb   : > { %v7967_v21 = vpop.f32.mrb[217].mxu0 }
 0x2fc   : > { %v7968_v46 = vadd.f32 %v7967_v21, %v7966_v17  ;;  %v7969_v51 = vpop.f32.mrb[218].mxu0 }
 0x2fd   : > { %v7970_v43 = vpop.f32.mrb[219].mxu0 }
 0x2fe   : > { %v3876_v9 = vadd.f32 %v7968_v46, %v10170_v18  ;;  %v7971_v62 = vadd.f32 %v7970_v43, %v7969_v51 }
 0x300   : > { %v3879_v5 = vadd.f32 %v7971_v62, %v10176_v60  ;;  %v10317_v30 = vadd.f32 %v10100_v38, %v3876_v9 }
 0x302   : > { %v7972_v52 = vpop.f32.mrb[220].mxu0  ;;  %v10320_v48 = vadd.f32 %v10103_v56, %v3879_v5 }
 0x303   : > { %v7973_v23 = vpop.f32.mrb[221].mxu0 }
 0x304   : > { %v7974_v10 = vadd.f32 %v7973_v23, %v7972_v52  ;;  %v7975_v27 = vpop.f32.mrb[222].mxu0 }
 0x305   : > { %v7976_v6 = vpop.f32.mrb[223].mxu0 }
 0x306   : > { %v3884_v8 = vadd.f32 %v7974_v10, %v10183_v54  ;;  %v7977_v50 = vadd.f32 %v7976_v6, %v7975_v27 }
 0x308   : > { %v3887_v31 = vadd.f32 %v7977_v50, %v10188_v2  ;;  %v10325_v18 = vadd.f32 %v10108_v35, %v3884_v8 }
 0x30a   : > { %v7978_v60 = vpop.f32.mrb[224].mxu0  ;;  %v10328_v38 = vadd.f32 %v10111_v12, %v3887_v31 }
 0x30b   : > { %v7979_v47 = vpop.f32.mrb[225].mxu0 }
 0x30c   : > { %v7980_v11 = vadd.f32 %v7979_v47, %v7978_v60  ;;  %v7981_v56 = vpop.f32.mrb[226].mxu0 }
 0x30d   : > { %v7982_v17 = vpop.f32.mrb[227].mxu0 }
 0x30e   : > { %v3892_v21 = vadd.f32 %v7980_v11, %v10195_v59  ;;  %v7983_v46 = vadd.f32 %v7982_v17, %v7981_v56 }
 0x310   : > { %v3895_v51 = vadd.f32 %v7983_v46, %v10200_v58  ;;  %v10333_v54 = vadd.f32 %v10116_v24, %v3892_v21 }
 0x312   : > { %v7984_v2 = vpop.f32.mrb[228].mxu0  ;;  %v10336_v35 = vadd.f32 %v10119_v45, %v3895_v51 }
 0x313   : > { %v7985_v43 = vpop.f32.mrb[229].mxu0 }
 0x314   : > { %v7986_v9 = vadd.f32 %v7985_v43, %v7984_v2  ;;  %v7987_v12 = vpop.f32.mrb[230].mxu0 }
 0x315   : > { %v7988_v62 = vpop.f32.mrb[231].mxu0 }
 0x316   : > { %v3900_v5 = vadd.f32 %v7986_v9, %v10208_v39  ;;  %v7989_v52 = vadd.f32 %v7988_v62, %v7987_v12 }
 0x318   : > { %v3903_v23 = vadd.f32 %v7989_v52, %v10214_v49  ;;  %v10341_v59 = vadd.f32 %v10124_v42, %v3900_v5 }
 0x31a   : > { %v7990_v58 = vpop.f32.mrb[232].mxu0  ;;  %v10344_v24 = vadd.f32 %v10127_v3, %v3903_v23 }
 0x31b   : > { %v7991_v10 = vpop.f32.mrb[233].mxu0 }
 0x31c   : > { %v7992_v27 = vadd.f32 %v7991_v10, %v7990_v58  ;;  %v7993_v45 = vpop.f32.mrb[234].mxu0 }
 0x31d   : > { %v7994_v6 = vpop.f32.mrb[235].mxu0 }
 0x31e   : > { %v3908_v8 = vadd.f32 %v7992_v27, %v10222_v55  ;;  %v7995_v50 = vadd.f32 %v7994_v6, %v7993_v45 }
 0x320   : > { %v3911_v31 = vadd.f32 %v7995_v50, %v10228_v14  ;;  %v10349_v39 = vadd.f32 %v10132_v63, %v3908_v8 }
 0x322   : > { %v7996_v49 = vpop.f32.mrb[236].mxu0  ;;  %v10352_v42 = vadd.f32 %v10135_v34, %v3911_v31 }
 0x323   : > { %v7997_v60 = vpop.f32.mrb[237].mxu0 }
 0x324   : > { %v7998_v47 = vadd.f32 %v7997_v60, %v7996_v49  ;;  %v7999_v3 = vpop.f32.mrb[238].mxu0 }
 0x325   : > { %v8000_v11 = vpop.f32.mrb[239].mxu0 }
 0x326   : > { %v3916_v56 = vadd.f32 %v7998_v47, %v10236_v13  ;;  %v8001_v17 = vadd.f32 %v8000_v11, %v7999_v3 }
 0x328   : > { %v3919_v21 = vadd.f32 %v8001_v17, %v10242_v37  ;;  %v10357_v55 = vadd.f32 %v10139_v16, %v3916_v56  ;;  %v9029_v56 = vmov 0  }
 0x329   : > { %5107 = vmatprep.subr.bf16.mxu1 %v9029_v56  ;;  %4510 = vst [vmem:[#allocation2] sm:$0xff] %v9029_v56  ;;  %4511 = vst.msk [vmem:[#allocation2 + $0x8] sm:$0xff] %vm1151_vm0, %v9029_v56 }
 0x32a   : > { %v8002_v14 = vpop.f32.mrb[240].mxu0  ;;  %v10360_v63 = vadd.f32 %v10142_v25, %v3919_v21  ;;  %4514 = vst.msk [vmem:[#allocation2 + $0x118] sm:$0xff] %vm1151_vm0, %v9029_v56 }
 0x32b   : > { %v8003_v46 = vpop.f32.mrb[241].mxu0 }
 0x32c   : > { %v8004_v51 = vadd.f32 %v8003_v46, %v8002_v14  ;;  %v8005_v34 = vpop.f32.mrb[242].mxu0 }
 0x32d   : > { %v8006_v2 = vpop.f32.mrb[243].mxu0 }
 0x32e   : > { %v3924_v43 = vadd.f32 %v8004_v51, %v10250_v29  ;;  %v8007_v9 = vadd.f32 %v8006_v2, %v8005_v34  ;;  %v12228_v34 = vld [vmem:[#allocation14_spill] sm:$0xff] }
 0x330   : > { %v3927_v12 = vadd.f32 %v8007_v9, %v10254_v57  ;;  %v10365_v13 = vadd.f32 %v10148_v4, %v3924_v43  ;;  %v12229_v9 = vld [vmem:[#allocation15_spill] sm:$0xff] }
 0x332   : > { %v8008_v37 = vpop.f32.mrb[244].mxu0  ;;  %v10368_v16 = vadd.f32 %v10154_v41, %v3927_v12 }
 0x333   : > { %v8009_v62 = vpop.f32.mrb[245].mxu0 }
 0x334   : > { %v8010_v5 = vadd.f32 %v8009_v62, %v8008_v37  ;;  %v8011_v25 = vpop.f32.mrb[246].mxu0  ;;  %v12231_v62 = vld [vmem:[#allocation6_spill] sm:$0xff] }
 0x335   : > { %v8012_v52 = vpop.f32.mrb[247].mxu0 }
 0x336   : > { %v3932_v23 = vadd.f32 %v8010_v5, %v10258_v33  ;;  %v8013_v58 = vadd.f32 %v8012_v52, %v8011_v25 }
 0x338   : > { %v3935_v10 = vadd.f32 %v8013_v58, %v10262_v20  ;;  %v10373_v29 = vadd.f32 %v10160_v61, %v3932_v23 }
 0x33a   : > { %v8014_v57 = vpop.f32.mrb[248].mxu0  ;;  %v10376_v4 = vadd.f32 %v10166_v40, %v3935_v10  ;;  %v12232_v10 = vld [vmem:[#allocation16_spill] sm:$0xff] }
 0x33b   : > { %v8015_v27 = vpop.f32.mrb[249].mxu0 }
 0x33c   : > { %v8016_v45 = vadd.f32 %v8015_v27, %v8014_v57  ;;  %v8017_v41 = vpop.f32.mrb[250].mxu0 }
 0x33d   : > { %v8018_v6 = vpop.f32.mrb[251].mxu0 }
 0x33e   : > { %v3940_v8 = vadd.f32 %v8016_v45, %v10266_v44  ;;  %v8019_v50 = vadd.f32 %v8018_v6, %v8017_v41  ;;  %v8924_v44 = vld [vmem:[%s12150_s2 + $0x60] sm:$0xff]  }
 0x33f   : > { %5108 = vmatpush1.bf16.msra.mxu1 %v8924_v44  ;;  %v12233_v45 = vld [vmem:[#allocation18_spill] sm:$0xff] }
 0x340   : > { %v3943_v31 = vadd.f32 %v8019_v50, %v10270_v36  ;;  %v10381_v33 = vadd.f32 %v10173_v53, %v3940_v8  ;;  %5109 = vmatprep.subr.bf16.mxu1 %v9029_v56  ;;  %v12234_v6 = vld [vmem:[#allocation10_spill] sm:$0xff] }
 0x342   : > { %v8020_v20 = vpop.f32.mrb[252].mxu0  ;;  %v10384_v61 = vadd.f32 %v10179_v0, %v3943_v31  ;;  %v12235_v31 = vld [vmem:[#allocation7_spill] sm:$0xff] }
 0x343   : > { %v8021_v49 = vpop.f32.mrb[253].mxu0 }
 0x344   : > { %v8022_v60 = vadd.f32 %v8021_v49, %v8020_v20  ;;  %v8023_v40 = vpop.f32.mrb[254].mxu0 }
 0x345   : > { %v8024_v47 = vpop.f32.mrb[255].mxu0 }
 0x346   : > { %v3948_v3 = vadd.f32 %v8022_v60, %v10274_v26  ;;  %v8025_v11 = vadd.f32 %v8024_v47, %v8023_v40  ;;  %v12227_v26 = vld [vmem:[#allocation17_spill] sm:$0xff] }
 0x348   : > { %v3951_v53 = vadd.f32 %v8025_v11, %v10278_v1  ;;  %v10398_v0 = vadd.f32 %v10186_v19, %v3948_v3  ;;  %v12230_v1 = vld [vmem:[#allocation9_spill] sm:$0xff]  ;;  %v12236_v3 = vld [vmem:[#allocation19_spill] sm:$0xff] }
 0x34a   : > { %v8026_v36 = vpop.f32.mrb[0].mxu0  ;;  %v10402_v17 = vadd.f32 %v12227_v26, %v3951_v53  ;;  %v8925_v53 = vld [vmem:[%s12150_s2 + $0x68] sm:$0xff]  }
 0x34b   : > { %v8027_v21 = vpop.f32.mrb[1].mxu0  ;;  %v12237_v26 = vld [vmem:[#allocation11_spill] sm:$0xff]  ;;  %5110 = vmatpush1.bf16.msra.mxu1 %v8925_v53 }
 0x34c   : > { %v8028_v14 = vadd.f32 %v8027_v21, %v8026_v36  ;;  %v8029_v46 = vpop.f32.mrb[2].mxu0  ;;  %5111 = vmatprep.subr.bf16.mxu1 %v9029_v56 }
 0x34d   : > { %v8030_v51 = vpop.f32.mrb[3].mxu0 }
 0x34e   : > { %v3956_v2 = vadd.f32 %v8028_v14, %v12228_v34  ;;  %v8031_v43 = vadd.f32 %v8030_v51, %v8029_v46  ;;  %v12238_v46 = vld [vmem:[#allocation8_spill] sm:$0xff] }
 0x350   : > { %v3959_v12 = vadd.f32 %v8031_v43, %v12229_v9  ;;  %v10407_v37 = vadd.f32 %v12230_v1, %v3956_v2 }
 0x352   : > { %v8032_v19 = vpop.f32.mrb[4].mxu0  ;;  %v10410_v5 = vadd.f32 %v12231_v62, %v3959_v12  ;;  %v12239_v12 = vld [vmem:[#allocation20_spill] sm:$0xff]  ;;  %v12240_v62 = vld [vmem:[#allocation25_spill] sm:$0xff] }
 0x353   : > { %v8033_v25 = vpop.f32.mrb[5].mxu0 }
 0x354   : > { %v8034_v52 = vadd.f32 %v8033_v25, %v8032_v19  ;;  %v8035_v23 = vpop.f32.mrb[6].mxu0 }
 0x355   : > { %v8036_v58 = vpop.f32.mrb[7].mxu0 }
 0x356   : > { %v3964_v57 = vadd.f32 %v8034_v52, %v12232_v10  ;;  %v8037_v27 = vadd.f32 %v8036_v58, %v8035_v23  ;;  %v12241_v52 = vld [vmem:[#allocation12_spill] sm:$0xff]  ;;  %v12242_v10 = vld [vmem:[#allocation13_spill] sm:$0xff] }
 0x358   : > { %v3967_v41 = vadd.f32 %v8037_v27, %v12233_v45  ;;  %v10415_v8 = vadd.f32 %v12234_v6, %v3964_v57 }
 0x35a   : > { %v8038_v50 = vpop.f32.mrb[8].mxu0  ;;  %v10418_v20 = vadd.f32 %v12235_v31, %v3967_v41 }
 0x35b   : > { %v8039_v49 = vpop.f32.mrb[9].mxu0 }
 0x35c   : > { %v8040_v60 = vadd.f32 %v8039_v49, %v8038_v50  ;;  %v8041_v40 = vpop.f32.mrb[10].mxu0 }
 0x35d   : > { %v8042_v47 = vpop.f32.mrb[11].mxu0 }
 0x35e   : > { %v3972_v11 = vadd.f32 %v8040_v60, %v12236_v3  ;;  %v8043_v44 = vadd.f32 %v8042_v47, %v8041_v40 }
 0x360   : > { %v3975_v36 = vadd.f32 %v8043_v44, %v10292_v32  ;;  %v10426_v21 = vadd.f32 %v12237_v26, %v3972_v11  ;;  %v8926_v32 = vld [vmem:[%s12150_s2 + $0x70] sm:$0xff]  }
 0x361   : > { %5112 = vmatpush1.bf16.msra.mxu1 %v8926_v32 }
 0x362   : > { %v8044_v14 = vpop.f32.mrb[12].mxu0  ;;  %v10430_v51 = vadd.f32 %v12238_v46, %v3975_v36  ;;  %5113 = vmatprep.subr.bf16.mxu1 %v9029_v56 }
 0x363   : > { %v8045_v34 = vpop.f32.mrb[13].mxu0 }
 0x364   : > { %v8046_v2 = vadd.f32 %v8045_v34, %v8044_v14  ;;  %v8047_v43 = vpop.f32.mrb[14].mxu0  ;;  %v8927_v34 = vld [vmem:[%s12150_s2 + $0x78] sm:$0xff]  }
 0x365   : > { %v8048_v9 = vpop.f32.mrb[15].mxu0  ;;  %5114 = vmatpush1.bf16.msra.mxu1 %v8927_v34 }
 0x366   : > { %v3980_v1 = vadd.f32 %v8046_v2, %v12239_v12  ;;  %v8049_v19 = vadd.f32 %v8048_v9, %v8047_v43  ;;  %5115 = vmatprep.subr.bf16.mxu1 %v9029_v56 }
 0x368   : > { %v3983_v25 = vadd.f32 %v8049_v19, %v12240_v62  ;;  %v10438_v23 = vadd.f32 %v12241_v52, %v3980_v1 }
 0x36a   : > { %v8160_v58 = vpop.f32.mrb[112].mxu0  ;;  %v10441_v57 = vadd.f32 %v12242_v10, %v3983_v25 }
 0x36b   : > { %v10445_v27 = vadd.f32 %v10309_v22, %v8160_v58  ;;  %v4020_v45 = vpop.f32.mrb[113].mxu0 }
 0x36c   : > { %v10448_v41 = vadd.f32 %v10301_v7, %v4020_v45  ;;  %v8161_v6 = vpop.f32.mrb[114].mxu0  ;;  %v8928_v45 = vld [vmem:[%s12150_s2 + $0x80] sm:$0xff]  }
 0x36d   : > { %v10451_v50 = vadd.f32 %v10312_v15, %v8161_v6  ;;  %v4023_v31 = vpop.f32.mrb[115].mxu0  ;;  %v4293_v40 = vmul.f32 %v10445_v27, %v10445_v27  ;;  %5116 = vmatpush1.bf16.msra.mxu1 %v8928_v45 }
 0x36e   : > { %v4291_v49 = vmul.f32 %v10448_v41, %v10448_v41  ;;  %v10456_v60 = vadd.f32 %v10304_v28, %v4023_v31  ;;  %v4220_v22 = vsel %vm1151_vm0, %v10448_v41, 0.0  ;;  %v4223_v28 = vsel %vm1151_vm0, %v10445_v27, 0.0  ;;  %5117 = vmatprep.subr.bf16.mxu1 %v9029_v56 }
 0x36f   : > { %v4294_v47 = vmul.f32 %v10451_v50, %v10451_v50  ;;  %v4326_v2 = vsel %vm1151_vm0, %v4293_v40, 0.0  ;;  %v4225_v43 = vsel %vm1151_vm0, %v10451_v50, 0.0 }
 0x370   : > { %v4221_v7 = vsel %vm1151_vm0, %v10456_v60, 0.0  ;;  %v4292_v15 = vmul.f32 %v10456_v60, %v10456_v60  ;;  %v4323_v11 = vsel %vm1151_vm0, %v4291_v49, 0.0 }
 0x371   : > { %v4222_v3 = vadd.f32 %v4221_v7, %v4220_v22  ;;  %v4328_v1 = vsel %vm1151_vm0, %v4294_v47, 0.0  ;;  %v8929_v22 = vld [vmem:[%s12150_s2 + $0x88] sm:$0xff]  }
 0x372   : > { %v4324_v44 = vsel %vm1151_vm0, %v4292_v15, 0.0  ;;  %v8164_v53 = vpop.f32.mrb[116].mxu0  ;;  %5118 = vmatpush1.bf16.msra.mxu1 %v8929_v22 }
 0x373   : > { %v4224_v36 = vadd.f32 %v4223_v28, %v4222_v3  ;;  %v4325_v26 = vadd.f32 %v4324_v44, %v4323_v11  ;;  %v10473_v14 = vadd.f32 %v10325_v18, %v8164_v53  ;;  %v4036_v46 = vpop.f32.mrb[117].mxu0  ;;  %5119 = vmatprep.subr.bf16.mxu1 %v9029_v56 }
 0x374   : > { %v10482_v9 = vadd.f32 %v10317_v30, %v4036_v46  ;;  %v8165_v12 = vpop.f32.mrb[118].mxu0 }
 0x375   : > { %v4327_v19 = vadd.f32 %v4326_v2, %v4325_v26  ;;  %v4226_v32 = vadd.f32 %v4225_v43, %v4224_v36  ;;  %v4039_v18 = vpop.f32.mrb[119].mxu0  ;;  %v10490_v52 = vadd.f32 %v10328_v38, %v8165_v12  ;;  %v4297_v38 = vmul.f32 %v10473_v14, %v10473_v14 }
 0x376   : > { %v4227_v62 = vsel %vm1151_vm0, %v10482_v9, 0.0  ;;  %v4295_v25 = vmul.f32 %v10482_v9, %v10482_v9  ;;  %v10493_v58 = vadd.f32 %v10320_v48, %v4039_v18  ;;  %v4231_v7 = vsel %vm1151_vm0, %v10473_v14, 0.0 }
 0x377   : > { %v4228_v30 = vadd.f32 %v4227_v62, %v4226_v32  ;;  %v4329_v10 = vadd.f32 %v4328_v1, %v4327_v19  ;;  %v4298_v47 = vmul.f32 %v10490_v52, %v10490_v52  ;;  %v4233_v53 = vsel %vm1151_vm0, %v10490_v52, 0.0 }
 0x378   : > { %v4330_v6 = vsel %vm1151_vm0, %v4295_v25, 0.0  ;;  %v4229_v31 = vsel %vm1151_vm0, %v10493_v58, 0.0  ;;  %v4296_v48 = vmul.f32 %v10493_v58, %v10493_v58  ;;  %v4334_v34 = vsel %vm1151_vm0, %v4297_v38, 0.0 }
 0x379   : > { %v4331_v49 = vadd.f32 %v4330_v6, %v4329_v10  ;;  %v4230_v40 = vadd.f32 %v4229_v31, %v4228_v30 }
 0x37a   : > { %v8168_v15 = vpop.f32.mrb[120].mxu0  ;;  %v4332_v28 = vsel %vm1151_vm0, %v4296_v48, 0.0 }
 0x37b   : > { %v4232_v3 = vadd.f32 %v4231_v7, %v4230_v40  ;;  %v10516_v11 = vadd.f32 %v10341_v59, %v8168_v15  ;;  %v4052_v44 = vpop.f32.mrb[121].mxu0  ;;  %v4333_v36 = vadd.f32 %v4332_v28, %v4331_v49  ;;  %v8930_v59 = vld [vmem:[%s12150_s2 + $0x90] sm:$0xff]  }
 0x37c   : > { %v10521_v26 = vadd.f32 %v10333_v54, %v4052_v44  ;;  %v8169_v46 = vpop.f32.mrb[122].mxu0  ;;  %5120 = vmatpush1.bf16.msra.mxu1 %v8930_v59 }
 0x37d   : > { %v4234_v2 = vadd.f32 %v4233_v53, %v4232_v3  ;;  %v10525_v43 = vadd.f32 %v10344_v24, %v8169_v46  ;;  %v4055_v12 = vpop.f32.mrb[123].mxu0  ;;  %v4335_v1 = vadd.f32 %v4334_v34, %v4333_v36  ;;  %v4336_v24 = vsel %vm1151_vm0, %v4298_v47, 0.0  ;;  %5121 = vmatprep.subr.bf16.mxu1 %v9029_v56 }
 0x37e   : > { %v4235_v19 = vsel %vm1151_vm0, %v10521_v26, 0.0  ;;  %v4299_v54 = vmul.f32 %v10521_v26, %v10521_v26  ;;  %v10535_v32 = vadd.f32 %v10336_v35, %v4055_v12  ;;  %v4301_v45 = vmul.f32 %v10516_v11, %v10516_v11  ;;  %v8931_v35 = vld [vmem:[%s12150_s2 + $0x98] sm:$0xff]  }
 0x37f   : > { %v4236_v18 = vadd.f32 %v4235_v19, %v4234_v2  ;;  %v4337_v62 = vadd.f32 %v4336_v24, %v4335_v1  ;;  %v4239_v31 = vsel %vm1151_vm0, %v10516_v11, 0.0  ;;  %v4302_v48 = vmul.f32 %v10525_v43, %v10525_v43 }
 0x380   : > { %v4338_v25 = vsel %vm1151_vm0, %v4299_v54, 0.0  ;;  %v4237_v30 = vsel %vm1151_vm0, %v10535_v32, 0.0  ;;  %v4300_v10 = vmul.f32 %v10535_v32, %v10535_v32  ;;  %v4241_v47 = vsel %vm1151_vm0, %v10525_v43, 0.0  ;;  %5122 = vmatpush1.bf16.msra.mxu1 %v8931_v35 }
 0x381   : > { %v4238_v6 = vadd.f32 %v4237_v30, %v4236_v18  ;;  %v4339_v38 = vadd.f32 %v4338_v25, %v4337_v62  ;;  %v4342_v53 = vsel %vm1151_vm0, %v4301_v45, 0.0  ;;  %5123 = vmatprep.subr.bf16.mxu1 %v9029_v56 }
 0x382   : > { %v4340_v49 = vsel %vm1151_vm0, %v4300_v10, 0.0  ;;  %v8172_v40 = vpop.f32.mrb[124].mxu0 }
 0x383   : > { %v4240_v22 = vadd.f32 %v4239_v31, %v4238_v6  ;;  %v10556_v7 = vadd.f32 %v10357_v55, %v8172_v40  ;;  %v4068_v15 = vpop.f32.mrb[125].mxu0  ;;  %v4341_v3 = vadd.f32 %v4340_v49, %v4339_v38  ;;  %v8932_v55 = vld [vmem:[%s12150_s2 + $0xa0] sm:$0xff]  }
 0x384   : > { %v10561_v28 = vadd.f32 %v10349_v39, %v4068_v15  ;;  %v8173_v44 = vpop.f32.mrb[126].mxu0  ;;  %5124 = vmatpush1.bf16.msra.mxu1 %v8932_v55 }
 0x385   : > { %12243 = vst [vmem:[#allocation21_spill] sm:$0xff] %v10556_v7  ;;  %v4242_v36 = vadd.f32 %v4241_v47, %v4240_v22  ;;  %v10565_v46 = vadd.f32 %v10360_v63, %v8173_v44  ;;  %v4071_v34 = vpop.f32.mrb[127].mxu0  ;;  %v4343_v2 = vadd.f32 %v4342_v53, %v4341_v3  ;;  %v4344_v63 = vsel %vm1151_vm0, %v4302_v48, 0.0  ;;  %5125 = vmatprep.subr.bf16.mxu1 %v9029_v56 }
 0x386   : > { %v4243_v12 = vsel %vm1151_vm0, %v10561_v28, 0.0  ;;  %v4303_v39 = vmul.f32 %v10561_v28, %v10561_v28  ;;  %v10575_v59 = vadd.f32 %v10352_v42, %v4071_v34  ;;  %v4305_v62 = vmul.f32 %v10556_v7, %v10556_v7  ;;  %v8933_v42 = vld [vmem:[%s12150_s2 + $0xa8] sm:$0xff]  }
 0x387   : > { %v4244_v1 = vadd.f32 %v4243_v12, %v4242_v36  ;;  %v4345_v19 = vadd.f32 %v4344_v63, %v4343_v2  ;;  %v4247_v30 = vsel %vm1151_vm0, %v10556_v7, 0.0  ;;  %v4306_v35 = vmul.f32 %v10565_v46, %v10565_v46 }
 0x388   : > { %v4346_v54 = vsel %vm1151_vm0, %v4303_v39, 0.0  ;;  %v4245_v24 = vsel %vm1151_vm0, %v10575_v59, 0.0  ;;  %v4304_v18 = vmul.f32 %v10575_v59, %v10575_v59  ;;  %v4249_v40 = vsel %vm1151_vm0, %v10565_v46, 0.0  ;;  %5126 = vmatpush1.bf16.msra.mxu1 %v8933_v42 }
 0x389   : > { %v4246_v25 = vadd.f32 %v4245_v24, %v4244_v1  ;;  %v4347_v10 = vadd.f32 %v4346_v54, %v4345_v19  ;;  %v4350_v47 = vsel %vm1151_vm0, %v4305_v62, 0.0  ;;  %5127 = vmatprep.subr.bf16.mxu1 %v9029_v56 }
 0x38a   : > { %v4348_v45 = vsel %vm1151_vm0, %v4304_v18, 0.0  ;;  %v8176_v6 = vpop.f32.mrb[128].mxu0 }
 0x38b   : > { %v4248_v31 = vadd.f32 %v4247_v30, %v4246_v25  ;;  %v10596_v38 = vadd.f32 %v10373_v29, %v8176_v6  ;;  %v4084_v49 = vpop.f32.mrb[129].mxu0  ;;  %v4349_v48 = vadd.f32 %v4348_v45, %v4347_v10  ;;  %v8934_v29 = vld [vmem:[%s12150_s2 + $0xb0] sm:$0xff]  }
 0x38c   : > { %v10601_v22 = vadd.f32 %v10365_v13, %v4084_v49  ;;  %v8177_v15 = vpop.f32.mrb[130].mxu0  ;;  %5128 = vmatpush1.bf16.msra.mxu1 %v8934_v29 }
 0x38d   : > { %12244 = vst [vmem:[#allocation22_spill] sm:$0xff] %v10596_v38  ;;  %v4250_v3 = vadd.f32 %v4249_v40, %v4248_v31  ;;  %v10605_v44 = vadd.f32 %v10376_v4, %v8177_v15  ;;  %v4087_v53 = vpop.f32.mrb[131].mxu0  ;;  %v4351_v36 = vadd.f32 %v4350_v47, %v4349_v48  ;;  %v4352_v4 = vsel %vm1151_vm0, %v4306_v35, 0.0  ;;  %5129 = vmatprep.subr.bf16.mxu1 %v9029_v56 }
 0x38e   : > { %v4251_v34 = vsel %vm1151_vm0, %v10601_v22, 0.0  ;;  %v4307_v13 = vmul.f32 %v10601_v22, %v10601_v22  ;;  %v10615_v55 = vadd.f32 %v10368_v16, %v4087_v53  ;;  %v4309_v19 = vmul.f32 %v10596_v38, %v10596_v38 }
 0x38f   : > { %v4252_v2 = vadd.f32 %v4251_v34, %v4250_v3  ;;  %v4353_v12 = vadd.f32 %v4352_v4, %v4351_v36  ;;  %v4255_v16 = vsel %vm1151_vm0, %v10596_v38, 0.0  ;;  %v4310_v25 = vmul.f32 %v10605_v44, %v10605_v44 }
 0x390   : > { %v4354_v39 = vsel %vm1151_vm0, %v4307_v13, 0.0  ;;  %v4253_v63 = vsel %vm1151_vm0, %v10615_v55, 0.0  ;;  %v4308_v1 = vmul.f32 %v10615_v55, %v10615_v55  ;;  %v4257_v45 = vsel %vm1151_vm0, %v10605_v44, 0.0 }
 0x391   : > { %v4254_v54 = vadd.f32 %v4253_v63, %v4252_v2  ;;  %v4355_v24 = vadd.f32 %v4354_v39, %v4353_v12  ;;  %v4358_v49 = vsel %vm1151_vm0, %v4309_v19, 0.0 }
 0x392   : > { %v4356_v18 = vsel %vm1151_vm0, %v4308_v1, 0.0  ;;  %v8180_v62 = vpop.f32.mrb[132].mxu0 }
 0x393   : > { %v4256_v42 = vadd.f32 %v4255_v16, %v4254_v54  ;;  %v10633_v30 = vadd.f32 %v10398_v0, %v8180_v62  ;;  %v4100_v10 = vpop.f32.mrb[133].mxu0  ;;  %v4357_v6 = vadd.f32 %v4356_v18, %v4355_v24 }
 0x394   : > { %v10638_v35 = vadd.f32 %v10381_v33, %v4100_v10  ;;  %v8181_v31 = vpop.f32.mrb[134].mxu0  ;;  %v4360_v33 = vsel %vm1151_vm0, %v4310_v25, 0.0 }
 0x395   : > { %v4258_v40 = vadd.f32 %v4257_v45, %v4256_v42  ;;  %v10642_v48 = vadd.f32 %v10402_v17, %v8181_v31  ;;  %v4103_v15 = vpop.f32.mrb[135].mxu0  ;;  %v4359_v47 = vadd.f32 %v4358_v49, %v4357_v6  ;;  %v4313_v4 = vmul.f32 %v10633_v30, %v10633_v30 }
 0x396   : > { %v4259_v0 = vsel %vm1151_vm0, %v10638_v35, 0.0  ;;  %v4311_v3 = vmul.f32 %v10638_v35, %v10638_v35  ;;  %v10649_v53 = vadd.f32 %v10384_v61, %v4103_v15  ;;  %v4263_v61 = vsel %vm1151_vm0, %v10633_v30, 0.0 }
 0x397   : > { %v4260_v29 = vadd.f32 %v4259_v0, %v4258_v40  ;;  %v4361_v36 = vadd.f32 %v4360_v33, %v4359_v47  ;;  %v4314_v1 = vmul.f32 %v10642_v48, %v10642_v48  ;;  %v4265_v24 = vsel %vm1151_vm0, %v10642_v48, 0.0 }
 0x398   : > { %v4362_v34 = vsel %vm1151_vm0, %v4311_v3, 0.0  ;;  %v4261_v17 = vsel %vm1151_vm0, %v10649_v53, 0.0  ;;  %v4312_v13 = vmul.f32 %v10649_v53, %v10649_v53  ;;  %v4366_v42 = vsel %vm1151_vm0, %v4313_v4, 0.0 }
 0x399   : > { %v4262_v2 = vadd.f32 %v4261_v17, %v4260_v29  ;;  %v4363_v12 = vadd.f32 %v4362_v34, %v4361_v36 }
 0x39a   : > { %v4364_v39 = vsel %vm1151_vm0, %v4312_v13, 0.0  ;;  %v8184_v63 = vpop.f32.mrb[136].mxu0 }
 0x39b   : > { %v4264_v19 = vadd.f32 %v4263_v61, %v4262_v2  ;;  %v10665_v54 = vadd.f32 %v10415_v8, %v8184_v63  ;;  %v4116_v16 = vpop.f32.mrb[137].mxu0  ;;  %v4365_v18 = vadd.f32 %v4364_v39, %v4363_v12 }
 0x39c   : > { %v10670_v62 = vadd.f32 %v10407_v37, %v4116_v16  ;;  %v8185_v25 = vpop.f32.mrb[138].mxu0  ;;  %v4368_v37 = vsel %vm1151_vm0, %v4314_v1, 0.0 }
 0x39d   : > { %12245 = vst [vmem:[#allocation23_spill] sm:$0xff] %v10665_v54  ;;  %v4266_v10 = vadd.f32 %v4265_v24, %v4264_v19  ;;  %v10674_v45 = vadd.f32 %v10418_v20, %v8185_v25  ;;  %v4119_v6 = vpop.f32.mrb[139].mxu0  ;;  %v4367_v31 = vadd.f32 %v4366_v42, %v4365_v18  ;;  %v4317_v33 = vmul.f32 %v10665_v54, %v10665_v54 }
 0x39e   : > { %v4267_v8 = vsel %vm1151_vm0, %v10670_v62, 0.0  ;;  %v4315_v49 = vmul.f32 %v10670_v62, %v10670_v62  ;;  %v10681_v40 = vadd.f32 %v10410_v5, %v4119_v6  ;;  %v4271_v5 = vsel %vm1151_vm0, %v10665_v54, 0.0 }
 0x39f   : > { %12246 = vst [vmem:[#allocation24_spill] sm:$0xff] %v10674_v45  ;;  %v4268_v15 = vadd.f32 %v4267_v8, %v4266_v10  ;;  %v4369_v47 = vadd.f32 %v4368_v37, %v4367_v31  ;;  %v4318_v13 = vmul.f32 %v10674_v45, %v10674_v45  ;;  %v4273_v12 = vsel %vm1151_vm0, %v10674_v45, 0.0 }
 0x3a0   : > { %v4370_v0 = vsel %vm1151_vm0, %v4315_v49, 0.0  ;;  %v4269_v20 = vsel %vm1151_vm0, %v10681_v40, 0.0  ;;  %v4316_v3 = vmul.f32 %v10681_v40, %v10681_v40  ;;  %v4374_v19 = vsel %vm1151_vm0, %v4317_v33, 0.0 }
 0x3a1   : > { %v4270_v29 = vadd.f32 %v4269_v20, %v4268_v15  ;;  %v4371_v36 = vadd.f32 %v4370_v0, %v4369_v47 }
 0x3a2   : > { %v4372_v34 = vsel %vm1151_vm0, %v4316_v3, 0.0  ;;  %v8188_v17 = vpop.f32.mrb[140].mxu0 }
 0x3a3   : > { %v4272_v4 = vadd.f32 %v4271_v5, %v4270_v29  ;;  %v10697_v2 = vadd.f32 %v10438_v23, %v8188_v17  ;;  %v4132_v61 = vpop.f32.mrb[141].mxu0  ;;  %v4373_v39 = vadd.f32 %v4372_v34, %v4371_v36 }
 0x3a4   : > { %v10702_v63 = vadd.f32 %v10426_v21, %v4132_v61  ;;  %v8189_v1 = vpop.f32.mrb[142].mxu0  ;;  %v4376_v21 = vsel %vm1151_vm0, %v4318_v13, 0.0 }
 0x3a5   : > { %12247 = vst [vmem:[#allocation17_spill] sm:$0xff] %v10697_v2  ;;  %v4274_v16 = vadd.f32 %v4273_v12, %v4272_v4  ;;  %v10706_v24 = vadd.f32 %v10441_v57, %v8189_v1  ;;  %v4135_v18 = vpop.f32.mrb[143].mxu0  ;;  %v4375_v25 = vadd.f32 %v4374_v19, %v4373_v39  ;;  %v4321_v37 = vmul.f32 %v10697_v2, %v10697_v2 }
 0x3a6   : > { %12248 = vst [vmem:[#allocation14_spill] sm:$0xff] %v10702_v63  ;;  %v4275_v23 = vsel %vm1151_vm0, %v10702_v63, 0.0  ;;  %v4319_v42 = vmul.f32 %v10702_v63, %v10702_v63  ;;  %v10713_v10 = vadd.f32 %v10430_v51, %v4135_v18  ;;  %v4279_v51 = vsel %vm1151_vm0, %v10697_v2, 0.0 }
 0x3a7   : > { %12249 = vst [vmem:[#allocation15_spill] sm:$0xff] %v10706_v24  ;;  %v4276_v6 = vadd.f32 %v4275_v23, %v4274_v16  ;;  %v4377_v31 = vadd.f32 %v4376_v21, %v4375_v25  ;;  %v4322_v20 = vmul.f32 %v10706_v24, %v10706_v24  ;;  %v4281_v33 = vsel %vm1151_vm0, %v10706_v24, 0.0 }
 0x3a8   : > { %12250 = vst [vmem:[#allocation9_spill] sm:$0xff] %v10713_v10  ;;  %v4378_v8 = vsel %vm1151_vm0, %v4319_v42, 0.0  ;;  %v4277_v57 = vsel %vm1151_vm0, %v10713_v10, 0.0  ;;  %v4320_v49 = vmul.f32 %v10713_v10, %v10713_v10  ;;  %v4382_v5 = vsel %vm1151_vm0, %v4321_v37, 0.0 }
 0x3a9   : > { %v4278_v15 = vadd.f32 %v4277_v57, %v4276_v6  ;;  %v4379_v47 = vadd.f32 %v4378_v8, %v4377_v31  ;;  %v4384_v17 = vsel %vm1151_vm0, %v4322_v20, 0.0 }
 0x3aa   : > { %v4380_v0 = vsel %vm1151_vm0, %v4320_v49, 0.0 }
 0x3ab   : > { %v4280_v3 = vadd.f32 %v4279_v51, %v4278_v15  ;;  %v4381_v29 = vadd.f32 %v4380_v0, %v4379_v47  ;;  %v8935_v0 = vld [vmem:[%s12150_s2 + $0xb8] sm:$0xff]  }
 0x3ac   : > { %5130 = vmatpush1.bf16.msra.mxu1 %v8935_v0 }
 0x3ad   : > { %v4282_v36 = vadd.f32 %v4281_v33, %v4280_v3  ;;  %v4383_v34 = vadd.f32 %v4382_v5, %v4381_v29  ;;  %5388 = vmatprep.subr.bf16.mxu1 %v9029_v56 }
 0x3af   : > { %v4283_v13 = vrot.slane %v4282_v36, 4  ;;  %v4385_v4 = vadd.f32 %v4384_v17, %v4383_v34 }
 0x3b1   : > { %v4284_v61 = vadd.f32 %v4283_v13, %v4282_v36  ;;  %v4386_v12 = vrot.slane %v4385_v4, 4 }
 0x3b3   : > { %v4285_v39 = vrot.slane %v4284_v61, 2  ;;  %v4387_v1 = vadd.f32 %v4386_v12, %v4385_v4 }
 0x3b5   : > { %v4286_v19 = vadd.f32 %v4285_v39, %v4284_v61  ;;  %v4388_v16 = vrot.slane %v4387_v1, 2 }
 0x3b7   : > { %v4287_v18 = vrot.slane %v4286_v19, 1  ;;  %v4389_v25 = vadd.f32 %v4388_v16, %v4387_v1 }
 0x3b9   : > { %v4288_v23 = vadd.f32 %v4287_v18, %v4286_v19  ;;  %v4390_v42 = vrot.slane %v4389_v25, 1 }
 0x3bb   : > { %v10732_v21 = vmul.f32 0.00390625, %v4288_v23  ;;  %v4391_v6 = vadd.f32 %v4390_v42, %v4389_v25 }
 0x3bd   : > { %v4393_v31 = vmul.f32 %v10732_v21, %v10732_v21  ;;  %v4392_v8 = vmul.f32 0.00390625, %v4391_v6  ;;  %v4400_v15 = vsub.f32 %v10482_v9, %v10732_v21  ;;  %v4401_v51 = vsub.f32 %v10493_v58, %v10732_v21 }
 0x3be   : > { %v4396_v47 = vsub.f32 %v10448_v41, %v10732_v21  ;;  %v4397_v20 = vsub.f32 %v10456_v60, %v10732_v21  ;;  %v4402_v3 = vsub.f32 %v10473_v14, %v10732_v21  ;;  %v4403_v33 = vsub.f32 %v10490_v52, %v10732_v21 }
 0x3bf   : > { %v4394_v57 = vsub.f32 %v4392_v8, %v4393_v31  ;;  %v4398_v29 = vsub.f32 %v10445_v27, %v10732_v21  ;;  %v4399_v5 = vsub.f32 %v10451_v50, %v10732_v21  ;;  %v4406_v36 = vsub.f32 %v10516_v11, %v10732_v21 }
 0x3c0   : > { %v4407_v34 = vsub.f32 %v10525_v43, %v10732_v21  ;;  %v4404_v17 = vsub.f32 %v10521_v26, %v10732_v21  ;;  %v4405_v13 = vsub.f32 %v10535_v32, %v10732_v21  ;;  %v4410_v4 = vsub.f32 %v10556_v7, %v10732_v21 }
 0x3c1   : > { %v4395_v49 = vmax.f32 %v4394_v57, 0.0  ;;  %v4411_v61 = vsub.f32 %v10565_v46, %v10732_v21  ;;  %v4408_v12 = vsub.f32 %v10561_v28, %v10732_v21  ;;  %v4409_v39 = vsub.f32 %v10575_v59, %v10732_v21 }
 0x3c2   : > { %v4414_v1 = vsub.f32 %v10596_v38, %v10732_v21 }
 0x3c3   : > { %v4428_v37 = vadd.f32 1e-05, %v4395_v49 }
 0x3c5   : > { %8960 = vrsqrt.f32 %v4428_v37 }
 0x3cf   : > { %v10778_v18 = vpop.eup %8960 }
 0x3d0   : > { %v4434_v6 = vmul.f32 %v10778_v18, %v4400_v15  ;;  %v4435_v31 = vmul.f32 %v10778_v18, %v4401_v51  ;;  %v4430_v8 = vmul.f32 %v10778_v18, %v4396_v47  ;;  %v4431_v57 = vmul.f32 %v10778_v18, %v4397_v20 }
 0x3d1   : > { %v4436_v49 = vmul.f32 %v10778_v18, %v4402_v3  ;;  %v4437_v37 = vmul.f32 %v10778_v18, %v4403_v33  ;;  %v4432_v0 = vmul.f32 %v10778_v18, %v4398_v29  ;;  %v4433_v56 = vmul.f32 %v10778_v18, %v4399_v5 }
 0x3d2   : > { %v4466_v23 = vmax.f32 %v4434_v6, 0.0  ;;  %v4467_v25 = vmax.f32 %v4435_v31, 0.0  ;;  %v4462_v16 = vmax.f32 %v4430_v8, 0.0  ;;  %v4463_v42 = vmax.f32 %v4431_v57, 0.0 }
 0x3d3   : > { %v4468_v19 = vmax.f32 %v4436_v49, 0.0  ;;  %v4469_v15 = vmax.f32 %v4437_v37, 0.0  ;;  %v4464_v38 = vmax.f32 %v4432_v0, 0.0  ;;  %v4465_v51 = vmax.f32 %v4433_v56, 0.0 }
 0x3d4   : > { %v10796_v7 = vpack.c.bf16 %v4467_v25, %v4466_v23  ;;  %v10798_v47 = vpack.c.bf16 %v4463_v42, %v4462_v16  ;;  %v4440_v20 = vmul.f32 %v10778_v18, %v4406_v36  ;;  %v4441_v3 = vmul.f32 %v10778_v18, %v4407_v34 }
 0x3d5   : > { %v4438_v33 = vmul.f32 %v10778_v18, %v4404_v17  ;;  %v4439_v29 = vmul.f32 %v10778_v18, %v4405_v13  ;;  %v4417_v5 = vsub.f32 %v10649_v53, %v10732_v21  ;;  %v4422_v6 = vsub.f32 %v10665_v54, %v10732_v21 }
 0x3d6   : > { %4749 = vrot.lane.b32.xlu1 %v10796_v7, %s9030_s23  ;;  %4745 = vrot.lane.b32.xlu0 %v10798_v47, %s9030_s23  ;;  %v12158_v36 = vshll.u32 %v10798_v47, 16  ;;  %v10813_v34 = vpack.c.bf16 %v4469_v15, %v4468_v19  ;;  %v10815_v17 = vpack.c.bf16 %v4465_v51, %v4464_v38  ;;  %v4423_v13 = vsub.f32 %v10674_v45, %v10732_v21 }
 0x3d7   : > { %v12159_v16 = vshrl.u32 %v10798_v47, 16  ;;  %v4472_v25 = vmax.f32 %v4440_v20, 0.0  ;;  %v4473_v56 = vmax.f32 %v4441_v3, 0.0  ;;  %v4470_v23 = vmax.f32 %v4438_v33, 0.0 }
 0x3d8   : > { %v4662_v42 = vrot.slane %v12158_v36, 1  ;;  %v4471_v31 = vmax.f32 %v4439_v29, 0.0  ;;  %v4444_v8 = vmul.f32 %v10778_v18, %v4410_v4  ;;  %v4445_v57 = vmul.f32 %v10778_v18, %v4411_v61 }
 0x3d9   : > { %v4442_v19 = vmul.f32 %v10778_v18, %v4408_v12  ;;  %v4443_v49 = vmul.f32 %v10778_v18, %v4409_v39  ;;  %v4420_v37 = vsub.f32 %v10670_v62, %v10732_v21  ;;  %v4421_v0 = vsub.f32 %v10681_v40, %v10732_v21 }
 0x3da   : > { %v4663_v4 = vor.u32 %v4662_v42, %v12159_v16  ;;  %4751 = vrot.lane.b32.xlu1 %v10813_v34, %s9030_s23  ;;  %4747 = vrot.lane.b32.xlu0 %v10815_v17, %s9030_s23  ;;  %v4448_v61 = vmul.f32 %v10778_v18, %v4414_v1  ;;  %v4426_v12 = vsub.f32 %v10697_v2, %v10732_v21  ;;  %v4476_v39 = vmax.f32 %v4444_v8, 0.0 }
 0x3db   : > { %v4477_v15 = vmax.f32 %v4445_v57, 0.0  ;;  %v4474_v51 = vmax.f32 %v4442_v19, 0.0  ;;  %v4475_v20 = vmax.f32 %v4443_v49, 0.0  ;;  %v10847_v33 = vpack.c.bf16 %v4473_v56, %v4472_v25 }
 0x3dc   : > { %v4713_v3 = vsel %vm10826_vm3, %v4663_v4, 0  ;;  %v10849_v29 = vpack.c.bf16 %v4471_v31, %v4470_v23  ;;  %v12253_v42 = vsub.f32 %v10605_v44, %v10732_v21  ;;  %v12254_v1 = vsub.f32 %v10601_v22, %v10732_v21 }
 0x3dd   : > { %4843 = vst.msk [vmem:[#allocation2 + $0x18] sm:$0xff] %vm1151_vm0, %v4713_v3  ;;  %v12255_v57 = vsub.f32 %v10615_v55, %v10732_v21  ;;  %v4427_v56 = vsub.f32 %v10706_v24, %v10732_v21  ;;  %v4424_v23 = vsub.f32 %v10702_v63, %v10732_v21  ;;  %v12256_v19 = vsub.f32 %v10633_v30, %v10732_v21 }
 0x3de   : > { %v4449_v36 = vmul.f32 %v10778_v18, %v12253_v42  ;;  %v4446_v8 = vmul.f32 %v10778_v18, %v12254_v1  ;;  %4755 = vrot.lane.b32.xlu1 %v10847_v33, %s9030_s23  ;;  %4753 = vrot.lane.b32.xlu0 %v10849_v29, %s9030_s23  ;;  %v12257_v4 = vsub.f32 %v10642_v48, %v10732_v21  ;;  %v4480_v16 = vmax.f32 %v4448_v61, 0.0 }
 0x3df   : > { %v4447_v25 = vmul.f32 %v10778_v18, %v12255_v57  ;;  %v4452_v49 = vmul.f32 %v10778_v18, %v12256_v19  ;;  %v4425_v42 = vsub.f32 %v10713_v10, %v10732_v21  ;;  %v10883_v1 = vpack.c.bf16 %v4477_v15, %v4476_v39 }
 0x3e0   : > { %v4453_v3 = vmul.f32 %v10778_v18, %v12257_v4  ;;  %v10885_v57 = vpack.c.bf16 %v4475_v20, %v4474_v51  ;;  %v12258_v31 = vsub.f32 %v10638_v35, %v10732_v21  ;;  %v4481_v24 = vmax.f32 %v4449_v36, 0.0 }
 0x3e1   : > { %v4478_v19 = vmax.f32 %v4446_v8, 0.0  ;;  %v4479_v63 = vmax.f32 %v4447_v25, 0.0  ;;  %v4451_v54 = vmul.f32 %v10778_v18, %v4417_v5  ;;  %v12167_v4 = vshrl.u32 %v10813_v34, 16 }
 0x3e2   : > { %v4450_v2 = vmul.f32 %v10778_v18, %v12258_v31  ;;  %v12166_v45 = vshrl.u32 %v10815_v17, 16  ;;  %v4484_v10 = vmax.f32 %v4452_v49, 0.0  ;;  %v4485_v39 = vmax.f32 %v4453_v3, 0.0  ;;  %4759 = vrot.lane.b32.xlu1 %v10883_v1, %s9030_s23  ;;  %4757 = vrot.lane.b32.xlu0 %v10885_v57, %s9030_s23 }
 0x3e3   : > { %v4456_v21 = vmul.f32 %v10778_v18, %v4422_v6  ;;  %v4457_v5 = vmul.f32 %v10778_v18, %v4423_v13  ;;  %v4483_v51 = vmax.f32 %v4451_v54, 0.0  ;;  %v4454_v20 = vmul.f32 %v10778_v18, %v4420_v37 }
 0x3e4   : > { %v4482_v36 = vmax.f32 %v4450_v2, 0.0  ;;  %v4455_v8 = vmul.f32 %v10778_v18, %v4421_v0  ;;  %v10905_v31 = vld [vmem:[#allocation2 + $0x18] sm:$0xff]  ;;  %v10907_v49 = vpack.c.bf16 %v4481_v24, %v4480_v16  ;;  %v10909_v3 = vpack.c.bf16 %v4479_v63, %v4478_v19 }
 0x3e5   : > { %12259 = vst [vmem:[#allocation6_spill] sm:$0xff] %v10905_v31  ;;  %v4460_v61 = vmul.f32 %v10778_v18, %v4426_v12  ;;  %7236 = vmatprep.mubr.msk.bf16.mxu1 %vm1151_vm0, %v10905_v31  ;;  %v10915_v54 = vpack.c.bf16 %v4485_v39, %v4484_v10  ;;  %v4461_v2 = vmul.f32 %v10778_v18, %v4427_v56  ;;  %v4488_v63 = vmax.f32 %v4456_v21, 0.0 }
 0x3e6   : > { %v4458_v13 = vmul.f32 %v10778_v18, %v4424_v23  ;;  %4763 = vrot.lane.b32.xlu1 %v10907_v49, %s9030_s23  ;;  %4761 = vrot.lane.b32.xlu0 %v10909_v3, %s9030_s23  ;;  %v4489_v24 = vmax.f32 %v4457_v5, 0.0  ;;  %v4459_v16 = vmul.f32 %v10778_v18, %v4425_v42  ;;  %v12260_v37 = vshrl.u32 %v10796_v7, 16 }
 0x3e7   : > { %v10926_v12 = vpack.c.bf16 %v4483_v51, %v4482_v36  ;;  %v4486_v10 = vmax.f32 %v4454_v20, 0.0  ;;  %v4487_v19 = vmax.f32 %v4455_v8, 0.0  ;;  %v4533_v56 = vshll.u32 %v10796_v7, 16 }
 0x3e8   : > { %v4532_v0 = vrot.slane %v12260_v37, 7  ;;  %v4492_v23 = vmax.f32 %v4460_v61, 0.0  ;;  %v4493_v39 = vmax.f32 %v4461_v2, 0.0  ;;  %v12261_v6 = vshrl.u32 %v10798_v47, 16 }
 0x3e9   : > { %v4539_v21 = vrot.slane %v12167_v4, 7  ;;  %v4490_v5 = vmax.f32 %v4458_v13, 0.0  ;;  %v4666_v18 = vrot.slane %v4533_v56, 1  ;;  %v4540_v42 = vshll.u32 %v10813_v34, 16 }
 0x3ea   : > { %v4518_v25 = vrot.slane %v12261_v6, 7  ;;  %v10933_v15 = vor.u32 %v4533_v56, %v4532_v0  ;;  %4767 = vrot.lane.b32.xlu1 %v10915_v54, %s9030_s23  ;;  %4765 = vrot.lane.b32.xlu0 %v10926_v12, %s9030_s23  ;;  %v4491_v61 = vmax.f32 %v4459_v16, 0.0  ;;  %v12262_v36 = vshll.u32 %v10798_v47, 16 }
 0x3eb   : > { %v4525_v20 = vrot.slane %v12166_v45, 7  ;;  %v4526_v8 = vshll.u32 %v10815_v17, 16  ;;  %v12263_v13 = vmov %v12260_v37  ;;  %v10951_v0 = vor.u32 %v4540_v42, %v4539_v21 }
 0x3ec   : > { %v10942_v51 = vor.u32 %v12262_v36, %v4518_v25  ;;  %v4667_v37 = vor.u32 %v4666_v18, %v12263_v13  ;;  %v10953_v56 = vpack.c.bf16 %v4489_v24, %v4488_v63  ;;  %v10955_v16 = vpack.c.bf16 %v4487_v19, %v4486_v10 }
 0x3ed   : > { %v4668_v47 = vrot.slane %v4540_v42, 1  ;;  %v10957_v25 = vor.u32 %v4526_v8, %v4525_v20  ;;  %v10959_v36 = vpack.c.bf16 %v4493_v39, %v4492_v23  ;;  %v4664_v6 = vrot.slane %v4526_v8, 1 }
 0x3ee   : > { %v4715_v45 = vsel %vm10826_vm3, %v4667_v37, 0  ;;  %v12264_v2 = vshrl.u32 %v10847_v33, 16  ;;  %4771 = vrot.lane.b32.xlu1 %v10953_v56, %s9030_s23  ;;  %4769 = vrot.lane.b32.xlu0 %v10955_v16, %s9030_s23  ;;  %v10969_v7 = vpack.c.bf16 %v4491_v61, %v4490_v5  ;;  %v12265_v63 = vshrl.u32 %v10813_v34, 16 }
 0x3ef   : > { %4847 = vst.msk [vmem:[#allocation2 + $0x38] sm:$0xff] %vm1151_vm0, %v4715_v45  ;;  %v4554_v10 = vshll.u32 %v10847_v33, 16  ;;  %v12266_v19 = vshrl.u32 %v10849_v29, 16  ;;  %v12267_v39 = vshrl.u32 %v10815_v17, 16  ;;  %v4547_v18 = vshll.u32 %v10849_v29, 16 }
 0x3f0   : > { %v4553_v4 = vrot.slane %v12264_v2, 7  ;;  %v4669_v24 = vor.u32 %v4668_v47, %v12265_v63  ;;  %v12268_v42 = vshrl.u32 %v10883_v1, 16  ;;  %v4568_v5 = vshll.u32 %v10883_v1, 16 }
 0x3f1   : > { %v4546_v23 = vrot.slane %v12266_v19, 7  ;;  %v4665_v21 = vor.u32 %v4664_v6, %v12267_v39  ;;  %v4672_v61 = vrot.slane %v4554_v10, 1  ;;  %v12269_v8 = vshrl.u32 %v10885_v57, 16 }
 0x3f2   : > { %v4567_v20 = vrot.slane %v12268_v42, 7  ;;  %v4716_v45 = vsel %vm10826_vm3, %v4669_v24, 0  ;;  %v10985_v34 = vor.u32 %v4554_v10, %v4553_v4  ;;  %v4670_v13 = vrot.slane %v4547_v18, 1  ;;  %4775 = vrot.lane.b32.xlu1 %v10959_v36, %s9030_s23  ;;  %4773 = vrot.lane.b32.xlu0 %v10969_v7, %s9030_s23 }
 0x3f3   : > { %v4560_v2 = vrot.slane %v12269_v8, 7  ;;  %4849 = vst.msk [vmem:[#allocation2 + $0x48] sm:$0xff] %vm1151_vm0, %v4716_v45  ;;  %v4714_v17 = vsel %vm10826_vm3, %v4665_v21, 0  ;;  %v10992_v6 = vor.u32 %v4547_v18, %v4546_v23  ;;  %v4593_v47 = vshrl.u32 %v10915_v54, 16  ;;  %v7199_v23 = vld [vmem:[%s12151_s3] ss:$0 sm:$0xff] }
 0x3f4   : > { %v10994_v37 = vor.u32 %v4568_v5, %v4567_v20  ;;  %4845 = vst.msk [vmem:[#allocation2 + $0x28] sm:$0xff] %vm1151_vm0, %v4714_v17  ;;  %v12270_v4 = vshrl.u32 %v10847_v33, 16  ;;  %v4676_v24 = vrot.slane %v4568_v5, 1  ;;  %v4561_v10 = vshll.u32 %v10885_v57, 16 }
 0x3f5   : > { %v4586_v19 = vshrl.u32 %v10926_v12, 16  ;;  %v12271_v39 = vshrl.u32 %v10849_v29, 16  ;;  %v12272_v18 = vshrl.u32 %v10907_v49, 16  ;;  %v12273_v33 = vshrl.u32 %v10883_v1, 16 }
 0x3f6   : > { %v4673_v63 = vor.u32 %v4672_v61, %v12270_v4  ;;  %v11017_v45 = vor.u32 %v4561_v10, %v4560_v2  ;;  %v4674_v61 = vrot.slane %v4561_v10, 1  ;;  %v4582_v29 = vshll.u32 %v10907_v49, 16  ;;  %4185 = vrot.lane.b32.xlu0 %v7199_v23, %s9030_s23 }
 0x3f7   : > { %v4671_v21 = vor.u32 %v4670_v13, %v12271_v39  ;;  %v4581_v42 = vrot.slane %v12272_v18, 7  ;;  %v4677_v5 = vor.u32 %v4676_v24, %v12273_v33  ;;  %v12274_v17 = vshrl.u32 %v10909_v3, 16 }
 0x3f8   : > { %v4718_v20 = vsel %vm10826_vm3, %v4673_v63, 0  ;;  %v4575_v4 = vshll.u32 %v10909_v3, 16  ;;  %v4607_v63 = vshrl.u32 %v10953_v56, 16  ;;  %v12275_v2 = vshrl.u32 %v10885_v57, 16 }
 0x3f9   : > { %4853 = vst.msk [vmem:[#allocation2 + $0x68] sm:$0xff] %vm1151_vm0, %v4718_v20  ;;  %v4717_v8 = vsel %vm10826_vm3, %v4671_v21, 0  ;;  %v4574_v13 = vrot.slane %v12274_v17, 7  ;;  %v4720_v1 = vsel %vm10826_vm3, %v4677_v5, 0  ;;  %v4595_v10 = vrot.slane %v4593_v47, 7 }
 0x3fa   : > { %4851 = vst.msk [vmem:[#allocation2 + $0x58] sm:$0xff] %vm1151_vm0, %v4717_v8  ;;  %v4675_v24 = vor.u32 %v4674_v61, %v12275_v2  ;;  %4857 = vst.msk [vmem:[#allocation2 + $0x88] sm:$0xff] %vm1151_vm0, %v4720_v1  ;;  %v11034_v39 = vor.u32 %v4582_v29, %v4581_v42  ;;  %v4680_v21 = vrot.slane %v4582_v29, 1  ;;  %v4678_v20 = vrot.slane %v4575_v4, 1 }
 0x3fb   : > { %v11036_v18 = vor.u32 %v4575_v4, %v4574_v13  ;;  %v4596_v33 = vshll.u32 %v10915_v54, 16  ;;  %v4588_v8 = vrot.slane %v4586_v19, 7  ;;  %v4589_v5 = vshll.u32 %v10926_v12, 16 }
 0x3fc   : > { %v4719_v23 = vsel %vm10826_vm3, %v4675_v24, 0  ;;  %v4600_v57 = vshrl.u32 %v10955_v16, 16  ;;  %v4621_v61 = vshrl.u32 %v10959_v36, 16  ;;  %v12276_v42 = vshrl.u32 %v10907_v49, 16 }
 0x3fd   : > { %4855 = vst.msk [vmem:[#allocation2 + $0x78] sm:$0xff] %vm1151_vm0, %v4719_v23  ;;  %v4679_v13 = vor.u32 %v4678_v20, %v12274_v17  ;;  %v11049_v4 = vor.u32 %v4596_v33, %v4595_v10  ;;  %v4684_v1 = vrot.slane %v4596_v33, 1  ;;  %v11051_v2 = vor.u32 %v4589_v5, %v4588_v8 }
 0x3fe   : > { %v4681_v29 = vor.u32 %v4680_v21, %v12276_v42  ;;  %v4682_v54 = vrot.slane %v4589_v5, 1  ;;  %v4609_v31 = vrot.slane %v4607_v63, 7  ;;  %v4610_v23 = vshll.u32 %v10953_v56, 16 }
 0x3ff   : > { %v4721_v24 = vsel %vm10826_vm3, %v4679_v13, 0  ;;  %v4614_v49 = vshrl.u32 %v10969_v7, 16  ;;  %v4685_v3 = vor.u32 %v4684_v1, %v4593_v47  ;;  %v4602_v33 = vrot.slane %v4600_v57, 7 }
 0x400   : > { %v4722_v12 = vsel %vm10826_vm3, %v4681_v29, 0  ;;  %4859 = vst.msk [vmem:[#allocation2 + $0x98] sm:$0xff] %vm1151_vm0, %v4721_v24  ;;  %v4683_v10 = vor.u32 %v4682_v54, %v4586_v19  ;;  %v11061_v21 = vor.u32 %v4610_v23, %v4609_v31  ;;  %v4688_v20 = vrot.slane %v4610_v23, 1 }
 0x401   : > { %4861 = vst.msk [vmem:[#allocation2 + $0xa8] sm:$0xff] %vm1151_vm0, %v4722_v12  ;;  %v4603_v8 = vshll.u32 %v10955_v16, 16  ;;  %v4724_v5 = vsel %vm10826_vm3, %v4685_v3, 0  ;;  %v4623_v42 = vrot.slane %v4621_v61, 7  ;;  %v4624_v29 = vshll.u32 %v10959_v36, 16 }
 0x402   : > { %v4723_v56 = vsel %vm10826_vm3, %v4683_v10, 0  ;;  %4865 = vst.msk [vmem:[#allocation2 + $0xc8] sm:$0xff] %vm1151_vm0, %v4724_v5  ;;  %v4689_v47 = vor.u32 %v4688_v20, %v4607_v63  ;;  %v4616_v13 = vrot.slane %v4614_v49, 7  ;;  %v4617_v1 = vshll.u32 %v10969_v7, 16 }
 0x403   : > { %4863 = vst.msk [vmem:[#allocation2 + $0xb8] sm:$0xff] %vm1151_vm0, %v4723_v56  ;;  %v11071_v31 = vor.u32 %v4603_v8, %v4602_v33  ;;  %v4686_v19 = vrot.slane %v4603_v8, 1  ;;  %v11073_v17 = vor.u32 %v4624_v29, %v4623_v42  ;;  %v4692_v16 = vrot.slane %v4624_v29, 1  ;;  %v11111_v56 = vld [vmem:[#allocation2 + $0x28] sm:$0xff] }
 0x404   : > { %v4726_v54 = vsel %vm10826_vm3, %v4689_v47, 0  ;;  %v11079_v24 = vor.u32 %v4617_v1, %v4616_v13  ;;  %v4690_v23 = vrot.slane %v4617_v1, 1  ;;  %v4646_v38 = vsel %vm11090_vm6, 0, %v10942_v51 }
 0x405   : > { %v4687_v12 = vor.u32 %v4686_v19, %v4600_v57  ;;  %4869 = vst.msk [vmem:[#allocation2 + $0xe8] sm:$0xff] %vm1151_vm0, %v4726_v54  ;;  %v4693_v36 = vor.u32 %v4692_v16, %v4621_v61  ;;  %v8936_v61 = vld [vmem:[%s12150_s2] sm:$0xff]   ;;  %v4649_v51 = vsel %vm11090_vm6, 0, %v10951_v0  ;;  %v4647_v29 = vsel %vm11090_vm6, 0, %v10957_v25  ;;  %v8938_v0 = vld [vmem:[%s12150_s2 + $0x10] sm:$0xff]  }
 0x406   : > { %v4691_v10 = vor.u32 %v4690_v23, %v4614_v49  ;;  %v4648_v49 = vsel %vm11090_vm6, 0, %v10933_v15  ;;  %v8937_v15 = vld [vmem:[%s12150_s2 + $0x8] sm:$0xff]   ;;  %v11124_v19 = vld [vmem:[#allocation2] sm:$0xff]  ;;  %v4651_v25 = vsel %vm11090_vm6, 0, %v10985_v34  ;;  %v4650_v54 = vsel %vm11090_vm6, 0, %v10992_v6  ;;  %v8939_v34 = vld [vmem:[%s12150_s2 + $0x18] sm:$0xff]  }
 0x407   : > { %v4725_v63 = vsel %vm10826_vm3, %v4687_v12, 0  ;;  %v4728_v3 = vsel %vm10826_vm3, %v4693_v36, 0  ;;  %v4653_v6 = vsel %vm11090_vm6, 0, %v10994_v37  ;;  %v4655_v37 = vsel %vm11090_vm6, 0, %v11034_v39  ;;  %v8941_v39 = vld [vmem:[%s12150_s2 + $0x28] sm:$0xff]   ;;  %v8944_v57 = vld [vmem:[%s12150_s2 + $0x40] sm:$0xff]  }
 0x408   : > { %4867 = vst.msk [vmem:[#allocation2 + $0xd8] sm:$0xff] %vm1151_vm0, %v4725_v63  ;;  %4873 = vst.msk [vmem:[#allocation2 + $0x108] sm:$0xff] %vm1151_vm0, %v4728_v3  ;;  %v4727_v7 = vsel %vm10826_vm3, %v4691_v10, 0  ;;  %v11150_v63 = vld [vmem:[#allocation2 + $0x38] sm:$0xff]  ;;  %v4652_v10 = vsel %vm11090_vm6, 0, %v11017_v45  ;;  %v4654_v45 = vsel %vm11090_vm6, 0, %v11036_v18 }
 0x409   : > { %4871 = vst.msk [vmem:[#allocation2 + $0xf8] sm:$0xff] %vm1151_vm0, %v4727_v7  ;;  %v4657_v18 = vsel %vm11090_vm6, 0, %v11049_v4  ;;  %v4659_v4 = vsel %vm11090_vm6, 0, %v11061_v21  ;;  %v8943_v21 = vld [vmem:[%s12150_s2 + $0x38] sm:$0xff]  }
 0x448   : > { %v4750_v20 = vpop.permute.xlu1 %4749  ;;  %v4746_v33 = vpop.permute.xlu0 %4745 }
 0x449   : > { %v11104_v8 = vsel %vm1151_vm0, %v4648_v49, %v4750_v20  ;;  %v11107_v5 = vsel %vm1151_vm0, %v4646_v38, %v4746_v33  ;;  %v8940_v49 = vld [vmem:[%s12150_s2 + $0x20] sm:$0xff]  }
 0x44a   : > { %4846 = vst [vmem:[#allocation2 + $0x30] sm:$0xff] %v11104_v8  ;;  %5140 = vmatmul.mubr.bf16.vlgmr.msra.gmra.mrb[144].mxu1 %v11107_v5 }
 0x44b   : > { %7237 = vmatprep.mubr.msk.bf16.mxu1 %vm1151_vm0, %v11111_v56  ;;  %5389 = vmatpush1.bf16.msra.mxu1 %v8936_v61 }
 0x44c   : > { %v4752_v42 = vpop.permute.xlu1 %4751  ;;  %v4748_v47 = vpop.permute.xlu0 %4747  ;;  %5390 = vmatprep.subr.bf16.mxu1 %v11124_v19 }
 0x44d   : > { %v11128_v16 = vsel %vm1151_vm0, %v4649_v51, %v4752_v42  ;;  %v11131_v13 = vsel %vm1151_vm0, %v4647_v29, %v4748_v47  ;;  %v11187_v42 = vld [vmem:[#allocation2 + $0x48] sm:$0xff]  ;;  %v4656_v47 = vsel %vm11090_vm6, 0, %v11051_v2  ;;  %v4658_v2 = vsel %vm11090_vm6, 0, %v11071_v31 }
 0x44e   : > { %v4661_v31 = vsel %vm11090_vm6, 0, %v11073_v17 }
 0x44f   : > { %5391 = vmatpush1.bf16.msra.mxu1 %v8937_v15 }
 0x450   : > { %v4756_v1 = vpop.permute.xlu1 %4755  ;;  %v4754_v12 = vpop.permute.xlu0 %4753  ;;  %5392 = vmatprep.subr.bf16.mxu1 %v11124_v19 }
 0x451   : > { %v11144_v36 = vsel %vm1151_vm0, %v4651_v25, %v4756_v1  ;;  %v11147_v23 = vsel %vm1151_vm0, %v4650_v54, %v4754_v12  ;;  %v8942_v54 = vld [vmem:[%s12150_s2 + $0x30] sm:$0xff]  }
 0x452   : > { %5148 = vmatmul.mubr.bf16.gmra.mrb[148].mxu1 %v11131_v13 }
 0x453   : > { %7238 = vmatprep.mubr.msk.bf16.mxu1 %vm1151_vm0, %v11150_v63  ;;  %5393 = vmatpush1.bf16.msra.mxu1 %v8938_v0 }
 0x454   : > { %v4760_v3 = vpop.permute.xlu1 %4759  ;;  %v4758_v7 = vpop.permute.xlu0 %4757  ;;  %5394 = vmatprep.subr.bf16.mxu1 %v11124_v19 }
 0x455   : > { %v11165_v61 = vsel %vm1151_vm0, %v4653_v6, %v4760_v3  ;;  %v11168_v20 = vsel %vm1151_vm0, %v4652_v10, %v4758_v7  ;;  %v11224_v10 = vld [vmem:[#allocation2 + $0x58] sm:$0xff] }
 0x457   : > { %5395 = vmatpush1.bf16.msra.mxu1 %v8939_v34 }
 0x458   : > { %v4764_v33 = vpop.permute.xlu1 %4763  ;;  %v4762_v38 = vpop.permute.xlu0 %4761  ;;  %5396 = vmatprep.subr.bf16.mxu1 %v11124_v19 }
 0x459   : > { %v11181_v15 = vsel %vm1151_vm0, %v4655_v37, %v4764_v33  ;;  %v11184_v51 = vsel %vm1151_vm0, %v4654_v45, %v4762_v38 }
 0x45a   : > { %5156 = vmatmul.mubr.bf16.gmra.mrb[152].mxu1 %v11104_v8 }
 0x45b   : > { %7239 = vmatprep.mubr.msk.bf16.mxu1 %vm1151_vm0, %v11187_v42  ;;  %5397 = vmatpush1.bf16.msra.mxu1 %v8940_v49  ;;  %v4660_v49 = vsel %vm11090_vm6, 0, %v11079_v24 }
 0x45c   : > { %v4768_v29 = vpop.permute.xlu1 %4767  ;;  %v4766_v0 = vpop.permute.xlu0 %4765  ;;  %5398 = vmatprep.subr.bf16.mxu1 %v11124_v19 }
 0x45d   : > { %v11202_v25 = vsel %vm1151_vm0, %v4657_v18, %v4768_v29  ;;  %v11205_v1 = vsel %vm1151_vm0, %v4656_v47, %v4766_v0  ;;  %v8945_v18 = vld [vmem:[%s12150_s2 + $0x48] sm:$0xff]   ;;  %v11282_v47 = vld [vmem:[#allocation2 + $0x78] sm:$0xff] }
 0x45e   : > { %v8947_v0 = vld [vmem:[%s12150_s2 + $0x58] sm:$0xff]  }
 0x45f   : > { %5399 = vmatpush1.bf16.msra.mxu1 %v8941_v39  ;;  %v11257_v39 = vld [vmem:[#allocation2 + $0x68] sm:$0xff] }
 0x460   : > { %v4772_v12 = vpop.permute.xlu1 %4771  ;;  %v4770_v34 = vpop.permute.xlu0 %4769  ;;  %5400 = vmatprep.subr.bf16.mxu1 %v11124_v19 }
 0x461   : > { %v11218_v6 = vsel %vm1151_vm0, %v4659_v4, %v4772_v12  ;;  %v11221_v3 = vsel %vm1151_vm0, %v4658_v2, %v4770_v34  ;;  %v12279_v2 = vld [vmem:[#allocation21_spill] sm:$0xff] }
 0x462   : > { %5164 = vmatmul.mubr.bf16.gmra.mrb[156].mxu1 %v11128_v16 }
 0x463   : > { %7240 = vmatprep.mubr.msk.bf16.mxu1 %vm1151_vm0, %v11224_v10  ;;  %5401 = vmatpush1.bf16.msra.mxu1 %v8942_v54 }
 0x464   : > { %v4776_v7 = vpop.permute.xlu1 %4775  ;;  %v4774_v37 = vpop.permute.xlu0 %4773  ;;  %5402 = vmatprep.subr.bf16.mxu1 %v11124_v19 }
 0x465   : > { %v11239_v33 = vsel %vm1151_vm0, %v4661_v31, %v4776_v7  ;;  %v11242_v45 = vsel %vm1151_vm0, %v4660_v49, %v4774_v37  ;;  %v12280_v31 = vld [vmem:[#allocation22_spill] sm:$0xff] }
 0x467   : > { %5403 = vmatpush1.bf16.msra.mxu1 %v8943_v21 }
 0x468   : > { %v11244_v38 = vpop.permute.xlu0 %4185  ;;  %5404 = vmatprep.subr.bf16.mxu1 %v11124_v19 }
 0x469   : > { %v4189_v17 = vadd.f32 %v10456_v60, %v11244_v38  ;;  %v4188_v24 = vadd.f32 %v10448_v41, %v11244_v38  ;;  %v4191_v60 = vadd.f32 %v10451_v50, %v11244_v38  ;;  %v4190_v41 = vadd.f32 %v10445_v27, %v11244_v38  ;;  %v8946_v27 = vld [vmem:[%s12150_s2 + $0x50] sm:$0xff]  }
 0x46a   : > { %5172 = vmatmul.mubr.bf16.gmra.mrb[160].mxu1 %v11147_v23  ;;  %v4193_v29 = vadd.f32 %v10493_v58, %v11244_v38  ;;  %v4192_v50 = vadd.f32 %v10482_v9, %v11244_v38  ;;  %v4195_v9 = vadd.f32 %v10490_v52, %v11244_v38  ;;  %v4194_v58 = vadd.f32 %v10473_v14, %v11244_v38  ;;  %v11304_v14 = vld [vmem:[#allocation2 + $0x88] sm:$0xff] }
 0x46b   : > { %6227 = vrot.lane.b32.xlu0 %v4189_v17, %s9030_s23  ;;  %6225 = vrot.lane.b32.xlu1 %v4188_v24, %s9030_s23  ;;  %v4197_v54 = vadd.f32 %v10535_v32, %v11244_v38  ;;  %v4196_v52 = vadd.f32 %v10521_v26, %v11244_v38  ;;  %v4199_v32 = vadd.f32 %v10525_v43, %v11244_v38  ;;  %v11321_v43 = vld [vmem:[#allocation2 + $0x98] sm:$0xff]  ;;  %v12282_v24 = vld [vmem:[#allocation23_spill] sm:$0xff] }
 0x46c   : > { %7241 = vmatprep.mubr.msk.bf16.mxu1 %vm1151_vm0, %v11257_v39  ;;  %5405 = vmatpush1.bf16.msra.mxu1 %v8944_v57  ;;  %v4198_v26 = vadd.f32 %v10516_v11, %v11244_v38  ;;  %v4201_v4 = vadd.f32 %v10575_v59, %v11244_v38  ;;  %v4200_v12 = vadd.f32 %v10561_v28, %v11244_v38 }
 0x46d   : > { %5406 = vmatprep.subr.bf16.mxu1 %v11124_v19  ;;  %v4203_v11 = vadd.f32 %v10565_v46, %v11244_v38  ;;  %v4202_v59 = vadd.f32 %v12279_v2, %v11244_v38  ;;  %v4205_v28 = vadd.f32 %v10615_v55, %v11244_v38  ;;  %v4204_v34 = vadd.f32 %v10601_v22, %v11244_v38  ;;  %v11338_v46 = vld [vmem:[#allocation2 + $0xa8] sm:$0xff]  ;;  %v8954_v2 = vld [vmem:[%s12150_s2 + $0xf0] sm:$0xff]  }
 0x46e   : > { %v4207_v21 = vadd.f32 %v10605_v44, %v11244_v38  ;;  %v4206_v55 = vadd.f32 %v12280_v31, %v11244_v38  ;;  %v4209_v22 = vadd.f32 %v10649_v53, %v11244_v38  ;;  %v4208_v7 = vadd.f32 %v10638_v35, %v11244_v38  ;;  %v11355_v44 = vld [vmem:[#allocation2 + $0xb8] sm:$0xff]  ;;  %v5552_v31 = vld [vmem:[#allocation2 + $0x30] sm:$0xff] }
 0x46f   : > { %6231 = vrot.lane.b32.xlu0 %v4191_v60, %s9030_s23  ;;  %6229 = vrot.lane.b32.xlu1 %v4190_v41, %s9030_s23  ;;  %v4211_v49 = vadd.f32 %v10642_v48, %v11244_v38  ;;  %v4210_v53 = vadd.f32 %v10633_v30, %v11244_v38  ;;  %v4213_v35 = vadd.f32 %v10681_v40, %v11244_v38  ;;  %v11372_v48 = vld [vmem:[#allocation2 + $0xc8] sm:$0xff]  ;;  %v12281_v30 = vld [vmem:[#allocation24_spill] sm:$0xff]  ;;  %v12284_v60 = vld [vmem:[#allocation14_spill] sm:$0xff] }
 0x470   : > { %5407 = vmatpush1.bf16.msra.mxu1 %v8945_v18  ;;  %v4212_v37 = vadd.f32 %v10670_v62, %v11244_v38  ;;  %v4215_v17 = vadd.f32 %v12281_v30, %v11244_v38  ;;  %v4214_v40 = vadd.f32 %v12282_v24, %v11244_v38  ;;  %v12283_v62 = vld [vmem:[#allocation9_spill] sm:$0xff]  ;;  %v4216_v41 = vadd.f32 %v12284_v60, %v11244_v38 }
 0x471   : > { %5408 = vmatprep.subr.bf16.mxu1 %v11124_v19  ;;  %v4217_v57 = vadd.f32 %v12283_v62, %v11244_v38  ;;  %v11389_v18 = vld [vmem:[#allocation2 + $0xd8] sm:$0xff] }
 0x472   : > { %5180 = vmatmul.mubr.bf16.gmra.mrb[164].mxu1 %v11144_v36 }
 0x473   : > { %6235 = vrot.lane.b32.xlu0 %v4193_v29, %s9030_s23  ;;  %6233 = vrot.lane.b32.xlu1 %v4192_v50, %s9030_s23  ;;  %v12285_v29 = vld [vmem:[#allocation15_spill] sm:$0xff] }
 0x474   : > { %7242 = vmatprep.mubr.msk.bf16.mxu1 %vm1151_vm0, %v11282_v47  ;;  %5409 = vmatpush1.bf16.msra.mxu1 %v8946_v27  ;;  %v4219_v50 = vadd.f32 %v12285_v29, %v11244_v38  ;;  %v12286_v27 = vld [vmem:[#allocation17_spill] sm:$0xff] }
 0x475   : > { %5410 = vmatprep.subr.bf16.mxu1 %v11124_v19 }
 0x477   : > { %6239 = vrot.lane.b32.xlu0 %v4195_v9, %s9030_s23  ;;  %6237 = vrot.lane.b32.xlu1 %v4194_v58, %s9030_s23  ;;  %v4218_v9 = vadd.f32 %v12286_v27, %v11244_v38  ;;  %v11400_v58 = vld [vmem:[#allocation2 + $0xe8] sm:$0xff] }
 0x478   : > { %5411 = vmatpush1.bf16.msra.mxu1 %v8947_v0  ;;  %v11405_v0 = vld [vmem:[#allocation2 + $0xf8] sm:$0xff]  ;;  %v11410_v38 = vld [vmem:[#allocation2 + $0x108] sm:$0xff] }
 0x479   : > { %5727 = vmatprep.subr.bf16.mxu1 %v11124_v19 }
 0x47a   : > { %5188 = vmatmul.mubr.bf16.gmra.mrb[168].mxu1 %v11168_v20 }
 0x47b   : > { %6243 = vrot.lane.b32.xlu0 %v4197_v54, %s9030_s23  ;;  %6241 = vrot.lane.b32.xlu1 %v4196_v52, %s9030_s23  ;;  %v4875_v54 = vld [vmem:[#allocation2 + $0x8] sm:$0xff]  ;;  %v8948_v52 = vld [vmem:[%s12150_s2 + $0xc0] sm:$0xff]  }
 0x47c   : > { %7243 = vmatprep.mubr.msk.bf16.mxu1 %vm1151_vm0, %v11304_v14 }
 0x47f   : > { %6247 = vrot.lane.b32.xlu0 %v4199_v32, %s9030_s23  ;;  %6245 = vrot.lane.b32.xlu1 %v4198_v26, %s9030_s23  ;;  %v12287_v32 = vld [vmem:[#allocation6_spill] sm:$0xff]  ;;  %v8949_v26 = vld [vmem:[%s12150_s2 + $0xc8] sm:$0xff]  }
 0x482   : > { %5196 = vmatmul.mubr.bf16.gmra.mrb[172].mxu1 %v11165_v61 }
 0x483   : > { %6251 = vrot.lane.b32.xlu0 %v4201_v4, %s9030_s23  ;;  %6249 = vrot.lane.b32.xlu1 %v4200_v12, %s9030_s23  ;;  %v8950_v4 = vld [vmem:[%s12150_s2 + $0xd0] sm:$0xff]   ;;  %v8951_v12 = vld [vmem:[%s12150_s2 + $0xd8] sm:$0xff]  }
 0x484   : > { %7244 = vmatprep.mubr.msk.bf16.mxu1 %vm1151_vm0, %v11321_v43 }
 0x487   : > { %6255 = vrot.lane.b32.xlu0 %v4203_v11, %s9030_s23  ;;  %6253 = vrot.lane.b32.xlu1 %v4202_v59, %s9030_s23  ;;  %v8952_v11 = vld [vmem:[%s12150_s2 + $0xe0] sm:$0xff]   ;;  %v8955_v59 = vld [vmem:[%s12150_s2 + $0xf8] sm:$0xff]  }
 0x48a   : > { %5204 = vmatmul.mubr.bf16.gmra.mrb[176].mxu1 %v11184_v51 }
 0x48b   : > { %6259 = vrot.lane.b32.xlu0 %v4205_v28, %s9030_s23  ;;  %6257 = vrot.lane.b32.xlu1 %v4204_v34, %s9030_s23  ;;  %v8956_v28 = vld [vmem:[%s12150_s2 + $0x100] sm:$0xff]   ;;  %v8958_v34 = vld [vmem:[%s12150_s2 + $0x110] sm:$0xff]  }
 0x48c   : > { %7245 = vmatprep.mubr.msk.bf16.mxu1 %vm1151_vm0, %v11338_v46 }
 0x48f   : > { %6263 = vrot.lane.b32.xlu0 %v4207_v21, %s9030_s23  ;;  %6261 = vrot.lane.b32.xlu1 %v4206_v55, %s9030_s23  ;;  %v8959_v21 = vld [vmem:[%s12150_s2 + $0x118] sm:$0xff]  }
 0x492   : > { %5212 = vmatmul.mubr.bf16.gmra.mrb[180].mxu1 %v11181_v15 }
 0x493   : > { %6267 = vrot.lane.b32.xlu0 %v4209_v22, %s9030_s23  ;;  %6265 = vrot.lane.b32.xlu1 %v4208_v7, %s9030_s23 }
 0x494   : > { %7246 = vmatprep.mubr.msk.bf16.mxu1 %vm1151_vm0, %v11355_v44 }
 0x497   : > { %6271 = vrot.lane.b32.xlu0 %v4211_v49, %s9030_s23  ;;  %6269 = vrot.lane.b32.xlu1 %v4210_v53, %s9030_s23 }
 0x49a   : > { %5220 = vmatmul.mubr.bf16.gmra.mrb[184].mxu1 %v11205_v1 }
 0x49b   : > { %6275 = vrot.lane.b32.xlu0 %v4213_v35, %s9030_s23  ;;  %6273 = vrot.lane.b32.xlu1 %v4212_v37, %s9030_s23 }
 0x49c   : > { %7247 = vmatprep.mubr.msk.bf16.mxu1 %vm1151_vm0, %v11372_v48 }
 0x49f   : > { %6279 = vrot.lane.b32.xlu0 %v4215_v17, %s9030_s23  ;;  %6277 = vrot.lane.b32.xlu1 %v4214_v40, %s9030_s23 }
 0x4a2   : > { %5228 = vmatmul.mubr.bf16.gmra.mrb[188].mxu1 %v11202_v25 }
 0x4a3   : > { %6283 = vrot.lane.b32.xlu0 %v4217_v57, %s9030_s23  ;;  %6281 = vrot.lane.b32.xlu1 %v4216_v41, %s9030_s23 }
 0x4a4   : > { %7248 = vmatprep.mubr.msk.bf16.mxu1 %vm1151_vm0, %v11389_v18 }
 0x4a7   : > { %6287 = vrot.lane.b32.xlu0 %v4219_v50, %s9030_s23  ;;  %6285 = vrot.lane.b32.xlu1 %v4218_v9, %s9030_s23  ;;  %s8969_s23 = sshll.u32 %s9031_s14, 4  ;;  %s8970_s23 = int_to_ptr.vmem [resolvable:$false] %s8969_s23 }
 0x4a8   : > { %s8971_s10 = scalar_lea.vmem %s8970_s23, 8192  ;;  %p8972_p0 = scmp.lt.s32.totalorder %s12077_s5, %s8970_s23 }
 0x4a9   : > { %p8973_p1 = scmp.lt.s32.totalorder %s8971_s10, %s8965_s9 }
 0x4aa   : > { %5236 = vmatmul.mubr.bf16.gmra.mrb[192].mxu1 %v11221_v3 }
 0x4ab   : > { %7249 = vmatprep.mubr.msk.bf16.mxu1 %vm1151_vm0, %v11400_v58  ;;  %p8974_p2 = por %p8973_p1, %p8972_p0 }
 0x4ad   : > { %p8975_p3 = pnand %p8974_p2, %p8968_p13 }
 0x4b2   : > { %5244 = vmatmul.mubr.bf16.gmra.mrb[196].mxu1 %v11218_v6 }
 0x4b3   : > { %7250 = vmatprep.mubr.msk.bf16.mxu1 %vm1151_vm0, %v11405_v0 }
 0x4ba   : > { %5252 = vmatmul.mubr.bf16.gmra.mrb[200].mxu1 %v11242_v45 }
 0x4bb   : > { %7251 = vmatprep.mubr.msk.bf16.mxu1 %vm1151_vm0, %v11410_v38 }
 0x4c2   : > { %5260 = vmatmul.mubr.bf16.gmra.mrb[204].mxu1 %v11239_v33 }
 0x4c3   : > { %7264 = vmatprep.mubr.msk.bf16.mxu1 %vm1151_vm0, %v4875_v54 }
 0x4ca   : > { %5421 = vmatmul.mubr.bf16.vlgmr.msra.gmra.mrb[144].mxu1 %v11124_v19 }
 0x4cb   : > { %7265 = vmatprep.mubr.msk.bf16.mxu1 %vm1151_vm0, %v12287_v32  ;;  %5728 = vmatpush1.bf16.msra.mxu1 %v8948_v52 }
 0x4cc   : > { %5729 = vmatprep.subr.bf16.mxu1 %v11124_v19 }
 0x4cf   : > { %5730 = vmatpush1.bf16.msra.mxu1 %v8949_v26 }
 0x4d0   : > { %5731 = vmatprep.subr.bf16.mxu1 %v11124_v19 }
 0x4d2   : > { %5429 = vmatmul.mubr.bf16.gmra.mrb[148].mxu1 %v11107_v5  ;;  %v8953_v5 = vld [vmem:[%s12150_s2 + $0xe8] sm:$0xff]  }
 0x4d3   : > { %7266 = vmatprep.mubr.msk.bf16.mxu1 %vm1151_vm0, %v11111_v56  ;;  %5732 = vmatpush1.bf16.msra.mxu1 %v8950_v4 }
 0x4d4   : > { %5733 = vmatprep.subr.bf16.mxu1 %v11124_v19 }
 0x4d7   : > { %5734 = vmatpush1.bf16.msra.mxu1 %v8951_v12 }
 0x4d8   : > { %5735 = vmatprep.subr.bf16.mxu1 %v11124_v19 }
 0x4da   : > { %5437 = vmatmul.mubr.bf16.gmra.mrb[152].mxu1 %v11131_v13 }
 0x4db   : > { %7267 = vmatprep.mubr.msk.bf16.mxu1 %vm1151_vm0, %v11150_v63  ;;  %5736 = vmatpush1.bf16.msra.mxu1 %v8952_v11 }
 0x4dc   : > { %5737 = vmatprep.subr.bf16.mxu1 %v11124_v19 }
 0x4df   : > { %5738 = vmatpush1.bf16.msra.mxu1 %v8953_v5 }
 0x4e0   : > { %5739 = vmatprep.subr.bf16.mxu1 %v11124_v19 }
 0x4e2   : > { %5445 = vmatmul.mubr.bf16.gmra.mrb[156].mxu1 %v11104_v8  ;;  %v8957_v8 = vld [vmem:[%s12150_s2 + $0x108] sm:$0xff]  }
 0x4e3   : > { %7268 = vmatprep.mubr.msk.bf16.mxu1 %vm1151_vm0, %v11187_v42  ;;  %5740 = vmatpush1.bf16.msra.mxu1 %v8954_v2 }
 0x4e4   : > { %5741 = vmatprep.subr.bf16.mxu1 %v11124_v19 }
 0x4e7   : > { %5742 = vmatpush1.bf16.msra.mxu1 %v8955_v59 }
 0x4e8   : > { %5743 = vmatprep.subr.bf16.mxu1 %v11124_v19 }
 0x4ea   : > { %5453 = vmatmul.mubr.bf16.gmra.mrb[160].mxu1 %v11128_v16 }
 0x4eb   : > { %7269 = vmatprep.mubr.msk.bf16.mxu1 %vm1151_vm0, %v11224_v10  ;;  %5744 = vmatpush1.bf16.msra.mxu1 %v8956_v28 }
 0x4ec   : > { %5745 = vmatprep.subr.bf16.mxu1 %v11124_v19 }
 0x4ef   : > { %5746 = vmatpush1.bf16.msra.mxu1 %v8957_v8 }
 0x4f0   : > { %5747 = vmatprep.subr.bf16.mxu1 %v11124_v19 }
 0x4f2   : > { %5461 = vmatmul.mubr.bf16.gmra.mrb[164].mxu1 %v11147_v23 }
 0x4f3   : > { %7270 = vmatprep.mubr.msk.bf16.mxu1 %vm1151_vm0, %v11257_v39  ;;  %5748 = vmatpush1.bf16.msra.mxu1 %v8958_v34 }
 0x4f4   : > { %5749 = vmatprep.subr.bf16.mxu1 %v11124_v19 }
 0x4f7   : > { %5750 = vmatpush1.bf16.msra.mxu1 %v8959_v21 }
 0x4fa   : > { %5469 = vmatmul.mubr.bf16.gmra.mrb[168].mxu1 %v11144_v36 }
 0x4fb   : > { %7271 = vmatprep.mubr.msk.bf16.mxu1 %vm1151_vm0, %v11282_v47 }
 0x502   : > { %5477 = vmatmul.mubr.bf16.gmra.mrb[172].mxu1 %v11168_v20 }
 0x503   : > { %7272 = vmatprep.mubr.msk.bf16.mxu1 %vm1151_vm0, %v11304_v14 }
 0x50a   : > { %5485 = vmatmul.mubr.bf16.gmra.mrb[176].mxu1 %v11165_v61 }
 0x50b   : > { %7273 = vmatprep.mubr.msk.bf16.mxu1 %vm1151_vm0, %v11321_v43 }
 0x512   : > { %5493 = vmatmul.mubr.bf16.gmra.mrb[180].mxu1 %v11184_v51 }
 0x513   : > { %7274 = vmatprep.mubr.msk.bf16.mxu1 %vm1151_vm0, %v11338_v46 }
 0x51a   : > { %5501 = vmatmul.mubr.bf16.gmra.mrb[184].mxu1 %v11181_v15 }
 0x51b   : > { %7275 = vmatprep.mubr.msk.bf16.mxu1 %vm1151_vm0, %v11355_v44 }
 0x522   : > { %5509 = vmatmul.mubr.bf16.gmra.mrb[188].mxu1 %v11205_v1 }
 0x523   : > { %7276 = vmatprep.mubr.msk.bf16.mxu1 %vm1151_vm0, %v11372_v48 }
 0x52a   : > { %5517 = vmatmul.mubr.bf16.gmra.mrb[192].mxu1 %v11202_v25 }
 0x52b   : > { %7277 = vmatprep.mubr.msk.bf16.mxu1 %vm1151_vm0, %v11389_v18 }
 0x532   : > { %5525 = vmatmul.mubr.bf16.gmra.mrb[196].mxu1 %v11221_v3 }
 0x533   : > { %7278 = vmatprep.mubr.msk.bf16.mxu1 %vm1151_vm0, %v11400_v58 }
 0x53a   : > { %5533 = vmatmul.mubr.bf16.gmra.mrb[200].mxu1 %v11218_v6 }
 0x53b   : > { %7279 = vmatprep.mubr.msk.bf16.mxu1 %vm1151_vm0, %v11405_v0 }
 0x542   : > { %5541 = vmatmul.mubr.bf16.gmra.mrb[204].mxu1 %v11242_v45 }
 0x543   : > { %7316 = vmatprep.mubr.msk.bf16.mxu1 %vm1151_vm0, %v11111_v56  ;;  %v5581_v56 = vld [vmem:[#allocation2 + $0x118] sm:$0xff] }
 0x54a   : > { %5760 = vmatmul.mubr.bf16.vlgmr.msra.gmra.mrb[144].mxu1 %v11131_v13 }
 0x54b   : > { %7317 = vmatprep.mubr.msk.bf16.mxu1 %vm1151_vm0, %v11150_v63 }
 0x552   : > { %5768 = vmatmul.mubr.bf16.gmra.mrb[148].mxu1 %v5552_v31 }
 0x553   : > { %7318 = vmatprep.mubr.msk.bf16.mxu1 %vm1151_vm0, %v11187_v42 }
 0x55a   : > { %5776 = vmatmul.mubr.bf16.gmra.mrb[152].mxu1 %v11128_v16 }
 0x55b   : > { %7319 = vmatprep.mubr.msk.bf16.mxu1 %vm1151_vm0, %v11224_v10 }
 0x562   : > { %5784 = vmatmul.mubr.bf16.gmra.mrb[156].mxu1 %v11147_v23 }
 0x563   : > { %7320 = vmatprep.mubr.msk.bf16.mxu1 %vm1151_vm0, %v11257_v39 }
 0x56a   : > { %5792 = vmatmul.mubr.bf16.gmra.mrb[160].mxu1 %v11144_v36 }
 0x56b   : > { %7321 = vmatprep.mubr.msk.bf16.mxu1 %vm1151_vm0, %v11282_v47 }
 0x572   : > { %5800 = vmatmul.mubr.bf16.gmra.mrb[164].mxu1 %v11168_v20 }
 0x573   : > { %7322 = vmatprep.mubr.msk.bf16.mxu1 %vm1151_vm0, %v11304_v14 }
 0x57a   : > { %5808 = vmatmul.mubr.bf16.gmra.mrb[168].mxu1 %v11165_v61 }
 0x57b   : > { %7323 = vmatprep.mubr.msk.bf16.mxu1 %vm1151_vm0, %v11321_v43 }
 0x582   : > { %5816 = vmatmul.mubr.bf16.gmra.mrb[172].mxu1 %v11184_v51 }
 0x583   : > { %7324 = vmatprep.mubr.msk.bf16.mxu1 %vm1151_vm0, %v11338_v46 }
 0x58a   : > { %5824 = vmatmul.mubr.bf16.gmra.mrb[176].mxu1 %v11181_v15 }
 0x58b   : > { %7325 = vmatprep.mubr.msk.bf16.mxu1 %vm1151_vm0, %v11355_v44 }
 0x592   : > { %5832 = vmatmul.mubr.bf16.gmra.mrb[180].mxu1 %v11205_v1 }
 0x593   : > { %7326 = vmatprep.mubr.msk.bf16.mxu1 %vm1151_vm0, %v11372_v48 }
 0x59a   : > { %5840 = vmatmul.mubr.bf16.gmra.mrb[184].mxu1 %v11202_v25 }
 0x59b   : > { %7327 = vmatprep.mubr.msk.bf16.mxu1 %vm1151_vm0, %v11389_v18 }
 0x5a2   : > { %5848 = vmatmul.mubr.bf16.gmra.mrb[188].mxu1 %v11221_v3 }
 0x5a3   : > { %7328 = vmatprep.mubr.msk.bf16.mxu1 %vm1151_vm0, %v11400_v58 }
 0x5aa   : > { %5856 = vmatmul.mubr.bf16.gmra.mrb[192].mxu1 %v11218_v6 }
 0x5ab   : > { %7329 = vmatprep.mubr.msk.bf16.mxu1 %vm1151_vm0, %v11405_v0 }
 0x5b2   : > { %5864 = vmatmul.mubr.bf16.gmra.mrb[196].mxu1 %v11242_v45 }
 0x5b3   : > { %7330 = vmatprep.mubr.msk.bf16.mxu1 %vm1151_vm0, %v11410_v38 }
 0x5ba   : > { %5872 = vmatmul.mubr.bf16.gmra.mrb[200].mxu1 %v11239_v33 }
 0x5bb   : > { %7331 = vmatprep.mubr.msk.bf16.mxu1 %vm1151_vm0, %v5581_v56 }
 0x5c2   : > { %5880 = vmatmul.mubr.bf16.gmra.mrb[204].mxu1 %v11124_v19 }
 0x61d   : > { %v11555_v16 = vpop.f32.mrb[144].mxu1 }
 0x61e   : > { %v5990_v13 = vmul.f32 %v11555_v16, %v11555_v16  ;;  %v5763_v36 = vpop.f32.mrb[145].mxu1  ;;  %v5920_v63 = vsel %vm1151_vm0, %v11555_v16, 0.0 }
 0x61f   : > { %v11559_v23 = vpop.f32.mrb[146].mxu1 }
 0x620   : > { %v5921_v61 = vsel %vm1151_vm0, %v11559_v23, 0.0  ;;  %v5991_v20 = vmul.f32 %v11559_v23, %v11559_v23  ;;  %v5766_v15 = vpop.f32.mrb[147].mxu1  ;;  %v6022_v19 = vsel %vm1151_vm0, %v5990_v13, 0.0 }
 0x621   : > { %v5922_v51 = vadd.f32 %v5921_v61, %v5920_v63 }
 0x622   : > { %v6023_v42 = vsel %vm1151_vm0, %v5991_v20, 0.0 }
 0x623   : > { %v6024_v25 = vadd.f32 %v6023_v42, %v6022_v19 }
 0x625   : > { %v11569_v1 = vpop.f32.mrb[148].mxu1 }
 0x626   : > { %v5923_v6 = vsel %vm1151_vm0, %v11569_v1, 0.0  ;;  %v5992_v3 = vmul.f32 %v11569_v1, %v11569_v1  ;;  %v5771_v10 = vpop.f32.mrb[149].mxu1 }
 0x627   : > { %v5924_v33 = vadd.f32 %v5923_v6, %v5922_v51  ;;  %v11575_v45 = vpop.f32.mrb[150].mxu1 }
 0x628   : > { %v6025_v39 = vsel %vm1151_vm0, %v5992_v3, 0.0  ;;  %v5925_v47 = vsel %vm1151_vm0, %v11575_v45, 0.0  ;;  %v5993_v14 = vmul.f32 %v11575_v45, %v11575_v45  ;;  %v5774_v43 = vpop.f32.mrb[151].mxu1 }
 0x629   : > { %v6026_v46 = vadd.f32 %v6025_v39, %v6024_v25  ;;  %v5926_v55 = vadd.f32 %v5925_v47, %v5924_v33 }
 0x62a   : > { %v6027_v22 = vsel %vm1151_vm0, %v5993_v14, 0.0 }
 0x62b   : > { %v6028_v7 = vadd.f32 %v6027_v22, %v6026_v46 }
 0x62d   : > { %v11583_v44 = vpop.f32.mrb[152].mxu1 }
 0x62e   : > { %v5927_v49 = vsel %vm1151_vm0, %v11583_v44, 0.0  ;;  %v5994_v53 = vmul.f32 %v11583_v44, %v11583_v44  ;;  %v5779_v35 = vpop.f32.mrb[153].mxu1 }
 0x62f   : > { %v5928_v37 = vadd.f32 %v5927_v49, %v5926_v55  ;;  %v11589_v48 = vpop.f32.mrb[154].mxu1 }
 0x630   : > { %v6029_v30 = vsel %vm1151_vm0, %v5994_v53, 0.0  ;;  %v5929_v17 = vsel %vm1151_vm0, %v11589_v48, 0.0  ;;  %v5995_v24 = vmul.f32 %v11589_v48, %v11589_v48  ;;  %v5782_v40 = vpop.f32.mrb[155].mxu1 }
 0x631   : > { %v6030_v62 = vadd.f32 %v6029_v30, %v6028_v7  ;;  %v5930_v57 = vadd.f32 %v5929_v17, %v5928_v37 }
 0x632   : > { %v6031_v60 = vsel %vm1151_vm0, %v5995_v24, 0.0 }
 0x633   : > { %v6032_v41 = vadd.f32 %v6031_v60, %v6030_v62 }
 0x635   : > { %v11597_v18 = vpop.f32.mrb[156].mxu1 }
 0x636   : > { %v5931_v29 = vsel %vm1151_vm0, %v11597_v18, 0.0  ;;  %v5996_v50 = vmul.f32 %v11597_v18, %v11597_v18  ;;  %v5787_v27 = vpop.f32.mrb[157].mxu1 }
 0x637   : > { %v5932_v9 = vadd.f32 %v5931_v29, %v5930_v57  ;;  %v11603_v58 = vpop.f32.mrb[158].mxu1 }
 0x638   : > { %v6033_v0 = vsel %vm1151_vm0, %v5996_v50, 0.0  ;;  %v5933_v38 = vsel %vm1151_vm0, %v11603_v58, 0.0  ;;  %v5997_v54 = vmul.f32 %v11603_v58, %v11603_v58  ;;  %v5790_v52 = vpop.f32.mrb[159].mxu1 }
 0x639   : > { %v6034_v32 = vadd.f32 %v6033_v0, %v6032_v41  ;;  %v5934_v26 = vadd.f32 %v5933_v38, %v5932_v9 }
 0x63a   : > { %v6035_v4 = vsel %vm1151_vm0, %v5997_v54, 0.0 }
 0x63b   : > { %v6036_v12 = vadd.f32 %v6035_v4, %v6034_v32 }
 0x63d   : > { %v11611_v11 = vpop.f32.mrb[160].mxu1 }
 0x63e   : > { %v5935_v5 = vsel %vm1151_vm0, %v11611_v11, 0.0  ;;  %v5998_v2 = vmul.f32 %v11611_v11, %v11611_v11  ;;  %v5795_v59 = vpop.f32.mrb[161].mxu1 }
 0x63f   : > { %v5936_v28 = vadd.f32 %v5935_v5, %v5934_v26  ;;  %v11617_v8 = vpop.f32.mrb[162].mxu1 }
 0x640   : > { %v6037_v34 = vsel %vm1151_vm0, %v5998_v2, 0.0  ;;  %v5937_v21 = vsel %vm1151_vm0, %v11617_v8, 0.0  ;;  %v5999_v31 = vmul.f32 %v11617_v8, %v11617_v8  ;;  %v5798_v56 = vpop.f32.mrb[163].mxu1 }
 0x641   : > { %v6038_v13 = vadd.f32 %v6037_v34, %v6036_v12  ;;  %v5938_v36 = vadd.f32 %v5937_v21, %v5936_v28 }
 0x642   : > { %v6039_v63 = vsel %vm1151_vm0, %v5999_v31, 0.0 }
 0x643   : > { %v6040_v61 = vadd.f32 %v6039_v63, %v6038_v13 }
 0x645   : > { %v11625_v20 = vpop.f32.mrb[164].mxu1 }
 0x646   : > { %v5939_v15 = vsel %vm1151_vm0, %v11625_v20, 0.0  ;;  %v6000_v51 = vmul.f32 %v11625_v20, %v11625_v20  ;;  %v5803_v19 = vpop.f32.mrb[165].mxu1 }
 0x647   : > { %v5940_v42 = vadd.f32 %v5939_v15, %v5938_v36  ;;  %v11631_v25 = vpop.f32.mrb[166].mxu1  ;;  %v11681_v19 = vpop.permute.xlu0 %6227 }
 0x648   : > { %v6041_v6 = vsel %vm1151_vm0, %v6000_v51, 0.0  ;;  %v5941_v3 = vsel %vm1151_vm0, %v11631_v25, 0.0  ;;  %v6001_v10 = vmul.f32 %v11631_v25, %v11631_v25  ;;  %v5806_v33 = vpop.f32.mrb[167].mxu1 }
 0x649   : > { %v6042_v39 = vadd.f32 %v6041_v6, %v6040_v61  ;;  %v5942_v47 = vadd.f32 %v5941_v3, %v5940_v42 }
 0x64a   : > { %v6043_v14 = vsel %vm1151_vm0, %v6001_v10, 0.0 }
 0x64b   : > { %v6044_v43 = vadd.f32 %v6043_v14, %v6042_v39 }
 0x64d   : > { %v11639_v46 = vpop.f32.mrb[168].mxu1 }
 0x64e   : > { %v5943_v55 = vsel %vm1151_vm0, %v11639_v46, 0.0  ;;  %v6002_v22 = vmul.f32 %v11639_v46, %v11639_v46  ;;  %v5811_v7 = vpop.f32.mrb[169].mxu1 }
 0x64f   : > { %v5944_v49 = vadd.f32 %v5943_v55, %v5942_v47  ;;  %v11645_v53 = vpop.f32.mrb[170].mxu1 }
 0x650   : > { %v6045_v35 = vsel %vm1151_vm0, %v6002_v22, 0.0  ;;  %v5945_v37 = vsel %vm1151_vm0, %v11645_v53, 0.0  ;;  %v6003_v30 = vmul.f32 %v11645_v53, %v11645_v53  ;;  %v5814_v17 = vpop.f32.mrb[171].mxu1 }
 0x651   : > { %v6046_v24 = vadd.f32 %v6045_v35, %v6044_v43  ;;  %v5946_v40 = vadd.f32 %v5945_v37, %v5944_v49  ;;  %v11697_v35 = vpop.permute.xlu0 %6231 }
 0x652   : > { %v6047_v62 = vsel %vm1151_vm0, %v6003_v30, 0.0 }
 0x653   : > { %v6048_v57 = vadd.f32 %v6047_v62, %v6046_v24 }
 0x655   : > { %v11653_v60 = vpop.f32.mrb[172].mxu1 }
 0x656   : > { %v5947_v41 = vsel %vm1151_vm0, %v11653_v60, 0.0  ;;  %v6004_v29 = vmul.f32 %v11653_v60, %v11653_v60  ;;  %v5819_v50 = vpop.f32.mrb[173].mxu1 }
 0x657   : > { %v5948_v27 = vadd.f32 %v5947_v41, %v5946_v40  ;;  %v11659_v9 = vpop.f32.mrb[174].mxu1 }
 0x658   : > { %v6049_v0 = vsel %vm1151_vm0, %v6004_v29, 0.0  ;;  %v5949_v38 = vsel %vm1151_vm0, %v11659_v9, 0.0  ;;  %v6005_v54 = vmul.f32 %v11659_v9, %v11659_v9  ;;  %v5822_v52 = vpop.f32.mrb[175].mxu1 }
 0x659   : > { %v6050_v32 = vadd.f32 %v6049_v0, %v6048_v57  ;;  %v5950_v26 = vadd.f32 %v5949_v38, %v5948_v27  ;;  %v11712_v0 = vpop.permute.xlu0 %6235 }
 0x65a   : > { %v6051_v4 = vsel %vm1151_vm0, %v6005_v54, 0.0 }
 0x65b   : > { %v6052_v12 = vadd.f32 %v6051_v4, %v6050_v32 }
 0x65d   : > { %v11667_v5 = vpop.f32.mrb[176].mxu1 }
 0x65e   : > { %v5951_v2 = vsel %vm1151_vm0, %v11667_v5, 0.0  ;;  %v6006_v59 = vmul.f32 %v11667_v5, %v11667_v5  ;;  %v5827_v28 = vpop.f32.mrb[177].mxu1 }
 0x65f   : > { %v5952_v34 = vadd.f32 %v5951_v2, %v5950_v26  ;;  %v11673_v21 = vpop.f32.mrb[178].mxu1 }
 0x660   : > { %v6053_v31 = vsel %vm1151_vm0, %v6006_v59, 0.0  ;;  %v5953_v56 = vsel %vm1151_vm0, %v11673_v21, 0.0  ;;  %v6007_v13 = vmul.f32 %v11673_v21, %v11673_v21  ;;  %v5830_v36 = vpop.f32.mrb[179].mxu1  ;;  %v11721_v59 = vpop.permute.xlu0 %6239 }
 0x661   : > { %v6054_v63 = vadd.f32 %v6053_v31, %v6052_v12  ;;  %v5954_v61 = vadd.f32 %v5953_v56, %v5952_v34  ;;  %v11725_v31 = vpop.permute.xlu1 %6225 }
 0x662   : > { %v6055_v15 = vsel %vm1151_vm0, %v6007_v13, 0.0 }
 0x663   : > { %v6056_v51 = vadd.f32 %v6055_v15, %v6054_v63 }
 0x665   : > { %v11683_v42 = vpop.f32.mrb[180].mxu1 }
 0x666   : > { %v5955_v6 = vsel %vm1151_vm0, %v11683_v42, 0.0  ;;  %v6008_v3 = vmul.f32 %v11683_v42, %v11683_v42  ;;  %v5835_v10 = vpop.f32.mrb[181].mxu1 }
 0x667   : > { %v5956_v33 = vadd.f32 %v5955_v6, %v5954_v61  ;;  %v11689_v39 = vpop.f32.mrb[182].mxu1 }
 0x668   : > { %v6057_v47 = vsel %vm1151_vm0, %v6008_v3, 0.0  ;;  %v5957_v14 = vsel %vm1151_vm0, %v11689_v39, 0.0  ;;  %v6009_v43 = vmul.f32 %v11689_v39, %v11689_v39  ;;  %v5838_v55 = vpop.f32.mrb[183].mxu1  ;;  %v11733_v3 = vpop.permute.xlu0 %6243 }
 0x669   : > { %v6058_v22 = vadd.f32 %v6057_v47, %v6056_v51  ;;  %v5958_v7 = vadd.f32 %v5957_v14, %v5956_v33  ;;  %v11737_v33 = vpop.permute.xlu1 %6229 }
 0x66a   : > { %v6059_v49 = vsel %vm1151_vm0, %v6009_v43, 0.0 }
 0x66b   : > { %v6060_v37 = vadd.f32 %v6059_v49, %v6058_v22 }
 0x66d   : > { %v11699_v30 = vpop.f32.mrb[184].mxu1 }
 0x66e   : > { %v5959_v17 = vsel %vm1151_vm0, %v11699_v30, 0.0  ;;  %v6010_v24 = vmul.f32 %v11699_v30, %v11699_v30  ;;  %v5843_v40 = vpop.f32.mrb[185].mxu1 }
 0x66f   : > { %v5960_v62 = vadd.f32 %v5959_v17, %v5958_v7  ;;  %v11705_v57 = vpop.f32.mrb[186].mxu1 }
 0x670   : > { %v6061_v41 = vsel %vm1151_vm0, %v6010_v24, 0.0  ;;  %v5961_v29 = vsel %vm1151_vm0, %v11705_v57, 0.0  ;;  %v6011_v50 = vmul.f32 %v11705_v57, %v11705_v57  ;;  %v5846_v27 = vpop.f32.mrb[187].mxu1 }
 0x671   : > { %v6062_v38 = vadd.f32 %v6061_v41, %v6060_v37  ;;  %v5962_v54 = vadd.f32 %v5961_v29, %v5960_v62  ;;  %v11751_v41 = vpop.permute.xlu0 %6247 }
 0x672   : > { %v6063_v52 = vsel %vm1151_vm0, %v6011_v50, 0.0  ;;  %12288 = vst [vmem:[#allocation16_spill] sm:$0xff] %v11751_v41  ;;  %v11753_v50 = vpop.permute.xlu1 %6233 }
 0x673   : > { %v6064_v32 = vadd.f32 %v6063_v52, %v6062_v38 }
 0x675   : > { %v11715_v26 = vpop.f32.mrb[188].mxu1 }
 0x676   : > { %v5963_v4 = vsel %vm1151_vm0, %v11715_v26, 0.0  ;;  %v6012_v12 = vmul.f32 %v11715_v26, %v11715_v26  ;;  %v5851_v2 = vpop.f32.mrb[189].mxu1 }
 0x677   : > { %v5964_v28 = vadd.f32 %v5963_v4, %v5962_v54  ;;  %v11723_v34 = vpop.f32.mrb[190].mxu1 }
 0x678   : > { %v6065_v56 = vsel %vm1151_vm0, %v6012_v12, 0.0  ;;  %v5965_v13 = vsel %vm1151_vm0, %v11723_v34, 0.0  ;;  %v6013_v36 = vmul.f32 %v11723_v34, %v11723_v34  ;;  %v5854_v63 = vpop.f32.mrb[191].mxu1 }
 0x679   : > { %v6066_v61 = vadd.f32 %v6065_v56, %v6064_v32  ;;  %v5966_v15 = vadd.f32 %v5965_v13, %v5964_v28  ;;  %v11768_v13 = vpop.permute.xlu0 %6251 }
 0x67a   : > { %v6067_v51 = vsel %vm1151_vm0, %v6013_v36, 0.0  ;;  %12289 = vst [vmem:[#allocation18_spill] sm:$0xff] %v11768_v13 }
 0x67b   : > { %v6068_v6 = vadd.f32 %v6067_v51, %v6066_v61  ;;  %v11770_v61 = vpop.permute.xlu1 %6237 }
 0x67d   : > { %v11735_v10 = vpop.f32.mrb[192].mxu1 }
 0x67e   : > { %v5967_v47 = vsel %vm1151_vm0, %v11735_v10, 0.0  ;;  %v6014_v14 = vmul.f32 %v11735_v10, %v11735_v10  ;;  %v5859_v43 = vpop.f32.mrb[193].mxu1 }
 0x67f   : > { %v5968_v55 = vadd.f32 %v5967_v47, %v5966_v15  ;;  %v11743_v22 = vpop.f32.mrb[194].mxu1 }
 0x680   : > { %v6069_v7 = vsel %vm1151_vm0, %v6014_v14, 0.0  ;;  %v5969_v49 = vsel %vm1151_vm0, %v11743_v22, 0.0  ;;  %v6015_v37 = vmul.f32 %v11743_v22, %v11743_v22  ;;  %v5862_v17 = vpop.f32.mrb[195].mxu1 }
 0x681   : > { %v6070_v24 = vadd.f32 %v6069_v7, %v6068_v6  ;;  %v5970_v40 = vadd.f32 %v5969_v49, %v5968_v55  ;;  %v11779_v55 = vpop.permute.xlu0 %6255 }
 0x682   : > { %v6071_v62 = vsel %vm1151_vm0, %v6015_v37, 0.0  ;;  %12290 = vst [vmem:[#allocation10_spill] sm:$0xff] %v11779_v55  ;;  %v11783_v37 = vpop.permute.xlu1 %6241 }
 0x683   : > { %v6072_v29 = vadd.f32 %v6071_v62, %v6070_v24 }
 0x685   : > { %v11755_v27 = vpop.f32.mrb[196].mxu1 }
 0x686   : > { %v5971_v38 = vsel %vm1151_vm0, %v11755_v27, 0.0  ;;  %v6016_v54 = vmul.f32 %v11755_v27, %v11755_v27  ;;  %v5867_v52 = vpop.f32.mrb[197].mxu1 }
 0x687   : > { %v5972_v32 = vadd.f32 %v5971_v38, %v5970_v40  ;;  %v11761_v4 = vpop.f32.mrb[198].mxu1 }
 0x688   : > { %v6073_v12 = vsel %vm1151_vm0, %v6016_v54, 0.0  ;;  %v5973_v2 = vsel %vm1151_vm0, %v11761_v4, 0.0  ;;  %v6017_v28 = vmul.f32 %v11761_v4, %v11761_v4  ;;  %v5870_v56 = vpop.f32.mrb[199].mxu1 }
 0x689   : > { %v6074_v36 = vadd.f32 %v6073_v12, %v6072_v29  ;;  %v5974_v63 = vadd.f32 %v5973_v2, %v5972_v32  ;;  %v11791_v32 = vpop.permute.xlu0 %6259  ;;  %v11795_v2 = vpop.permute.xlu1 %6245 }
 0x68a   : > { %v6075_v15 = vsel %vm1151_vm0, %v6017_v28, 0.0  ;;  %12291 = vst [vmem:[#allocation7_spill] sm:$0xff] %v11791_v32 }
 0x68b   : > { %v6076_v51 = vadd.f32 %v6075_v15, %v6074_v36 }
 0x68d   : > { %v11773_v6 = vpop.f32.mrb[200].mxu1 }
 0x68e   : > { %v5975_v47 = vsel %vm1151_vm0, %v11773_v6, 0.0  ;;  %v6018_v14 = vmul.f32 %v11773_v6, %v11773_v6  ;;  %v5875_v43 = vpop.f32.mrb[201].mxu1 }
 0x68f   : > { %v5976_v7 = vadd.f32 %v5975_v47, %v5974_v63  ;;  %v11781_v49 = vpop.f32.mrb[202].mxu1 }
 0x690   : > { %v6077_v17 = vsel %vm1151_vm0, %v6018_v14, 0.0  ;;  %v5977_v24 = vsel %vm1151_vm0, %v11781_v49, 0.0  ;;  %v6019_v40 = vmul.f32 %v11781_v49, %v11781_v49  ;;  %v5878_v62 = vpop.f32.mrb[203].mxu1 }
 0x691   : > { %v6078_v29 = vadd.f32 %v6077_v17, %v6076_v51  ;;  %v5978_v38 = vadd.f32 %v5977_v24, %v5976_v7 }
 0x692   : > { %v6079_v54 = vsel %vm1151_vm0, %v6019_v40, 0.0  ;;  %v11809_v40 = vpop.permute.xlu0 %6263 }
 0x693   : > { %v6080_v52 = vadd.f32 %v6079_v54, %v6078_v29 }
 0x695   : > { %v11793_v12 = vpop.f32.mrb[204].mxu1 }
 0x696   : > { %v5979_v28 = vsel %vm1151_vm0, %v11793_v12, 0.0  ;;  %v6020_v56 = vmul.f32 %v11793_v12, %v11793_v12  ;;  %v5883_v36 = vpop.f32.mrb[205].mxu1  ;;  %v11813_v32 = vpop.permute.xlu0 %6267 }
 0x697   : > { %v5980_v63 = vadd.f32 %v5979_v28, %v5978_v38  ;;  %v11801_v15 = vpop.f32.mrb[206].mxu1  ;;  %v11811_v38 = vpop.permute.xlu1 %6249 }
 0x698   : > { %v6081_v51 = vsel %vm1151_vm0, %v6020_v56, 0.0  ;;  %v5981_v47 = vsel %vm1151_vm0, %v11801_v15, 0.0  ;;  %v6021_v14 = vmul.f32 %v11801_v15, %v11801_v15  ;;  %v5886_v43 = vpop.f32.mrb[207].mxu1 }
 0x699   : > { %v6082_v7 = vadd.f32 %v6081_v51, %v6080_v52  ;;  %v5982_v17 = vadd.f32 %v5981_v47, %v5980_v63 }
 0x69a   : > { %v6083_v24 = vsel %vm1151_vm0, %v6021_v14, 0.0  ;;  %v11817_v14 = vpop.permute.xlu0 %6271 }
 0x69b   : > { %v5983_v62 = vrot.slane %v5982_v17, 4  ;;  %v6084_v29 = vadd.f32 %v6083_v24, %v6082_v7  ;;  %v11815_v41 = vpop.permute.xlu1 %6253  ;;  %12292 = vst [vmem:[#allocation19_spill] sm:$0xff] %v11817_v14 }
 0x69d   : > { %v5984_v54 = vadd.f32 %v5983_v62, %v5982_v17  ;;  %v6085_v28 = vrot.slane %v6084_v29, 4 }
 0x69f   : > { %v5985_v56 = vrot.slane %v5984_v54, 2  ;;  %v6086_v36 = vadd.f32 %v6085_v28, %v6084_v29  ;;  %v11821_v24 = vpop.permute.xlu1 %6257 }
 0x6a1   : > { %v5986_v55 = vadd.f32 %v5985_v56, %v5984_v54  ;;  %v6087_v13 = vrot.slane %v6086_v36, 2 }
 0x6a3   : > { %v5987_v52 = vrot.slane %v5986_v55, 1  ;;  %v6088_v63 = vadd.f32 %v6087_v13, %v6086_v36 }
 0x6a5   : > { %v5988_v51 = vadd.f32 %v5987_v52, %v5986_v55  ;;  %v6089_v47 = vrot.slane %v6088_v63, 1 }
 0x6a7   : > { %v11819_v43 = vmul.f32 0.00390625, %v5988_v51  ;;  %v6090_v7 = vadd.f32 %v6089_v47, %v6088_v63  ;;  %v11851_v63 = vpop.permute.xlu0 %6275  ;;  %v11859_v51 = vpop.permute.xlu1 %6261 }
 0x6a8   : > { %12293 = vst [vmem:[#allocation11_spill] sm:$0xff] %v11851_v63 }
 0x6a9   : > { %v6091_v17 = vmul.f32 0.00390625, %v6090_v7  ;;  %v6092_v62 = vmul.f32 %v11819_v43, %v11819_v43  ;;  %v6126_v29 = vsub.f32 %v11801_v15, %v11819_v43  ;;  %v6095_v54 = vsub.f32 %v11555_v16, %v11819_v43 }
 0x6aa   : > { %v6096_v13 = vsub.f32 %v11559_v23, %v11819_v43  ;;  %v6097_v55 = vsub.f32 %v11569_v1, %v11819_v43  ;;  %v6098_v28 = vsub.f32 %v11575_v45, %v11819_v43  ;;  %v6099_v56 = vsub.f32 %v11583_v44, %v11819_v43 }
 0x6ab   : > { %v6093_v36 = vsub.f32 %v6091_v17, %v6092_v62  ;;  %v6100_v52 = vsub.f32 %v11589_v48, %v11819_v43  ;;  %v6101_v15 = vsub.f32 %v11597_v18, %v11819_v43  ;;  %v6102_v16 = vsub.f32 %v11603_v58, %v11819_v43  ;;  %v11895_v17 = vpop.permute.xlu1 %6265 }
 0x6ac   : > { %v6103_v23 = vsub.f32 %v11611_v11, %v11819_v43  ;;  %v6104_v1 = vsub.f32 %v11617_v8, %v11819_v43  ;;  %v6105_v45 = vsub.f32 %v11625_v20, %v11819_v43  ;;  %v6106_v44 = vsub.f32 %v11631_v25, %v11819_v43 }
 0x6ad   : > { %v6094_v48 = vmax.f32 %v6093_v36, 0.0  ;;  %v6107_v18 = vsub.f32 %v11639_v46, %v11819_v43  ;;  %v6108_v58 = vsub.f32 %v11645_v53, %v11819_v43  ;;  %v6109_v11 = vsub.f32 %v11653_v60, %v11819_v43 }
 0x6ae   : > { %v6110_v8 = vsub.f32 %v11659_v9, %v11819_v43  ;;  %v6111_v20 = vsub.f32 %v11667_v5, %v11819_v43  ;;  %v6112_v25 = vsub.f32 %v11673_v21, %v11819_v43  ;;  %v6113_v46 = vsub.f32 %v11683_v42, %v11819_v43 }
 0x6af   : > { %v6127_v47 = vadd.f32 1e-05, %v6094_v48  ;;  %v6114_v53 = vsub.f32 %v11689_v39, %v11819_v43  ;;  %v6115_v60 = vsub.f32 %v11699_v30, %v11819_v43  ;;  %v6116_v9 = vsub.f32 %v11705_v57, %v11819_v43 }
 0x6b0   : > { %v6117_v5 = vsub.f32 %v11715_v26, %v11819_v43  ;;  %v6118_v21 = vsub.f32 %v11723_v34, %v11819_v43  ;;  %v6119_v42 = vsub.f32 %v11735_v10, %v11819_v43  ;;  %v6120_v39 = vsub.f32 %v11743_v22, %v11819_v43  ;;  %v11893_v10 = vpop.permute.xlu0 %6279 }
 0x6b1   : > { %8962 = vrsqrt.f32 %v6127_v47  ;;  %v6121_v30 = vsub.f32 %v11755_v27, %v11819_v43  ;;  %v6122_v57 = vsub.f32 %v11761_v4, %v11819_v43  ;;  %v6123_v26 = vsub.f32 %v11773_v6, %v11819_v43  ;;  %12294 = vst [vmem:[#allocation8_spill] sm:$0xff] %v11893_v10  ;;  %v11900_v27 = vpop.permute.xlu1 %6269 }
 0x6b2   : > { %v6124_v7 = vsub.f32 %v11781_v49, %v11819_v43  ;;  %v6125_v34 = vsub.f32 %v11793_v12, %v11819_v43 }
 0x6b4   : > { %v11897_v22 = vpop.permute.xlu0 %6283 }
 0x6b5   : > { %12295 = vst [vmem:[#allocation20_spill] sm:$0xff] %v11897_v22 }
 0x6bb   : > { %v8963_v62 = vpop.eup %8962 }
 0x6bc   : > { %v6160_v4 = vmul.f32 %v8963_v62, %v6126_v29  ;;  %v11904_v6 = vmul.f32 %v8963_v62, %v6095_v54  ;;  %v11906_v36 = vmul.f32 %v8963_v62, %v6096_v13  ;;  %v11908_v49 = vmul.f32 %v8963_v62, %v6097_v55  ;;  %v6288_v54 = vpop.permute.xlu0 %6287 }
 0x6bd   : > { %v11910_v12 = vmul.f32 %v8963_v62, %v6098_v28  ;;  %v11912_v43 = vmul.f32 %v8963_v62, %v6099_v56  ;;  %v11914_v48 = vmul.f32 %v8963_v62, %v6100_v52  ;;  %v11916_v47 = vmul.f32 %v8963_v62, %v6101_v15  ;;  %v11932_v52 = vpop.permute.xlu1 %6273 }
 0x6be   : > { %v6192_v22 = vmax.f32 %v6160_v4, 0.0  ;;  %v11918_v10 = vmul.f32 %v8963_v62, %v6102_v16  ;;  %v11920_v63 = vmul.f32 %v8963_v62, %v6103_v23  ;;  %v11922_v29 = vmul.f32 %v8963_v62, %v6104_v1 }
 0x6bf   : > { %v11924_v13 = vmul.f32 %v8963_v62, %v6105_v45  ;;  %v11926_v55 = vmul.f32 %v8963_v62, %v6106_v44  ;;  %v11928_v28 = vmul.f32 %v8963_v62, %v6107_v18  ;;  %v11930_v56 = vmul.f32 %v8963_v62, %v6108_v58 }
 0x6c0   : > { %v6352_v15 = vadd.f32 %v6288_v54, %v6192_v22  ;;  %v11934_v14 = vmul.f32 %v8963_v62, %v6109_v11  ;;  %v11936_v16 = vmul.f32 %v8963_v62, %v6110_v8  ;;  %v11938_v23 = vmul.f32 %v8963_v62, %v6111_v20 }
 0x6c1   : > { %v11940_v1 = vmul.f32 %v8963_v62, %v6112_v25  ;;  %v11942_v4 = vmul.f32 %v8963_v62, %v6113_v46  ;;  %v11944_v45 = vmul.f32 %v8963_v62, %v6114_v53  ;;  %v11946_v44 = vmul.f32 %v8963_v62, %v6115_v60 }
 0x6c2   : > { %6384 = vst.msk [vmem:[%s11948_s29 + $0xf8] sm:$0xff] %vm1151_vm0, %v6352_v15  ;;  %v11952_v18 = vmul.f32 %v8963_v62, %v6116_v9  ;;  %v11954_v58 = vmul.f32 %v8963_v62, %v6117_v5  ;;  %v11956_v11 = vmul.f32 %v8963_v62, %v6118_v21  ;;  %v11958_v8 = vmul.f32 %v8963_v62, %v6119_v42 }
 0x6c3   : > { %v11960_v20 = vmul.f32 %v8963_v62, %v6120_v39  ;;  %v11962_v25 = vmul.f32 %v8963_v62, %v6121_v30  ;;  %v11964_v46 = vmul.f32 %v8963_v62, %v6122_v57  ;;  %v11966_v53 = vmul.f32 %v8963_v62, %v6123_v26  ;;  %v11978_v57 = vpop.permute.xlu1 %6277 }
 0x6c4   : > { %v11968_v60 = vmul.f32 %v8963_v62, %v6124_v7  ;;  %v11970_v22 = vmul.f32 %v8963_v62, %v6125_v34  ;;  %v6161_v9 = vmax.f32 %v11904_v6, 0.0  ;;  %v6162_v5 = vmax.f32 %v11906_v36, 0.0 }
 0x6c5   : > { %v6163_v21 = vmax.f32 %v11908_v49, 0.0  ;;  %v6164_v42 = vmax.f32 %v11910_v12, 0.0  ;;  %v6165_v39 = vmax.f32 %v11912_v43, 0.0  ;;  %v6166_v30 = vmax.f32 %v11914_v48, 0.0 }
 0x6c6   : > { %v6167_v26 = vmax.f32 %v11916_v47, 0.0  ;;  %v6168_v7 = vmax.f32 %v11918_v10, 0.0  ;;  %v6169_v34 = vmax.f32 %v11920_v63, 0.0  ;;  %v6170_v62 = vmax.f32 %v11922_v29, 0.0 }
 0x6c7   : > { %v6171_v6 = vmax.f32 %v11924_v13, 0.0  ;;  %v6172_v36 = vmax.f32 %v11926_v55, 0.0  ;;  %v6173_v49 = vmax.f32 %v11928_v28, 0.0  ;;  %v6174_v12 = vmax.f32 %v11930_v56, 0.0 }
 0x6c8   : > { %v6175_v43 = vmax.f32 %v11934_v14, 0.0  ;;  %v6176_v48 = vmax.f32 %v11936_v16, 0.0  ;;  %v6177_v47 = vmax.f32 %v11938_v23, 0.0  ;;  %v6178_v10 = vmax.f32 %v11940_v1, 0.0 }
 0x6c9   : > { %v6179_v63 = vmax.f32 %v11942_v4, 0.0  ;;  %v6180_v29 = vmax.f32 %v11944_v45, 0.0  ;;  %v6181_v54 = vmax.f32 %v11946_v44, 0.0  ;;  %v6182_v13 = vmax.f32 %v11952_v18, 0.0  ;;  %v6282_v4 = vpop.permute.xlu1 %6281 }
 0x6ca   : > { %v6183_v55 = vmax.f32 %v11954_v58, 0.0  ;;  %v6184_v28 = vmax.f32 %v11956_v11, 0.0  ;;  %v6185_v14 = vmax.f32 %v11958_v8, 0.0  ;;  %v6186_v56 = vmax.f32 %v11960_v20, 0.0 }
 0x6cb   : > { %v6187_v15 = vmax.f32 %v11962_v25, 0.0  ;;  %v6188_v16 = vmax.f32 %v11964_v46, 0.0  ;;  %v6189_v23 = vmax.f32 %v11966_v53, 0.0  ;;  %v6190_v1 = vmax.f32 %v11968_v60, 0.0  ;;  %v12299_v53 = vld [vmem:[#allocation7_spill] sm:$0xff] }
 0x6cc   : > { %v6191_v45 = vmax.f32 %v11970_v22, 0.0  ;;  %v6321_v44 = vadd.f32 %v11725_v31, %v6161_v9  ;;  %v6322_v18 = vadd.f32 %v11681_v19, %v6162_v5  ;;  %v6323_v58 = vadd.f32 %v11737_v33, %v6163_v21  ;;  %v12300_v21 = vld [vmem:[#allocation19_spill] sm:$0xff] }
 0x6cd   : > { %v6324_v11 = vadd.f32 %v11697_v35, %v6164_v42  ;;  %v6325_v8 = vadd.f32 %v11753_v50, %v6165_v39  ;;  %v6326_v20 = vadd.f32 %v11712_v0, %v6166_v30  ;;  %v6327_v25 = vadd.f32 %v11770_v61, %v6167_v26  ;;  %v12296_v35 = vld [vmem:[#allocation16_spill] sm:$0xff]  ;;  %v12297_v50 = vld [vmem:[#allocation18_spill] sm:$0xff]  ;;  %v6286_v5 = vpop.permute.xlu1 %6285  ;;  %v12301_v42 = vld [vmem:[#allocation11_spill] sm:$0xff] }
 0x6ce   : > { %v6328_v46 = vadd.f32 %v11721_v59, %v6168_v7  ;;  %v6329_v19 = vadd.f32 %v11783_v37, %v6169_v34  ;;  %v6330_v31 = vadd.f32 %v11733_v3, %v6170_v62  ;;  %v6331_v33 = vadd.f32 %v11795_v2, %v6171_v6  ;;  %6353 = vst.msk [vmem:[%s11948_s29] sm:$0xff] %vm1151_vm0, %v6321_v44  ;;  %v12298_v37 = vld [vmem:[#allocation10_spill] sm:$0xff] }
 0x6cf   : > { %6354 = vst.msk [vmem:[%s11948_s29 + $0x8] sm:$0xff] %vm1151_vm0, %v6322_v18  ;;  %6355 = vst.msk [vmem:[%s11948_s29 + $0x10] sm:$0xff] %vm1151_vm0, %v6323_v58  ;;  %v6332_v0 = vadd.f32 %v12296_v35, %v6172_v36  ;;  %v6333_v59 = vadd.f32 %v11811_v38, %v6173_v49  ;;  %v6334_v61 = vadd.f32 %v12297_v50, %v6174_v12 }
 0x6d0   : > { %v6335_v3 = vadd.f32 %v11815_v41, %v6175_v43  ;;  %6356 = vst.msk [vmem:[%s11948_s29 + $0x18] sm:$0xff] %vm1151_vm0, %v6324_v11  ;;  %6357 = vst.msk [vmem:[%s11948_s29 + $0x20] sm:$0xff] %vm1151_vm0, %v6325_v8  ;;  %v6336_v2 = vadd.f32 %v12298_v37, %v6176_v48  ;;  %v6337_v38 = vadd.f32 %v11821_v24, %v6177_v47 }
 0x6d1   : > { %6358 = vst.msk [vmem:[%s11948_s29 + $0x28] sm:$0xff] %vm1151_vm0, %v6326_v20  ;;  %6359 = vst.msk [vmem:[%s11948_s29 + $0x30] sm:$0xff] %vm1151_vm0, %v6327_v25  ;;  %v6338_v41 = vadd.f32 %v12299_v53, %v6178_v10  ;;  %v6339_v60 = vadd.f32 %v11859_v51, %v6179_v63  ;;  %v6340_v22 = vadd.f32 %v11809_v40, %v6180_v29 }
 0x6d2   : > { %6360 = vst.msk [vmem:[%s11948_s29 + $0x38] sm:$0xff] %vm1151_vm0, %v6328_v46  ;;  %6361 = vst.msk [vmem:[%s11948_s29 + $0x40] sm:$0xff] %vm1151_vm0, %v6329_v19  ;;  %v6341_v24 = vadd.f32 %v11895_v17, %v6181_v54  ;;  %v6342_v9 = vadd.f32 %v11813_v32, %v6182_v13  ;;  %v6343_v51 = vadd.f32 %v11900_v27, %v6183_v55 }
 0x6d3   : > { %6362 = vst.msk [vmem:[%s11948_s29 + $0x48] sm:$0xff] %vm1151_vm0, %v6330_v31  ;;  %6363 = vst.msk [vmem:[%s11948_s29 + $0x50] sm:$0xff] %vm1151_vm0, %v6331_v33  ;;  %v6344_v40 = vadd.f32 %v12300_v21, %v6184_v28  ;;  %v6345_v17 = vadd.f32 %v11932_v52, %v6185_v14  ;;  %v6346_v32 = vadd.f32 %v12301_v42, %v6186_v56  ;;  %v12302_v52 = vld [vmem:[#allocation8_spill] sm:$0xff] }
 0x6d4   : > { %6364 = vst.msk [vmem:[%s11948_s29 + $0x58] sm:$0xff] %vm1151_vm0, %v6332_v0  ;;  %6365 = vst.msk [vmem:[%s11948_s29 + $0x60] sm:$0xff] %vm1151_vm0, %v6333_v59  ;;  %v6347_v27 = vadd.f32 %v11978_v57, %v6187_v15  ;;  %v6348_v39 = vadd.f32 %v12302_v52, %v6188_v16  ;;  %v6349_v30 = vadd.f32 %v6282_v4, %v6189_v23  ;;  %v12303_v57 = vld [vmem:[#allocation20_spill] sm:$0xff] }
 0x6d5   : > { %6366 = vst.msk [vmem:[%s11948_s29 + $0x68] sm:$0xff] %vm1151_vm0, %v6334_v61  ;;  %6367 = vst.msk [vmem:[%s11948_s29 + $0x70] sm:$0xff] %vm1151_vm0, %v6335_v3  ;;  %v6350_v26 = vadd.f32 %v12303_v57, %v6190_v1  ;;  %v6351_v7 = vadd.f32 %v6286_v5, %v6191_v45 }
 0x6d6   : > { %6368 = vst.msk [vmem:[%s11948_s29 + $0x78] sm:$0xff] %vm1151_vm0, %v6336_v2  ;;  %6369 = vst.msk [vmem:[%s11948_s29 + $0x80] sm:$0xff] %vm1151_vm0, %v6337_v38 }
 0x6d7   : > { %6370 = vst.msk [vmem:[%s11948_s29 + $0x88] sm:$0xff] %vm1151_vm0, %v6338_v41  ;;  %6371 = vst.msk [vmem:[%s11948_s29 + $0x90] sm:$0xff] %vm1151_vm0, %v6339_v60 }
 0x6d8   : > { %6372 = vst.msk [vmem:[%s11948_s29 + $0x98] sm:$0xff] %vm1151_vm0, %v6340_v22  ;;  %6373 = vst.msk [vmem:[%s11948_s29 + $0xa0] sm:$0xff] %vm1151_vm0, %v6341_v24 }
 0x6d9   : > { %6374 = vst.msk [vmem:[%s11948_s29 + $0xa8] sm:$0xff] %vm1151_vm0, %v6342_v9  ;;  %6375 = vst.msk [vmem:[%s11948_s29 + $0xb0] sm:$0xff] %vm1151_vm0, %v6343_v51 }
 0x6da   : > { %6376 = vst.msk [vmem:[%s11948_s29 + $0xb8] sm:$0xff] %vm1151_vm0, %v6344_v40  ;;  %6377 = vst.msk [vmem:[%s11948_s29 + $0xc0] sm:$0xff] %vm1151_vm0, %v6345_v17 }
 0x6db   : > { %6378 = vst.msk [vmem:[%s11948_s29 + $0xc8] sm:$0xff] %vm1151_vm0, %v6346_v32  ;;  %6379 = vst.msk [vmem:[%s11948_s29 + $0xd0] sm:$0xff] %vm1151_vm0, %v6347_v27 }
 0x6dc   : > { %6380 = vst.msk [vmem:[%s11948_s29 + $0xd8] sm:$0xff] %vm1151_vm0, %v6348_v39  ;;  %6381 = vst.msk [vmem:[%s11948_s29 + $0xe0] sm:$0xff] %vm1151_vm0, %v6349_v30 }
 0x6dd   : > { %6382 = vst.msk [vmem:[%s11948_s29 + $0xe8] sm:$0xff] %vm1151_vm0, %v6350_v26  ;;  %6383 = vst.msk [vmem:[%s11948_s29 + $0xf0] sm:$0xff] %vm1151_vm0, %v6351_v7 }
 0x6de   : > { %8978 = shalt.err (!%p8975_p3)
}
 0x6df   : > { %s8979_s11 = scalar_lea.hbm %s12075_s7, 4096  ;;  %s8983_s20 = scalar_lea.hbm %s12152_s4, 8192 }
 0x6e0   : > { %p8980_p4 = scmp.ne.s32.totalorder %s12075_s7, %s8979_s11  ;;  %p8984_p9 = scmp.lt.u32.totalorder %s12075_s7, %s12152_s4 }
 0x6e1   : > { %p8985_p10 = scmp.lt.u32.totalorder %s8983_s20, %s8979_s11  ;;  %p8987_p12 = scmp.lt.u32.totalorder %s8979_s11, %s12075_s7 }
 0x6e2   : > { %p8981_p7 = pnand %p8980_p4, %p9097_p5 }
 0x6e3   : > { %p8986_p11 = por %p8985_p10, %p8984_p9 }
 0x6e4   : > { %p8982_p8 = pneg %p8981_p7 }
 0x6e5   : > { %p8988_p13 = por %p8987_p12, %p8986_p11 }
 0x6e7   : > { %p8989_p0 = pnand %p8988_p13, %p8982_p8 }
 0x6e9   : > { %8992 = shalt.err (!%p8989_p0)
}
 0x6ea   : > { %s9032_s28 = smov 128   ;;  %s9033_s29 = smov 8  }
 0x6eb   : > { %8527 = dma.vmem_to_hbm [thread:$0]  (%p9097_p5), %s12077_s5, 4096, %s12075_s7, %s12107_s8, %s9032_s28, %s9032_s28, %s9033_s29  }
 0x6ec PF: > { %p8533_p1 = scmp.ge.s32.totalorder %s9027_s18, 2  ;;  %s6414_s30 = sand.u32 1, %s9015_s15  }
 0x6ed   : > { %s6415_s19 = scalar_lea.sflag [#allocation4], %s6414_s30 }
 0x6ee   : > { %p8530_p2 = pnand %p8533_p1, %p9101_p6 }
 0x6f0   : > { %9010 = dma.done.wait (!%p8530_p2), %s6415_s19, 4096  }
 0x6f1   : > { %9012 = vsyncadd (!%p8530_p2), %s6415_s19, 4294963200  ;;  %p14_p3 = scmp.ge.s32.totalorder %s9084_s21, 4   ;;  %s12304_s15 = smov %s9019_s16 }
 0x6f2   : > { %s12305_s16 = smov %s9023_s17  ;;  %s12306_s17 = smov %s9095_s24 }
 0x6f3   : > { %s12307_s18 = smov %s9084_s21  ;;  %16 = sbr.rel (!%p14_p3) target bundleno = 3 (0x3), region = 80 }
 0x6fa   :  { %6420 = vsyncpa [#allocation4], 1 }
 0x6fb   :  { %6422 = vsyncpa [#allocation4 + $0x1], 1 }

</bundles_post_ra>
